<compile_context>
chip_gen: v7x
topology: tpu7x:2x2x1
jax: 0.10.0
libtpu: 0.0.40
codegen_flags: <defaults>
</compile_context>

<pallas_src>
import math

import jax
import jax.numpy as jnp
from jax.experimental import pallas as pl
from jax.experimental.pallas import tpu as pltpu

# ----------------------- tiny synthetic BERT config -----------------------
VOCAB = 128
MAX_POS = 16
TYPE_VOCAB = 2
HIDDEN = 32
NUM_HEADS = 4
HEAD_DIM = HIDDEN // NUM_HEADS
INTERMEDIATE = 64
NUM_LAYERS = 2
NUM_CLASSES = 3
LN_EPS = 1e-12
PAD = 128                       # lane-dense padded width for activations / weights
QKV_W = 3 * NUM_HEADS * PAD     # fused head-slotted QKV width

_VMEM = pl.BlockSpec(memory_space=pltpu.MemorySpace.VMEM)


# ------------------------------ fused kernel --------------------------------
def _make_fused_call(batch, seq):
    rows = batch * seq
    f32 = jnp.float32
    bf16 = jnp.bfloat16
    scale = 1.0 / math.sqrt(HEAD_DIM)
    c_gelu = math.sqrt(2.0 / math.pi)

    def kernel(emb_ref, mask_ref, embg_ref, embb_ref,
               wqkv_ref, bqkv_ref, wo_ref, bo_ref, ln1g_ref, ln1b_ref,
               wi_ref, bi_ref, wo2_ref, bo2_ref, ln2g_ref, ln2b_ref,
               poolw_ref, poolb_ref, clsw_ref, clsb_ref, out_ref):
        lane = jax.lax.broadcasted_iota(jnp.int32, (1, PAD), 1)
        hmask = (lane < HIDDEN).astype(f32)           # valid-hidden lane mask

        def layernorm_residual(x, res, g, b):
            """LayerNorm(x + res) over the first HIDDEN lanes; padded lanes stay exactly 0
            (g/b are zero-padded). Invariant: inputs must be exactly 0 in lanes >= HIDDEN."""
            y = x + res
            mu = jnp.sum(y, axis=-1, keepdims=True) * (1.0 / HIDDEN)
            d = (y - mu) * hmask
            var = jnp.sum(d * d, axis=-1, keepdims=True) * (1.0 / HIDDEN)
            return d * jax.lax.rsqrt(var + LN_EPS) * g + b

        def mxu(a, w_bf16):
            """Dense matmul: bf16 operands into the MXU, f32 accumulation."""
            return jnp.dot(a.astype(bf16), w_bf16, preferred_element_type=f32)

        # --- additive attention bias built in-kernel (never materialized in HBM) ---
        key_ok = mask_ref[...]                                           # (1, rows) 1.0/0.0
        ri = jax.lax.broadcasted_iota(jnp.int32, (rows, rows), 0).astype(f32)
        ci = jax.lax.broadcasted_iota(jnp.int32, (rows, rows), 1).astype(f32)
        # batch id = floor(i / seq); exact here because seq is a power of two
        same = (jnp.floor(ri * (1.0 / seq)) == jnp.floor(ci * (1.0 / seq))).astype(f32)
        attn_bias = (1.0 - same * key_ok) * (-10000.0)                   # (rows, rows)

        # --- embedding: zero-pad to 128 lanes in-kernel, then LayerNorm ---
        x = jnp.concatenate(
            [emb_ref[...], jnp.zeros((rows, PAD - HIDDEN), f32)], axis=-1)
        x = layernorm_residual(x, 0.0, embg_ref[...], embb_ref[...])     # (rows, 128)

        # --- encoder layers (static unroll) ---
        for l in range(NUM_LAYERS):
            # fused, head-slotted QKV projection: lanes = [Q_h0..Q_h3 | K_h0..K_h3 | V_h0..V_h3],
            # one 128-lane slot per head -> all per-head slices below are lane-aligned views.
            qkv = mxu(x, wqkv_ref[l]) + bqkv_ref[l]                      # (rows, QKV_W)

            ctx = jnp.zeros((rows, PAD), f32)
            for h in range(NUM_HEADS):
                q = qkv[:, h * PAD:(h + 1) * PAD]
                k = qkv[:, (NUM_HEADS + h) * PAD:(NUM_HEADS + h + 1) * PAD]
                v = qkv[:, (2 * NUM_HEADS + h) * PAD:(2 * NUM_HEADS + h + 1) * PAD]
                s = jnp.einsum("qd,kd->qk", q.astype(bf16), k.astype(bf16),
                               preferred_element_type=f32) * scale
                s = s + attn_bias                      # HF -10000 mask + cross-batch exclusion
                s = s - jnp.max(s, axis=-1, keepdims=True)
                p = jnp.exp(s)
                p = p * pl.reciprocal(jnp.sum(p, axis=-1, keepdims=True), approx=True)
                # V is packed at the head's own lane offsets, so this context already sits in
                # the right lanes; summing disjoint-lane contexts == concatenating heads.
                ctx = ctx + jnp.dot(p.astype(bf16), v.astype(bf16),
                                    preferred_element_type=f32)
            # single merged output projection (one K=128 bf16 MXU matmul for all heads)
            attn = mxu(ctx, wo_ref[l]) + bo_ref[l]
            x = layernorm_residual(attn, x, ln1g_ref[l], ln1b_ref[l])

            # feed-forward
            inter = mxu(x, wi_ref[l]) + bi_ref[l]
            # TODO(synk): HF BERT uses exact erf GELU; tanh approximation used (Mosaic-safe).
            inter = 0.5 * inter * (1.0 + jnp.tanh(
                c_gelu * (inter + 0.044715 * inter * inter * inter)))
            ffn = mxu(inter, wo2_ref[l]) + bo2_ref[l]
            x = layernorm_residual(ffn, x, ln2g_ref[l], ln2b_ref[l])

        # --- pooler + classifier + softmax on the B CLS rows only ---
        cls = jnp.concatenate([x[b * seq:b * seq + 1, :] for b in range(batch)], axis=0)
        pooled = jnp.tanh(mxu(cls, poolw_ref[...]) + poolb_ref[...])     # (B, 128)
        logits = mxu(pooled, clsw_ref[...]) + clsb_ref[...]
        logits = logits + (lane >= NUM_CLASSES).astype(f32) * (-1e9)     # mask padded classes
        logits = logits - jnp.max(logits, axis=-1, keepdims=True)
        e = jnp.exp(logits)
        out_ref[...] = e / jnp.sum(e, axis=-1, keepdims=True)            # exact normalization

    return pl.pallas_call(
        kernel,
        out_shape=jax.ShapeDtypeStruct((batch, PAD), jnp.float32),
        in_specs=[_VMEM] * 20,
        out_specs=_VMEM,
    )


# --------------------------- parameter init / packing ------------------------
class _Init:
    def __init__(self, key):
        self.key = key

    def normal(self, shape):
        self.key, sub = jax.random.split(self.key)
        return (0.02 * jax.random.normal(sub, shape)).astype(jnp.float32)


def init_params(key):
    ini = _Init(key)
    params = {
        "word_emb": ini.normal((VOCAB, HIDDEN)),
        "pos_emb": ini.normal((MAX_POS, HIDDEN)),
        "type_emb": ini.normal((TYPE_VOCAB, HIDDEN)),
        "emb_ln_g": jnp.ones((HIDDEN,), jnp.float32),
        "emb_ln_b": jnp.zeros((HIDDEN,), jnp.float32),
        "layers": [],
        "pool_w": ini.normal((HIDDEN, HIDDEN)),
        "pool_b": jnp.zeros((HIDDEN,), jnp.float32),
        "cls_w": ini.normal((HIDDEN, NUM_CLASSES)),
        "cls_b": jnp.zeros((NUM_CLASSES,), jnp.float32),
    }
    for _ in range(NUM_LAYERS):
        params["layers"].append({
            "wq": ini.normal((HIDDEN, HIDDEN)), "bq": jnp.zeros((HIDDEN,), jnp.float32),
            "wk": ini.normal((HIDDEN, HIDDEN)), "bk": jnp.zeros((HIDDEN,), jnp.float32),
            "wv": ini.normal((HIDDEN, HIDDEN)), "bv": jnp.zeros((HIDDEN,), jnp.float32),
            "wo": ini.normal((HIDDEN, HIDDEN)), "bo": jnp.zeros((HIDDEN,), jnp.float32),
            "ln1_g": jnp.ones((HIDDEN,), jnp.float32), "ln1_b": jnp.zeros((HIDDEN,), jnp.float32),
            "wi": ini.normal((HIDDEN, INTERMEDIATE)), "bi": jnp.zeros((INTERMEDIATE,), jnp.float32),
            "wo2": ini.normal((INTERMEDIATE, HIDDEN)), "bo2": jnp.zeros((HIDDEN,), jnp.float32),
            "ln2_g": jnp.ones((HIDDEN,), jnp.float32), "ln2_b": jnp.zeros((HIDDEN,), jnp.float32),
        })
    return params


def _pad_mat(a):
    out = jnp.zeros((PAD, PAD), jnp.float32)
    return out.at[:a.shape[0], :a.shape[1]].set(a)


def _pad_row(v):
    out = jnp.zeros((1, PAD), jnp.float32)
    return out.at[0, :v.shape[0]].set(v)


def _head_slotted_qkv(L):
    """Pack Q/K/V into per-head 128-lane slots. Each head's weights keep their original lane
    offsets inside the slot (so the per-head attention context lands in the right lanes for
    the merged output projection); all other lanes are exactly zero."""
    w = jnp.zeros((PAD, QKV_W), jnp.float32)
    b = jnp.zeros((1, QKV_W), jnp.float32)
    parts = ((L["wq"], L["bq"]), (L["wk"], L["bk"]), (L["wv"], L["bv"]))
    for kind, (wm, bv) in enumerate(parts):
        for h in range(NUM_HEADS):
            lo = h * HEAD_DIM
            slot = (kind * NUM_HEADS + h) * PAD
            w = w.at[:HIDDEN, slot + lo:slot + lo + HEAD_DIM].set(wm[:, lo:lo + HEAD_DIM])
            b = b.at[0, slot + lo:slot + lo + HEAD_DIM].set(bv[lo:lo + HEAD_DIM])
    return w, b


def pack_params(p):
    """One-time packing: head-slotted fused QKV, zero-pad everything to lane-dense 128-wide
    layouts, stack per-layer tensors along a leading dim, cast all dense weights to bf16."""
    bf16 = jnp.bfloat16
    layers = p["layers"]

    def stack_mat(fn, dtype=jnp.float32):
        return jnp.stack([_pad_mat(fn(L)) for L in layers]).astype(dtype)

    def stack_row(fn):
        return jnp.stack([_pad_row(fn(L)) for L in layers])

    qkv_packed = [_head_slotted_qkv(L) for L in layers]
    return {
        "word_emb": p["word_emb"], "pos_emb": p["pos_emb"], "type_emb": p["type_emb"],
        "emb_g": _pad_row(p["emb_ln_g"]), "emb_b": _pad_row(p["emb_ln_b"]),
        "wqkv": jnp.stack([w for w, _ in qkv_packed]).astype(bf16),
        "bqkv": jnp.stack([b for _, b in qkv_packed]),
        "wo": stack_mat(lambda L: L["wo"], bf16),
        "bo": stack_row(lambda L: L["bo"]),
        "ln1g": stack_row(lambda L: L["ln1_g"]), "ln1b": stack_row(lambda L: L["ln1_b"]),
        "wi": stack_mat(lambda L: L["wi"], bf16),
        "bi": stack_row(lambda L: L["bi"]),
        "wo2": stack_mat(lambda L: L["wo2"], bf16),
        "bo2": stack_row(lambda L: L["bo2"]),
        "ln2g": stack_row(lambda L: L["ln2_g"]), "ln2b": stack_row(lambda L: L["ln2_b"]),
        "pool_w": _pad_mat(p["pool_w"]).astype(bf16), "pool_b": _pad_row(p["pool_b"]),
        "cls_w": _pad_mat(p["cls_w"]).astype(bf16), "cls_b": _pad_row(p["cls_b"]),
    }


# ------------------------------ forward pass ---------------------------------
@jax.jit
def bert_sentence_classification_forward(packed, input_ids, attention_mask):
    b, s = input_ids.shape
    rows = b * s

    # TODO(synk): embedding row-gather stays in JAX (data-dependent gather).
    emb = (packed["word_emb"][input_ids]
           + packed["pos_emb"][:s][None, :, :]
           + packed["type_emb"][0][None, None, :]).reshape(rows, HIDDEN)   # token_type_ids = 0
    key_ok = attention_mask.reshape(1, rows).astype(jnp.float32)

    probs_full = _make_fused_call(b, s)(
        emb, key_ok, packed["emb_g"], packed["emb_b"],
        packed["wqkv"], packed["bqkv"], packed["wo"], packed["bo"],
        packed["ln1g"], packed["ln1b"], packed["wi"], packed["bi"],
        packed["wo2"], packed["bo2"], packed["ln2g"], packed["ln2b"],
        packed["pool_w"], packed["pool_b"], packed["cls_w"], packed["cls_b"])

    # kernel already kept only the B CLS rows; slice back to NUM_CLASSES lanes
    return probs_full[:, :NUM_CLASSES]


# --------------------------------- main --------------------------------------
if __name__ == "__main__":
    key = jax.random.PRNGKey(0)
    k_par, k_ids = jax.random.split(key)

    params = init_params(k_par)
    packed = pack_params(params)

    B, S = 2, 8
    input_ids = jax.random.randint(k_ids, (B, S), 0, VOCAB, dtype=jnp.int32)
    attention_mask = jnp.array([[1, 1, 1, 1, 1, 1, 1, 1],
                                [1, 1, 1, 1, 1, 0, 0, 0]], dtype=jnp.int32)

    probs = bert_sentence_classification_forward(packed, input_ids, attention_mask)
    probs = jax.block_until_ready(probs)

    assert probs.shape == (B, NUM_CLASSES)
    assert bool(jnp.all(jnp.abs(jnp.sum(probs, axis=1) - 1.0) < 1e-4))
    print("KERNEL_OK")
</pallas_src>

<mosaic_0001>
module attributes {stable_mosaic.version = 11 : i64} {
  func.func @kernel(%arg0: memref<16x32xf32, #tpu.memory_space<vmem>>, %arg1: memref<1x16xf32, #tpu.memory_space<vmem>>, %arg2: memref<1x128xf32, #tpu.memory_space<vmem>>, %arg3: memref<1x128xf32, #tpu.memory_space<vmem>>, %arg4: memref<2x128x1536xbf16, #tpu.memory_space<vmem>>, %arg5: memref<2x1x1536xf32, #tpu.memory_space<vmem>>, %arg6: memref<2x128x128xbf16, #tpu.memory_space<vmem>>, %arg7: memref<2x1x128xf32, #tpu.memory_space<vmem>>, %arg8: memref<2x1x128xf32, #tpu.memory_space<vmem>>, %arg9: memref<2x1x128xf32, #tpu.memory_space<vmem>>, %arg10: memref<2x128x128xbf16, #tpu.memory_space<vmem>>, %arg11: memref<2x1x128xf32, #tpu.memory_space<vmem>>, %arg12: memref<2x128x128xbf16, #tpu.memory_space<vmem>>, %arg13: memref<2x1x128xf32, #tpu.memory_space<vmem>>, %arg14: memref<2x1x128xf32, #tpu.memory_space<vmem>>, %arg15: memref<2x1x128xf32, #tpu.memory_space<vmem>>, %arg16: memref<128x128xbf16, #tpu.memory_space<vmem>>, %arg17: memref<1x128xf32, #tpu.memory_space<vmem>>, %arg18: memref<128x128xbf16, #tpu.memory_space<vmem>>, %arg19: memref<1x128xf32, #tpu.memory_space<vmem>>, %arg20: memref<2x128xf32, #tpu.memory_space<vmem>>) attributes {dimension_semantics = [], scalar_prefetch = 0 : i64, scratch_operands = 0 : i64, tpu.core_type = #tpu.core_type<tc>} {
    %0 = tpu.iota {dimensions = array<i32: 1>} : vector<1x128xi32>
    %c32_i32 = arith.constant 32 : i32
    %1 = vector.broadcast %c32_i32 : i32 to vector<1x128xi32>
    %2 = arith.cmpi slt, %0, %1 : vector<1x128xi32>
    %3 = arith.extui %2 : vector<1x128xi1> to vector<1x128xi32>
    %4 = arith.sitofp %3 : vector<1x128xi32> to vector<1x128xf32>
    %c0 = arith.constant 0 : index
    %c0_0 = arith.constant 0 : index
    %5 = vector.load %arg1[%c0, %c0_0] : memref<1x16xf32, #tpu.memory_space<vmem>>, vector<1x16xf32>
    %6 = tpu.iota {dimensions = array<i32: 0>} : vector<16x16xi32>
    %7 = arith.sitofp %6 : vector<16x16xi32> to vector<16x16xf32>
    %8 = tpu.iota {dimensions = array<i32: 1>} : vector<16x16xi32>
    %9 = arith.sitofp %8 : vector<16x16xi32> to vector<16x16xf32>
    %cst = arith.constant 1.250000e-01 : f32
    %10 = vector.broadcast %cst : f32 to vector<16x16xf32>
    %11 = arith.mulf %7, %10 : vector<16x16xf32>
    %12 = math.floor %11 : vector<16x16xf32>
    %cst_1 = arith.constant 1.250000e-01 : f32
    %13 = vector.broadcast %cst_1 : f32 to vector<16x16xf32>
    %14 = arith.mulf %9, %13 : vector<16x16xf32>
    %15 = math.floor %14 : vector<16x16xf32>
    %16 = arith.cmpf oeq, %12, %15 : vector<16x16xf32>
    %17 = arith.extui %16 : vector<16x16xi1> to vector<16x16xi32>
    %18 = arith.sitofp %17 : vector<16x16xi32> to vector<16x16xf32>
    %19 = vector.broadcast %5 : vector<1x16xf32> to vector<16x16xf32>
    %20 = arith.mulf %18, %19 : vector<16x16xf32>
    %cst_2 = arith.constant 1.000000e+00 : f32
    %21 = vector.broadcast %cst_2 : f32 to vector<16x16xf32>
    %22 = arith.subf %21, %20 : vector<16x16xf32>
    %cst_3 = arith.constant -1.000000e+04 : f32
    %23 = vector.broadcast %cst_3 : f32 to vector<16x16xf32>
    %24 = arith.mulf %22, %23 : vector<16x16xf32>
    %c0_4 = arith.constant 0 : index
    %c0_5 = arith.constant 0 : index
    %25 = vector.load %arg0[%c0_4, %c0_5] : memref<16x32xf32, #tpu.memory_space<vmem>>, vector<16x32xf32>
    %cst_6 = arith.constant 0.000000e+00 : f32
    %26 = vector.broadcast %cst_6 : f32 to vector<16x96xf32>
    %27 = tpu.concatenate %25, %26 in 1 : vector<16x32xf32>, vector<16x96xf32> -> vector<16x128xf32>
    %c0_7 = arith.constant 0 : index
    %c0_8 = arith.constant 0 : index
    %28 = vector.load %arg2[%c0_7, %c0_8] : memref<1x128xf32, #tpu.memory_space<vmem>>, vector<1x128xf32>
    %c0_9 = arith.constant 0 : index
    %c0_10 = arith.constant 0 : index
    %29 = vector.load %arg3[%c0_9, %c0_10] : memref<1x128xf32, #tpu.memory_space<vmem>>, vector<1x128xf32>
    %cst_11 = arith.constant 0.000000e+00 : f32
    %30 = vector.broadcast %cst_11 : f32 to vector<16x128xf32>
    %31 = arith.addf %27, %30 : vector<16x128xf32>
    %cst_12 = arith.constant dense<0.000000e+00> : vector<16xf32>
    %32 = vector.multi_reduction <add>, %31, %cst_12 [1] : vector<16x128xf32> to vector<16xf32>
    %33 = vector.shape_cast %32 : vector<16xf32> to vector<16x1xf32>
    %cst_13 = arith.constant 3.125000e-02 : f32
    %34 = vector.broadcast %cst_13 : f32 to vector<16x1xf32>
    %35 = arith.mulf %33, %34 : vector<16x1xf32>
    %36 = vector.broadcast %35 : vector<16x1xf32> to vector<16x128xf32>
    %37 = arith.subf %31, %36 : vector<16x128xf32>
    %38 = vector.broadcast %4 : vector<1x128xf32> to vector<16x128xf32>
    %39 = arith.mulf %37, %38 : vector<16x128xf32>
    %40 = arith.mulf %39, %39 : vector<16x128xf32>
    %cst_14 = arith.constant dense<0.000000e+00> : vector<16xf32>
    %41 = vector.multi_reduction <add>, %40, %cst_14 [1] : vector<16x128xf32> to vector<16xf32>
    %42 = vector.shape_cast %41 : vector<16xf32> to vector<16x1xf32>
    %cst_15 = arith.constant 3.125000e-02 : f32
    %43 = vector.broadcast %cst_15 : f32 to vector<16x1xf32>
    %44 = arith.mulf %42, %43 : vector<16x1xf32>
    %cst_16 = arith.constant 9.99999996E-13 : f32
    %45 = vector.broadcast %cst_16 : f32 to vector<16x1xf32>
    %46 = arith.addf %44, %45 : vector<16x1xf32>
    %47 = math.rsqrt %46 : vector<16x1xf32>
    %48 = vector.broadcast %47 : vector<16x1xf32> to vector<16x128xf32>
    %49 = arith.mulf %39, %48 : vector<16x128xf32>
    %50 = vector.broadcast %28 : vector<1x128xf32> to vector<16x128xf32>
    %51 = arith.mulf %49, %50 : vector<16x128xf32>
    %52 = vector.broadcast %29 : vector<1x128xf32> to vector<16x128xf32>
    %53 = arith.addf %51, %52 : vector<16x128xf32>
    %c0_17 = arith.constant 0 : index
    %c0_18 = arith.constant 0 : index
    %c0_19 = arith.constant 0 : index
    %54 = vector.load %arg4[%c0_17, %c0_18, %c0_19] : memref<2x128x1536xbf16, #tpu.memory_space<vmem>>, vector<1x128x1536xbf16>
    %55 = vector.shape_cast %54 : vector<1x128x1536xbf16> to vector<128x1536xbf16>
    %56 = arith.truncf %53 : vector<16x128xf32> to vector<16x128xbf16>
    %cst_20 = arith.constant dense<0.000000e+00> : vector<16x1536xf32>
    %57 = tpu.matmul %56, %55, %cst_20 {dimension_numbers = #tpu.dot_dimension_numbers<[1], [0], [0], [1], [0, 0, 1, 1], [], []>} : vector<16x128xbf16>, vector<128x1536xbf16>, vector<16x1536xf32> -> vector<16x1536xf32>
    %c0_21 = arith.constant 0 : index
    %c0_22 = arith.constant 0 : index
    %c0_23 = arith.constant 0 : index
    %58 = vector.load %arg5[%c0_21, %c0_22, %c0_23] : memref<2x1x1536xf32, #tpu.memory_space<vmem>>, vector<1x1x1536xf32>
    %59 = vector.shape_cast %58 : vector<1x1x1536xf32> to vector<1x1536xf32>
    %60 = vector.broadcast %59 : vector<1x1536xf32> to vector<16x1536xf32>
    %61 = arith.addf %57, %60 : vector<16x1536xf32>
    %cst_24 = arith.constant 0.000000e+00 : f32
    %62 = vector.broadcast %cst_24 : f32 to vector<16x128xf32>
    %63 = vector.extract_strided_slice %61 {offsets = [0, 0], sizes = [16, 128], strides = [1, 1]} : vector<16x1536xf32> to vector<16x128xf32>
    %64 = vector.extract_strided_slice %61 {offsets = [0, 512], sizes = [16, 128], strides = [1, 1]} : vector<16x1536xf32> to vector<16x128xf32>
    %65 = vector.extract_strided_slice %61 {offsets = [0, 1024], sizes = [16, 128], strides = [1, 1]} : vector<16x1536xf32> to vector<16x128xf32>
    %66 = arith.truncf %63 : vector<16x128xf32> to vector<16x128xbf16>
    %67 = arith.truncf %64 : vector<16x128xf32> to vector<16x128xbf16>
    "tpu.trace_start"() <{level = 10 : i32, message = "qd,kd->qk"}> : () -> ()
    %cst_25 = arith.constant dense<0.000000e+00> : vector<16x16xf32>
    %68 = tpu.matmul %66, %67, %cst_25 {dimension_numbers = #tpu.dot_dimension_numbers<[1], [1], [0], [0], [0, 0, 1, 0], [], []>} : vector<16x128xbf16>, vector<16x128xbf16>, vector<16x16xf32> -> vector<16x16xf32>
    "tpu.trace_stop"() : () -> ()
    %cst_26 = arith.constant 0.353553385 : f32
    %69 = vector.broadcast %cst_26 : f32 to vector<16x16xf32>
    %70 = arith.mulf %68, %69 : vector<16x16xf32>
    %71 = arith.addf %70, %24 : vector<16x16xf32>
    %cst_27 = arith.constant dense<0xFF800000> : vector<16xf32>
    %72 = vector.multi_reduction <maximumf>, %71, %cst_27 [1] : vector<16x16xf32> to vector<16xf32>
    %73 = vector.shape_cast %72 : vector<16xf32> to vector<16x1xf32>
    %74 = vector.broadcast %73 : vector<16x1xf32> to vector<16x16xf32>
    %75 = arith.subf %71, %74 : vector<16x16xf32>
    %76 = math.exp %75 : vector<16x16xf32>
    %cst_28 = arith.constant dense<0.000000e+00> : vector<16xf32>
    %77 = vector.multi_reduction <add>, %76, %cst_28 [1] : vector<16x16xf32> to vector<16xf32>
    %78 = vector.shape_cast %77 : vector<16xf32> to vector<16x1xf32>
    %79 = tpu.reciprocal %78 {approx = true} : vector<16x1xf32> -> vector<16x1xf32>
    %80 = vector.broadcast %79 : vector<16x1xf32> to vector<16x16xf32>
    %81 = arith.mulf %76, %80 : vector<16x16xf32>
    %82 = arith.truncf %81 : vector<16x16xf32> to vector<16x16xbf16>
    %83 = arith.truncf %65 : vector<16x128xf32> to vector<16x128xbf16>
    %cst_29 = arith.constant dense<0.000000e+00> : vector<16x128xf32>
    %84 = tpu.matmul %82, %83, %cst_29 {dimension_numbers = #tpu.dot_dimension_numbers<[1], [0], [0], [1], [0, 0, 1, 1], [], []>} : vector<16x16xbf16>, vector<16x128xbf16>, vector<16x128xf32> -> vector<16x128xf32>
    %85 = arith.addf %62, %84 : vector<16x128xf32>
    %86 = vector.extract_strided_slice %61 {offsets = [0, 128], sizes = [16, 128], strides = [1, 1]} : vector<16x1536xf32> to vector<16x128xf32>
    %87 = vector.extract_strided_slice %61 {offsets = [0, 640], sizes = [16, 128], strides = [1, 1]} : vector<16x1536xf32> to vector<16x128xf32>
    %88 = vector.extract_strided_slice %61 {offsets = [0, 1152], sizes = [16, 128], strides = [1, 1]} : vector<16x1536xf32> to vector<16x128xf32>
    %89 = arith.truncf %86 : vector<16x128xf32> to vector<16x128xbf16>
    %90 = arith.truncf %87 : vector<16x128xf32> to vector<16x128xbf16>
    "tpu.trace_start"() <{level = 10 : i32, message = "qd,kd->qk"}> : () -> ()
    %cst_30 = arith.constant dense<0.000000e+00> : vector<16x16xf32>
    %91 = tpu.matmul %89, %90, %cst_30 {dimension_numbers = #tpu.dot_dimension_numbers<[1], [1], [0], [0], [0, 0, 1, 0], [], []>} : vector<16x128xbf16>, vector<16x128xbf16>, vector<16x16xf32> -> vector<16x16xf32>
    "tpu.trace_stop"() : () -> ()
    %cst_31 = arith.constant 0.353553385 : f32
    %92 = vector.broadcast %cst_31 : f32 to vector<16x16xf32>
    %93 = arith.mulf %91, %92 : vector<16x16xf32>
    %94 = arith.addf %93, %24 : vector<16x16xf32>
    %cst_32 = arith.constant dense<0xFF800000> : vector<16xf32>
    %95 = vector.multi_reduction <maximumf>, %94, %cst_32 [1] : vector<16x16xf32> to vector<16xf32>
    %96 = vector.shape_cast %95 : vector<16xf32> to vector<16x1xf32>
    %97 = vector.broadcast %96 : vector<16x1xf32> to vector<16x16xf32>
    %98 = arith.subf %94, %97 : vector<16x16xf32>
    %99 = math.exp %98 : vector<16x16xf32>
    %cst_33 = arith.constant dense<0.000000e+00> : vector<16xf32>
    %100 = vector.multi_reduction <add>, %99, %cst_33 [1] : vector<16x16xf32> to vector<16xf32>
    %101 = vector.shape_cast %100 : vector<16xf32> to vector<16x1xf32>
    %102 = tpu.reciprocal %101 {approx = true} : vector<16x1xf32> -> vector<16x1xf32>
    %103 = vector.broadcast %102 : vector<16x1xf32> to vector<16x16xf32>
    %104 = arith.mulf %99, %103 : vector<16x16xf32>
    %105 = arith.truncf %104 : vector<16x16xf32> to vector<16x16xbf16>
    %106 = arith.truncf %88 : vector<16x128xf32> to vector<16x128xbf16>
    %cst_34 = arith.constant dense<0.000000e+00> : vector<16x128xf32>
    %107 = tpu.matmul %105, %106, %cst_34 {dimension_numbers = #tpu.dot_dimension_numbers<[1], [0], [0], [1], [0, 0, 1, 1], [], []>} : vector<16x16xbf16>, vector<16x128xbf16>, vector<16x128xf32> -> vector<16x128xf32>
    %108 = arith.addf %85, %107 : vector<16x128xf32>
    %109 = vector.extract_strided_slice %61 {offsets = [0, 256], sizes = [16, 128], strides = [1, 1]} : vector<16x1536xf32> to vector<16x128xf32>
    %110 = vector.extract_strided_slice %61 {offsets = [0, 768], sizes = [16, 128], strides = [1, 1]} : vector<16x1536xf32> to vector<16x128xf32>
    %111 = vector.extract_strided_slice %61 {offsets = [0, 1280], sizes = [16, 128], strides = [1, 1]} : vector<16x1536xf32> to vector<16x128xf32>
    %112 = arith.truncf %109 : vector<16x128xf32> to vector<16x128xbf16>
    %113 = arith.truncf %110 : vector<16x128xf32> to vector<16x128xbf16>
    "tpu.trace_start"() <{level = 10 : i32, message = "qd,kd->qk"}> : () -> ()
    %cst_35 = arith.constant dense<0.000000e+00> : vector<16x16xf32>
    %114 = tpu.matmul %112, %113, %cst_35 {dimension_numbers = #tpu.dot_dimension_numbers<[1], [1], [0], [0], [0, 0, 1, 0], [], []>} : vector<16x128xbf16>, vector<16x128xbf16>, vector<16x16xf32> -> vector<16x16xf32>
    "tpu.trace_stop"() : () -> ()
    %cst_36 = arith.constant 0.353553385 : f32
    %115 = vector.broadcast %cst_36 : f32 to vector<16x16xf32>
    %116 = arith.mulf %114, %115 : vector<16x16xf32>
    %117 = arith.addf %116, %24 : vector<16x16xf32>
    %cst_37 = arith.constant dense<0xFF800000> : vector<16xf32>
    %118 = vector.multi_reduction <maximumf>, %117, %cst_37 [1] : vector<16x16xf32> to vector<16xf32>
    %119 = vector.shape_cast %118 : vector<16xf32> to vector<16x1xf32>
    %120 = vector.broadcast %119 : vector<16x1xf32> to vector<16x16xf32>
    %121 = arith.subf %117, %120 : vector<16x16xf32>
    %122 = math.exp %121 : vector<16x16xf32>
    %cst_38 = arith.constant dense<0.000000e+00> : vector<16xf32>
    %123 = vector.multi_reduction <add>, %122, %cst_38 [1] : vector<16x16xf32> to vector<16xf32>
    %124 = vector.shape_cast %123 : vector<16xf32> to vector<16x1xf32>
    %125 = tpu.reciprocal %124 {approx = true} : vector<16x1xf32> -> vector<16x1xf32>
    %126 = vector.broadcast %125 : vector<16x1xf32> to vector<16x16xf32>
    %127 = arith.mulf %122, %126 : vector<16x16xf32>
    %128 = arith.truncf %127 : vector<16x16xf32> to vector<16x16xbf16>
    %129 = arith.truncf %111 : vector<16x128xf32> to vector<16x128xbf16>
    %cst_39 = arith.constant dense<0.000000e+00> : vector<16x128xf32>
    %130 = tpu.matmul %128, %129, %cst_39 {dimension_numbers = #tpu.dot_dimension_numbers<[1], [0], [0], [1], [0, 0, 1, 1], [], []>} : vector<16x16xbf16>, vector<16x128xbf16>, vector<16x128xf32> -> vector<16x128xf32>
    %131 = arith.addf %108, %130 : vector<16x128xf32>
    %132 = vector.extract_strided_slice %61 {offsets = [0, 384], sizes = [16, 128], strides = [1, 1]} : vector<16x1536xf32> to vector<16x128xf32>
    %133 = vector.extract_strided_slice %61 {offsets = [0, 896], sizes = [16, 128], strides = [1, 1]} : vector<16x1536xf32> to vector<16x128xf32>
    %134 = vector.extract_strided_slice %61 {offsets = [0, 1408], sizes = [16, 128], strides = [1, 1]} : vector<16x1536xf32> to vector<16x128xf32>
    %135 = arith.truncf %132 : vector<16x128xf32> to vector<16x128xbf16>
    %136 = arith.truncf %133 : vector<16x128xf32> to vector<16x128xbf16>
    "tpu.trace_start"() <{level = 10 : i32, message = "qd,kd->qk"}> : () -> ()
    %cst_40 = arith.constant dense<0.000000e+00> : vector<16x16xf32>
    %137 = tpu.matmul %135, %136, %cst_40 {dimension_numbers = #tpu.dot_dimension_numbers<[1], [1], [0], [0], [0, 0, 1, 0], [], []>} : vector<16x128xbf16>, vector<16x128xbf16>, vector<16x16xf32> -> vector<16x16xf32>
    "tpu.trace_stop"() : () -> ()
    %cst_41 = arith.constant 0.353553385 : f32
    %138 = vector.broadcast %cst_41 : f32 to vector<16x16xf32>
    %139 = arith.mulf %137, %138 : vector<16x16xf32>
    %140 = arith.addf %139, %24 : vector<16x16xf32>
    %cst_42 = arith.constant dense<0xFF800000> : vector<16xf32>
    %141 = vector.multi_reduction <maximumf>, %140, %cst_42 [1] : vector<16x16xf32> to vector<16xf32>
    %142 = vector.shape_cast %141 : vector<16xf32> to vector<16x1xf32>
    %143 = vector.broadcast %142 : vector<16x1xf32> to vector<16x16xf32>
    %144 = arith.subf %140, %143 : vector<16x16xf32>
    %145 = math.exp %144 : vector<16x16xf32>
    %cst_43 = arith.constant dense<0.000000e+00> : vector<16xf32>
    %146 = vector.multi_reduction <add>, %145, %cst_43 [1] : vector<16x16xf32> to vector<16xf32>
    %147 = vector.shape_cast %146 : vector<16xf32> to vector<16x1xf32>
    %148 = tpu.reciprocal %147 {approx = true} : vector<16x1xf32> -> vector<16x1xf32>
    %149 = vector.broadcast %148 : vector<16x1xf32> to vector<16x16xf32>
    %150 = arith.mulf %145, %149 : vector<16x16xf32>
    %151 = arith.truncf %150 : vector<16x16xf32> to vector<16x16xbf16>
    %152 = arith.truncf %134 : vector<16x128xf32> to vector<16x128xbf16>
    %cst_44 = arith.constant dense<0.000000e+00> : vector<16x128xf32>
    %153 = tpu.matmul %151, %152, %cst_44 {dimension_numbers = #tpu.dot_dimension_numbers<[1], [0], [0], [1], [0, 0, 1, 1], [], []>} : vector<16x16xbf16>, vector<16x128xbf16>, vector<16x128xf32> -> vector<16x128xf32>
    %154 = arith.addf %131, %153 : vector<16x128xf32>
    %c0_45 = arith.constant 0 : index
    %c0_46 = arith.constant 0 : index
    %c0_47 = arith.constant 0 : index
    %155 = vector.load %arg6[%c0_45, %c0_46, %c0_47] : memref<2x128x128xbf16, #tpu.memory_space<vmem>>, vector<1x128x128xbf16>
    %156 = vector.shape_cast %155 : vector<1x128x128xbf16> to vector<128x128xbf16>
    %157 = arith.truncf %154 : vector<16x128xf32> to vector<16x128xbf16>
    %cst_48 = arith.constant dense<0.000000e+00> : vector<16x128xf32>
    %158 = tpu.matmul %157, %156, %cst_48 {dimension_numbers = #tpu.dot_dimension_numbers<[1], [0], [0], [1], [0, 0, 1, 1], [], []>} : vector<16x128xbf16>, vector<128x128xbf16>, vector<16x128xf32> -> vector<16x128xf32>
    %c0_49 = arith.constant 0 : index
    %c0_50 = arith.constant 0 : index
    %c0_51 = arith.constant 0 : index
    %159 = vector.load %arg7[%c0_49, %c0_50, %c0_51] : memref<2x1x128xf32, #tpu.memory_space<vmem>>, vector<1x1x128xf32>
    %160 = vector.shape_cast %159 : vector<1x1x128xf32> to vector<1x128xf32>
    %161 = vector.broadcast %160 : vector<1x128xf32> to vector<16x128xf32>
    %162 = arith.addf %158, %161 : vector<16x128xf32>
    %c0_52 = arith.constant 0 : index
    %c0_53 = arith.constant 0 : index
    %c0_54 = arith.constant 0 : index
    %163 = vector.load %arg8[%c0_52, %c0_53, %c0_54] : memref<2x1x128xf32, #tpu.memory_space<vmem>>, vector<1x1x128xf32>
    %164 = vector.shape_cast %163 : vector<1x1x128xf32> to vector<1x128xf32>
    %c0_55 = arith.constant 0 : index
    %c0_56 = arith.constant 0 : index
    %c0_57 = arith.constant 0 : index
    %165 = vector.load %arg9[%c0_55, %c0_56, %c0_57] : memref<2x1x128xf32, #tpu.memory_space<vmem>>, vector<1x1x128xf32>
    %166 = vector.shape_cast %165 : vector<1x1x128xf32> to vector<1x128xf32>
    %167 = arith.addf %162, %53 : vector<16x128xf32>
    %cst_58 = arith.constant dense<0.000000e+00> : vector<16xf32>
    %168 = vector.multi_reduction <add>, %167, %cst_58 [1] : vector<16x128xf32> to vector<16xf32>
    %169 = vector.shape_cast %168 : vector<16xf32> to vector<16x1xf32>
    %cst_59 = arith.constant 3.125000e-02 : f32
    %170 = vector.broadcast %cst_59 : f32 to vector<16x1xf32>
    %171 = arith.mulf %169, %170 : vector<16x1xf32>
    %172 = vector.broadcast %171 : vector<16x1xf32> to vector<16x128xf32>
    %173 = arith.subf %167, %172 : vector<16x128xf32>
    %174 = vector.broadcast %4 : vector<1x128xf32> to vector<16x128xf32>
    %175 = arith.mulf %173, %174 : vector<16x128xf32>
    %176 = arith.mulf %175, %175 : vector<16x128xf32>
    %cst_60 = arith.constant dense<0.000000e+00> : vector<16xf32>
    %177 = vector.multi_reduction <add>, %176, %cst_60 [1] : vector<16x128xf32> to vector<16xf32>
    %178 = vector.shape_cast %177 : vector<16xf32> to vector<16x1xf32>
    %cst_61 = arith.constant 3.125000e-02 : f32
    %179 = vector.broadcast %cst_61 : f32 to vector<16x1xf32>
    %180 = arith.mulf %178, %179 : vector<16x1xf32>
    %cst_62 = arith.constant 9.99999996E-13 : f32
    %181 = vector.broadcast %cst_62 : f32 to vector<16x1xf32>
    %182 = arith.addf %180, %181 : vector<16x1xf32>
    %183 = math.rsqrt %182 : vector<16x1xf32>
    %184 = vector.broadcast %183 : vector<16x1xf32> to vector<16x128xf32>
    %185 = arith.mulf %175, %184 : vector<16x128xf32>
    %186 = vector.broadcast %164 : vector<1x128xf32> to vector<16x128xf32>
    %187 = arith.mulf %185, %186 : vector<16x128xf32>
    %188 = vector.broadcast %166 : vector<1x128xf32> to vector<16x128xf32>
    %189 = arith.addf %187, %188 : vector<16x128xf32>
    %c0_63 = arith.constant 0 : index
    %c0_64 = arith.constant 0 : index
    %c0_65 = arith.constant 0 : index
    %190 = vector.load %arg10[%c0_63, %c0_64, %c0_65] : memref<2x128x128xbf16, #tpu.memory_space<vmem>>, vector<1x128x128xbf16>
    %191 = vector.shape_cast %190 : vector<1x128x128xbf16> to vector<128x128xbf16>
    %192 = arith.truncf %189 : vector<16x128xf32> to vector<16x128xbf16>
    %cst_66 = arith.constant dense<0.000000e+00> : vector<16x128xf32>
    %193 = tpu.matmul %192, %191, %cst_66 {dimension_numbers = #tpu.dot_dimension_numbers<[1], [0], [0], [1], [0, 0, 1, 1], [], []>} : vector<16x128xbf16>, vector<128x128xbf16>, vector<16x128xf32> -> vector<16x128xf32>
    %c0_67 = arith.constant 0 : index
    %c0_68 = arith.constant 0 : index
    %c0_69 = arith.constant 0 : index
    %194 = vector.load %arg11[%c0_67, %c0_68, %c0_69] : memref<2x1x128xf32, #tpu.memory_space<vmem>>, vector<1x1x128xf32>
    %195 = vector.shape_cast %194 : vector<1x1x128xf32> to vector<1x128xf32>
    %196 = vector.broadcast %195 : vector<1x128xf32> to vector<16x128xf32>
    %197 = arith.addf %193, %196 : vector<16x128xf32>
    %cst_70 = arith.constant 5.000000e-01 : f32
    %198 = vector.broadcast %cst_70 : f32 to vector<16x128xf32>
    %199 = arith.mulf %198, %197 : vector<16x128xf32>
    %cst_71 = arith.constant 4.471500e-02 : f32
    %200 = vector.broadcast %cst_71 : f32 to vector<16x128xf32>
    %201 = arith.mulf %200, %197 : vector<16x128xf32>
    %202 = arith.mulf %201, %197 : vector<16x128xf32>
    %203 = arith.mulf %202, %197 : vector<16x128xf32>
    %204 = arith.addf %197, %203 : vector<16x128xf32>
    %cst_72 = arith.constant 0.797884583 : f32
    %205 = vector.broadcast %cst_72 : f32 to vector<16x128xf32>
    %206 = arith.mulf %205, %204 : vector<16x128xf32>
    %207 = math.tanh %206 : vector<16x128xf32>
    %cst_73 = arith.constant 1.000000e+00 : f32
    %208 = vector.broadcast %cst_73 : f32 to vector<16x128xf32>
    %209 = arith.addf %208, %207 : vector<16x128xf32>
    %210 = arith.mulf %199, %209 : vector<16x128xf32>
    %c0_74 = arith.constant 0 : index
    %c0_75 = arith.constant 0 : index
    %c0_76 = arith.constant 0 : index
    %211 = vector.load %arg12[%c0_74, %c0_75, %c0_76] : memref<2x128x128xbf16, #tpu.memory_space<vmem>>, vector<1x128x128xbf16>
    %212 = vector.shape_cast %211 : vector<1x128x128xbf16> to vector<128x128xbf16>
    %213 = arith.truncf %210 : vector<16x128xf32> to vector<16x128xbf16>
    %cst_77 = arith.constant dense<0.000000e+00> : vector<16x128xf32>
    %214 = tpu.matmul %213, %212, %cst_77 {dimension_numbers = #tpu.dot_dimension_numbers<[1], [0], [0], [1], [0, 0, 1, 1], [], []>} : vector<16x128xbf16>, vector<128x128xbf16>, vector<16x128xf32> -> vector<16x128xf32>
    %c0_78 = arith.constant 0 : index
    %c0_79 = arith.constant 0 : index
    %c0_80 = arith.constant 0 : index
    %215 = vector.load %arg13[%c0_78, %c0_79, %c0_80] : memref<2x1x128xf32, #tpu.memory_space<vmem>>, vector<1x1x128xf32>
    %216 = vector.shape_cast %215 : vector<1x1x128xf32> to vector<1x128xf32>
    %217 = vector.broadcast %216 : vector<1x128xf32> to vector<16x128xf32>
    %218 = arith.addf %214, %217 : vector<16x128xf32>
    %c0_81 = arith.constant 0 : index
    %c0_82 = arith.constant 0 : index
    %c0_83 = arith.constant 0 : index
    %219 = vector.load %arg14[%c0_81, %c0_82, %c0_83] : memref<2x1x128xf32, #tpu.memory_space<vmem>>, vector<1x1x128xf32>
    %220 = vector.shape_cast %219 : vector<1x1x128xf32> to vector<1x128xf32>
    %c0_84 = arith.constant 0 : index
    %c0_85 = arith.constant 0 : index
    %c0_86 = arith.constant 0 : index
    %221 = vector.load %arg15[%c0_84, %c0_85, %c0_86] : memref<2x1x128xf32, #tpu.memory_space<vmem>>, vector<1x1x128xf32>
    %222 = vector.shape_cast %221 : vector<1x1x128xf32> to vector<1x128xf32>
    %223 = arith.addf %218, %189 : vector<16x128xf32>
    %cst_87 = arith.constant dense<0.000000e+00> : vector<16xf32>
    %224 = vector.multi_reduction <add>, %223, %cst_87 [1] : vector<16x128xf32> to vector<16xf32>
    %225 = vector.shape_cast %224 : vector<16xf32> to vector<16x1xf32>
    %cst_88 = arith.constant 3.125000e-02 : f32
    %226 = vector.broadcast %cst_88 : f32 to vector<16x1xf32>
    %227 = arith.mulf %225, %226 : vector<16x1xf32>
    %228 = vector.broadcast %227 : vector<16x1xf32> to vector<16x128xf32>
    %229 = arith.subf %223, %228 : vector<16x128xf32>
    %230 = vector.broadcast %4 : vector<1x128xf32> to vector<16x128xf32>
    %231 = arith.mulf %229, %230 : vector<16x128xf32>
    %232 = arith.mulf %231, %231 : vector<16x128xf32>
    %cst_89 = arith.constant dense<0.000000e+00> : vector<16xf32>
    %233 = vector.multi_reduction <add>, %232, %cst_89 [1] : vector<16x128xf32> to vector<16xf32>
    %234 = vector.shape_cast %233 : vector<16xf32> to vector<16x1xf32>
    %cst_90 = arith.constant 3.125000e-02 : f32
    %235 = vector.broadcast %cst_90 : f32 to vector<16x1xf32>
    %236 = arith.mulf %234, %235 : vector<16x1xf32>
    %cst_91 = arith.constant 9.99999996E-13 : f32
    %237 = vector.broadcast %cst_91 : f32 to vector<16x1xf32>
    %238 = arith.addf %236, %237 : vector<16x1xf32>
    %239 = math.rsqrt %238 : vector<16x1xf32>
    %240 = vector.broadcast %239 : vector<16x1xf32> to vector<16x128xf32>
    %241 = arith.mulf %231, %240 : vector<16x128xf32>
    %242 = vector.broadcast %220 : vector<1x128xf32> to vector<16x128xf32>
    %243 = arith.mulf %241, %242 : vector<16x128xf32>
    %244 = vector.broadcast %222 : vector<1x128xf32> to vector<16x128xf32>
    %245 = arith.addf %243, %244 : vector<16x128xf32>
    %c1 = arith.constant 1 : index
    %c0_92 = arith.constant 0 : index
    %c0_93 = arith.constant 0 : index
    %246 = vector.load %arg4[%c1, %c0_92, %c0_93] : memref<2x128x1536xbf16, #tpu.memory_space<vmem>>, vector<1x128x1536xbf16>
    %247 = vector.shape_cast %246 : vector<1x128x1536xbf16> to vector<128x1536xbf16>
    %248 = arith.truncf %245 : vector<16x128xf32> to vector<16x128xbf16>
    %cst_94 = arith.constant dense<0.000000e+00> : vector<16x1536xf32>
    %249 = tpu.matmul %248, %247, %cst_94 {dimension_numbers = #tpu.dot_dimension_numbers<[1], [0], [0], [1], [0, 0, 1, 1], [], []>} : vector<16x128xbf16>, vector<128x1536xbf16>, vector<16x1536xf32> -> vector<16x1536xf32>
    %c1_95 = arith.constant 1 : index
    %c0_96 = arith.constant 0 : index
    %c0_97 = arith.constant 0 : index
    %250 = vector.load %arg5[%c1_95, %c0_96, %c0_97] : memref<2x1x1536xf32, #tpu.memory_space<vmem>>, vector<1x1x1536xf32>
    %251 = vector.shape_cast %250 : vector<1x1x1536xf32> to vector<1x1536xf32>
    %252 = vector.broadcast %251 : vector<1x1536xf32> to vector<16x1536xf32>
    %253 = arith.addf %249, %252 : vector<16x1536xf32>
    %cst_98 = arith.constant 0.000000e+00 : f32
    %254 = vector.broadcast %cst_98 : f32 to vector<16x128xf32>
    %255 = vector.extract_strided_slice %253 {offsets = [0, 0], sizes = [16, 128], strides = [1, 1]} : vector<16x1536xf32> to vector<16x128xf32>
    %256 = vector.extract_strided_slice %253 {offsets = [0, 512], sizes = [16, 128], strides = [1, 1]} : vector<16x1536xf32> to vector<16x128xf32>
    %257 = vector.extract_strided_slice %253 {offsets = [0, 1024], sizes = [16, 128], strides = [1, 1]} : vector<16x1536xf32> to vector<16x128xf32>
    %258 = arith.truncf %255 : vector<16x128xf32> to vector<16x128xbf16>
    %259 = arith.truncf %256 : vector<16x128xf32> to vector<16x128xbf16>
    "tpu.trace_start"() <{level = 10 : i32, message = "qd,kd->qk"}> : () -> ()
    %cst_99 = arith.constant dense<0.000000e+00> : vector<16x16xf32>
    %260 = tpu.matmul %258, %259, %cst_99 {dimension_numbers = #tpu.dot_dimension_numbers<[1], [1], [0], [0], [0, 0, 1, 0], [], []>} : vector<16x128xbf16>, vector<16x128xbf16>, vector<16x16xf32> -> vector<16x16xf32>
    "tpu.trace_stop"() : () -> ()
    %cst_100 = arith.constant 0.353553385 : f32
    %261 = vector.broadcast %cst_100 : f32 to vector<16x16xf32>
    %262 = arith.mulf %260, %261 : vector<16x16xf32>
    %263 = arith.addf %262, %24 : vector<16x16xf32>
    %cst_101 = arith.constant dense<0xFF800000> : vector<16xf32>
    %264 = vector.multi_reduction <maximumf>, %263, %cst_101 [1] : vector<16x16xf32> to vector<16xf32>
    %265 = vector.shape_cast %264 : vector<16xf32> to vector<16x1xf32>
    %266 = vector.broadcast %265 : vector<16x1xf32> to vector<16x16xf32>
    %267 = arith.subf %263, %266 : vector<16x16xf32>
    %268 = math.exp %267 : vector<16x16xf32>
    %cst_102 = arith.constant dense<0.000000e+00> : vector<16xf32>
    %269 = vector.multi_reduction <add>, %268, %cst_102 [1] : vector<16x16xf32> to vector<16xf32>
    %270 = vector.shape_cast %269 : vector<16xf32> to vector<16x1xf32>
    %271 = tpu.reciprocal %270 {approx = true} : vector<16x1xf32> -> vector<16x1xf32>
    %272 = vector.broadcast %271 : vector<16x1xf32> to vector<16x16xf32>
    %273 = arith.mulf %268, %272 : vector<16x16xf32>
    %274 = arith.truncf %273 : vector<16x16xf32> to vector<16x16xbf16>
    %275 = arith.truncf %257 : vector<16x128xf32> to vector<16x128xbf16>
    %cst_103 = arith.constant dense<0.000000e+00> : vector<16x128xf32>
    %276 = tpu.matmul %274, %275, %cst_103 {dimension_numbers = #tpu.dot_dimension_numbers<[1], [0], [0], [1], [0, 0, 1, 1], [], []>} : vector<16x16xbf16>, vector<16x128xbf16>, vector<16x128xf32> -> vector<16x128xf32>
    %277 = arith.addf %254, %276 : vector<16x128xf32>
    %278 = vector.extract_strided_slice %253 {offsets = [0, 128], sizes = [16, 128], strides = [1, 1]} : vector<16x1536xf32> to vector<16x128xf32>
    %279 = vector.extract_strided_slice %253 {offsets = [0, 640], sizes = [16, 128], strides = [1, 1]} : vector<16x1536xf32> to vector<16x128xf32>
    %280 = vector.extract_strided_slice %253 {offsets = [0, 1152], sizes = [16, 128], strides = [1, 1]} : vector<16x1536xf32> to vector<16x128xf32>
    %281 = arith.truncf %278 : vector<16x128xf32> to vector<16x128xbf16>
    %282 = arith.truncf %279 : vector<16x128xf32> to vector<16x128xbf16>
    "tpu.trace_start"() <{level = 10 : i32, message = "qd,kd->qk"}> : () -> ()
    %cst_104 = arith.constant dense<0.000000e+00> : vector<16x16xf32>
    %283 = tpu.matmul %281, %282, %cst_104 {dimension_numbers = #tpu.dot_dimension_numbers<[1], [1], [0], [0], [0, 0, 1, 0], [], []>} : vector<16x128xbf16>, vector<16x128xbf16>, vector<16x16xf32> -> vector<16x16xf32>
    "tpu.trace_stop"() : () -> ()
    %cst_105 = arith.constant 0.353553385 : f32
    %284 = vector.broadcast %cst_105 : f32 to vector<16x16xf32>
    %285 = arith.mulf %283, %284 : vector<16x16xf32>
    %286 = arith.addf %285, %24 : vector<16x16xf32>
    %cst_106 = arith.constant dense<0xFF800000> : vector<16xf32>
    %287 = vector.multi_reduction <maximumf>, %286, %cst_106 [1] : vector<16x16xf32> to vector<16xf32>
    %288 = vector.shape_cast %287 : vector<16xf32> to vector<16x1xf32>
    %289 = vector.broadcast %288 : vector<16x1xf32> to vector<16x16xf32>
    %290 = arith.subf %286, %289 : vector<16x16xf32>
    %291 = math.exp %290 : vector<16x16xf32>
    %cst_107 = arith.constant dense<0.000000e+00> : vector<16xf32>
    %292 = vector.multi_reduction <add>, %291, %cst_107 [1] : vector<16x16xf32> to vector<16xf32>
    %293 = vector.shape_cast %292 : vector<16xf32> to vector<16x1xf32>
    %294 = tpu.reciprocal %293 {approx = true} : vector<16x1xf32> -> vector<16x1xf32>
    %295 = vector.broadcast %294 : vector<16x1xf32> to vector<16x16xf32>
    %296 = arith.mulf %291, %295 : vector<16x16xf32>
    %297 = arith.truncf %296 : vector<16x16xf32> to vector<16x16xbf16>
    %298 = arith.truncf %280 : vector<16x128xf32> to vector<16x128xbf16>
    %cst_108 = arith.constant dense<0.000000e+00> : vector<16x128xf32>
    %299 = tpu.matmul %297, %298, %cst_108 {dimension_numbers = #tpu.dot_dimension_numbers<[1], [0], [0], [1], [0, 0, 1, 1], [], []>} : vector<16x16xbf16>, vector<16x128xbf16>, vector<16x128xf32> -> vector<16x128xf32>
    %300 = arith.addf %277, %299 : vector<16x128xf32>
    %301 = vector.extract_strided_slice %253 {offsets = [0, 256], sizes = [16, 128], strides = [1, 1]} : vector<16x1536xf32> to vector<16x128xf32>
    %302 = vector.extract_strided_slice %253 {offsets = [0, 768], sizes = [16, 128], strides = [1, 1]} : vector<16x1536xf32> to vector<16x128xf32>
    %303 = vector.extract_strided_slice %253 {offsets = [0, 1280], sizes = [16, 128], strides = [1, 1]} : vector<16x1536xf32> to vector<16x128xf32>
    %304 = arith.truncf %301 : vector<16x128xf32> to vector<16x128xbf16>
    %305 = arith.truncf %302 : vector<16x128xf32> to vector<16x128xbf16>
    "tpu.trace_start"() <{level = 10 : i32, message = "qd,kd->qk"}> : () -> ()
    %cst_109 = arith.constant dense<0.000000e+00> : vector<16x16xf32>
    %306 = tpu.matmul %304, %305, %cst_109 {dimension_numbers = #tpu.dot_dimension_numbers<[1], [1], [0], [0], [0, 0, 1, 0], [], []>} : vector<16x128xbf16>, vector<16x128xbf16>, vector<16x16xf32> -> vector<16x16xf32>
    "tpu.trace_stop"() : () -> ()
    %cst_110 = arith.constant 0.353553385 : f32
    %307 = vector.broadcast %cst_110 : f32 to vector<16x16xf32>
    %308 = arith.mulf %306, %307 : vector<16x16xf32>
    %309 = arith.addf %308, %24 : vector<16x16xf32>
    %cst_111 = arith.constant dense<0xFF800000> : vector<16xf32>
    %310 = vector.multi_reduction <maximumf>, %309, %cst_111 [1] : vector<16x16xf32> to vector<16xf32>
    %311 = vector.shape_cast %310 : vector<16xf32> to vector<16x1xf32>
    %312 = vector.broadcast %311 : vector<16x1xf32> to vector<16x16xf32>
    %313 = arith.subf %309, %312 : vector<16x16xf32>
    %314 = math.exp %313 : vector<16x16xf32>
    %cst_112 = arith.constant dense<0.000000e+00> : vector<16xf32>
    %315 = vector.multi_reduction <add>, %314, %cst_112 [1] : vector<16x16xf32> to vector<16xf32>
    %316 = vector.shape_cast %315 : vector<16xf32> to vector<16x1xf32>
    %317 = tpu.reciprocal %316 {approx = true} : vector<16x1xf32> -> vector<16x1xf32>
    %318 = vector.broadcast %317 : vector<16x1xf32> to vector<16x16xf32>
    %319 = arith.mulf %314, %318 : vector<16x16xf32>
    %320 = arith.truncf %319 : vector<16x16xf32> to vector<16x16xbf16>
    %321 = arith.truncf %303 : vector<16x128xf32> to vector<16x128xbf16>
    %cst_113 = arith.constant dense<0.000000e+00> : vector<16x128xf32>
    %322 = tpu.matmul %320, %321, %cst_113 {dimension_numbers = #tpu.dot_dimension_numbers<[1], [0], [0], [1], [0, 0, 1, 1], [], []>} : vector<16x16xbf16>, vector<16x128xbf16>, vector<16x128xf32> -> vector<16x128xf32>
    %323 = arith.addf %300, %322 : vector<16x128xf32>
    %324 = vector.extract_strided_slice %253 {offsets = [0, 384], sizes = [16, 128], strides = [1, 1]} : vector<16x1536xf32> to vector<16x128xf32>
    %325 = vector.extract_strided_slice %253 {offsets = [0, 896], sizes = [16, 128], strides = [1, 1]} : vector<16x1536xf32> to vector<16x128xf32>
    %326 = vector.extract_strided_slice %253 {offsets = [0, 1408], sizes = [16, 128], strides = [1, 1]} : vector<16x1536xf32> to vector<16x128xf32>
    %327 = arith.truncf %324 : vector<16x128xf32> to vector<16x128xbf16>
    %328 = arith.truncf %325 : vector<16x128xf32> to vector<16x128xbf16>
    "tpu.trace_start"() <{level = 10 : i32, message = "qd,kd->qk"}> : () -> ()
    %cst_114 = arith.constant dense<0.000000e+00> : vector<16x16xf32>
    %329 = tpu.matmul %327, %328, %cst_114 {dimension_numbers = #tpu.dot_dimension_numbers<[1], [1], [0], [0], [0, 0, 1, 0], [], []>} : vector<16x128xbf16>, vector<16x128xbf16>, vector<16x16xf32> -> vector<16x16xf32>
    "tpu.trace_stop"() : () -> ()
    %cst_115 = arith.constant 0.353553385 : f32
    %330 = vector.broadcast %cst_115 : f32 to vector<16x16xf32>
    %331 = arith.mulf %329, %330 : vector<16x16xf32>
    %332 = arith.addf %331, %24 : vector<16x16xf32>
    %cst_116 = arith.constant dense<0xFF800000> : vector<16xf32>
    %333 = vector.multi_reduction <maximumf>, %332, %cst_116 [1] : vector<16x16xf32> to vector<16xf32>
    %334 = vector.shape_cast %333 : vector<16xf32> to vector<16x1xf32>
    %335 = vector.broadcast %334 : vector<16x1xf32> to vector<16x16xf32>
    %336 = arith.subf %332, %335 : vector<16x16xf32>
    %337 = math.exp %336 : vector<16x16xf32>
    %cst_117 = arith.constant dense<0.000000e+00> : vector<16xf32>
    %338 = vector.multi_reduction <add>, %337, %cst_117 [1] : vector<16x16xf32> to vector<16xf32>
    %339 = vector.shape_cast %338 : vector<16xf32> to vector<16x1xf32>
    %340 = tpu.reciprocal %339 {approx = true} : vector<16x1xf32> -> vector<16x1xf32>
    %341 = vector.broadcast %340 : vector<16x1xf32> to vector<16x16xf32>
    %342 = arith.mulf %337, %341 : vector<16x16xf32>
    %343 = arith.truncf %342 : vector<16x16xf32> to vector<16x16xbf16>
    %344 = arith.truncf %326 : vector<16x128xf32> to vector<16x128xbf16>
    %cst_118 = arith.constant dense<0.000000e+00> : vector<16x128xf32>
    %345 = tpu.matmul %343, %344, %cst_118 {dimension_numbers = #tpu.dot_dimension_numbers<[1], [0], [0], [1], [0, 0, 1, 1], [], []>} : vector<16x16xbf16>, vector<16x128xbf16>, vector<16x128xf32> -> vector<16x128xf32>
    %346 = arith.addf %323, %345 : vector<16x128xf32>
    %c1_119 = arith.constant 1 : index
    %c0_120 = arith.constant 0 : index
    %c0_121 = arith.constant 0 : index
    %347 = vector.load %arg6[%c1_119, %c0_120, %c0_121] : memref<2x128x128xbf16, #tpu.memory_space<vmem>>, vector<1x128x128xbf16>
    %348 = vector.shape_cast %347 : vector<1x128x128xbf16> to vector<128x128xbf16>
    %349 = arith.truncf %346 : vector<16x128xf32> to vector<16x128xbf16>
    %cst_122 = arith.constant dense<0.000000e+00> : vector<16x128xf32>
    %350 = tpu.matmul %349, %348, %cst_122 {dimension_numbers = #tpu.dot_dimension_numbers<[1], [0], [0], [1], [0, 0, 1, 1], [], []>} : vector<16x128xbf16>, vector<128x128xbf16>, vector<16x128xf32> -> vector<16x128xf32>
    %c1_123 = arith.constant 1 : index
    %c0_124 = arith.constant 0 : index
    %c0_125 = arith.constant 0 : index
    %351 = vector.load %arg7[%c1_123, %c0_124, %c0_125] : memref<2x1x128xf32, #tpu.memory_space<vmem>>, vector<1x1x128xf32>
    %352 = vector.shape_cast %351 : vector<1x1x128xf32> to vector<1x128xf32>
    %353 = vector.broadcast %352 : vector<1x128xf32> to vector<16x128xf32>
    %354 = arith.addf %350, %353 : vector<16x128xf32>
    %c1_126 = arith.constant 1 : index
    %c0_127 = arith.constant 0 : index
    %c0_128 = arith.constant 0 : index
    %355 = vector.load %arg8[%c1_126, %c0_127, %c0_128] : memref<2x1x128xf32, #tpu.memory_space<vmem>>, vector<1x1x128xf32>
    %356 = vector.shape_cast %355 : vector<1x1x128xf32> to vector<1x128xf32>
    %c1_129 = arith.constant 1 : index
    %c0_130 = arith.constant 0 : index
    %c0_131 = arith.constant 0 : index
    %357 = vector.load %arg9[%c1_129, %c0_130, %c0_131] : memref<2x1x128xf32, #tpu.memory_space<vmem>>, vector<1x1x128xf32>
    %358 = vector.shape_cast %357 : vector<1x1x128xf32> to vector<1x128xf32>
    %359 = arith.addf %354, %245 : vector<16x128xf32>
    %cst_132 = arith.constant dense<0.000000e+00> : vector<16xf32>
    %360 = vector.multi_reduction <add>, %359, %cst_132 [1] : vector<16x128xf32> to vector<16xf32>
    %361 = vector.shape_cast %360 : vector<16xf32> to vector<16x1xf32>
    %cst_133 = arith.constant 3.125000e-02 : f32
    %362 = vector.broadcast %cst_133 : f32 to vector<16x1xf32>
    %363 = arith.mulf %361, %362 : vector<16x1xf32>
    %364 = vector.broadcast %363 : vector<16x1xf32> to vector<16x128xf32>
    %365 = arith.subf %359, %364 : vector<16x128xf32>
    %366 = vector.broadcast %4 : vector<1x128xf32> to vector<16x128xf32>
    %367 = arith.mulf %365, %366 : vector<16x128xf32>
    %368 = arith.mulf %367, %367 : vector<16x128xf32>
    %cst_134 = arith.constant dense<0.000000e+00> : vector<16xf32>
    %369 = vector.multi_reduction <add>, %368, %cst_134 [1] : vector<16x128xf32> to vector<16xf32>
    %370 = vector.shape_cast %369 : vector<16xf32> to vector<16x1xf32>
    %cst_135 = arith.constant 3.125000e-02 : f32
    %371 = vector.broadcast %cst_135 : f32 to vector<16x1xf32>
    %372 = arith.mulf %370, %371 : vector<16x1xf32>
    %cst_136 = arith.constant 9.99999996E-13 : f32
    %373 = vector.broadcast %cst_136 : f32 to vector<16x1xf32>
    %374 = arith.addf %372, %373 : vector<16x1xf32>
    %375 = math.rsqrt %374 : vector<16x1xf32>
    %376 = vector.broadcast %375 : vector<16x1xf32> to vector<16x128xf32>
    %377 = arith.mulf %367, %376 : vector<16x128xf32>
    %378 = vector.broadcast %356 : vector<1x128xf32> to vector<16x128xf32>
    %379 = arith.mulf %377, %378 : vector<16x128xf32>
    %380 = vector.broadcast %358 : vector<1x128xf32> to vector<16x128xf32>
    %381 = arith.addf %379, %380 : vector<16x128xf32>
    %c1_137 = arith.constant 1 : index
    %c0_138 = arith.constant 0 : index
    %c0_139 = arith.constant 0 : index
    %382 = vector.load %arg10[%c1_137, %c0_138, %c0_139] : memref<2x128x128xbf16, #tpu.memory_space<vmem>>, vector<1x128x128xbf16>
    %383 = vector.shape_cast %382 : vector<1x128x128xbf16> to vector<128x128xbf16>
    %384 = arith.truncf %381 : vector<16x128xf32> to vector<16x128xbf16>
    %cst_140 = arith.constant dense<0.000000e+00> : vector<16x128xf32>
    %385 = tpu.matmul %384, %383, %cst_140 {dimension_numbers = #tpu.dot_dimension_numbers<[1], [0], [0], [1], [0, 0, 1, 1], [], []>} : vector<16x128xbf16>, vector<128x128xbf16>, vector<16x128xf32> -> vector<16x128xf32>
    %c1_141 = arith.constant 1 : index
    %c0_142 = arith.constant 0 : index
    %c0_143 = arith.constant 0 : index
    %386 = vector.load %arg11[%c1_141, %c0_142, %c0_143] : memref<2x1x128xf32, #tpu.memory_space<vmem>>, vector<1x1x128xf32>
    %387 = vector.shape_cast %386 : vector<1x1x128xf32> to vector<1x128xf32>
    %388 = vector.broadcast %387 : vector<1x128xf32> to vector<16x128xf32>
    %389 = arith.addf %385, %388 : vector<16x128xf32>
    %cst_144 = arith.constant 5.000000e-01 : f32
    %390 = vector.broadcast %cst_144 : f32 to vector<16x128xf32>
    %391 = arith.mulf %390, %389 : vector<16x128xf32>
    %cst_145 = arith.constant 4.471500e-02 : f32
    %392 = vector.broadcast %cst_145 : f32 to vector<16x128xf32>
    %393 = arith.mulf %392, %389 : vector<16x128xf32>
    %394 = arith.mulf %393, %389 : vector<16x128xf32>
    %395 = arith.mulf %394, %389 : vector<16x128xf32>
    %396 = arith.addf %389, %395 : vector<16x128xf32>
    %cst_146 = arith.constant 0.797884583 : f32
    %397 = vector.broadcast %cst_146 : f32 to vector<16x128xf32>
    %398 = arith.mulf %397, %396 : vector<16x128xf32>
    %399 = math.tanh %398 : vector<16x128xf32>
    %cst_147 = arith.constant 1.000000e+00 : f32
    %400 = vector.broadcast %cst_147 : f32 to vector<16x128xf32>
    %401 = arith.addf %400, %399 : vector<16x128xf32>
    %402 = arith.mulf %391, %401 : vector<16x128xf32>
    %c1_148 = arith.constant 1 : index
    %c0_149 = arith.constant 0 : index
    %c0_150 = arith.constant 0 : index
    %403 = vector.load %arg12[%c1_148, %c0_149, %c0_150] : memref<2x128x128xbf16, #tpu.memory_space<vmem>>, vector<1x128x128xbf16>
    %404 = vector.shape_cast %403 : vector<1x128x128xbf16> to vector<128x128xbf16>
    %405 = arith.truncf %402 : vector<16x128xf32> to vector<16x128xbf16>
    %cst_151 = arith.constant dense<0.000000e+00> : vector<16x128xf32>
    %406 = tpu.matmul %405, %404, %cst_151 {dimension_numbers = #tpu.dot_dimension_numbers<[1], [0], [0], [1], [0, 0, 1, 1], [], []>} : vector<16x128xbf16>, vector<128x128xbf16>, vector<16x128xf32> -> vector<16x128xf32>
    %c1_152 = arith.constant 1 : index
    %c0_153 = arith.constant 0 : index
    %c0_154 = arith.constant 0 : index
    %407 = vector.load %arg13[%c1_152, %c0_153, %c0_154] : memref<2x1x128xf32, #tpu.memory_space<vmem>>, vector<1x1x128xf32>
    %408 = vector.shape_cast %407 : vector<1x1x128xf32> to vector<1x128xf32>
    %409 = vector.broadcast %408 : vector<1x128xf32> to vector<16x128xf32>
    %410 = arith.addf %406, %409 : vector<16x128xf32>
    %c1_155 = arith.constant 1 : index
    %c0_156 = arith.constant 0 : index
    %c0_157 = arith.constant 0 : index
    %411 = vector.load %arg14[%c1_155, %c0_156, %c0_157] : memref<2x1x128xf32, #tpu.memory_space<vmem>>, vector<1x1x128xf32>
    %412 = vector.shape_cast %411 : vector<1x1x128xf32> to vector<1x128xf32>
    %c1_158 = arith.constant 1 : index
    %c0_159 = arith.constant 0 : index
    %c0_160 = arith.constant 0 : index
    %413 = vector.load %arg15[%c1_158, %c0_159, %c0_160] : memref<2x1x128xf32, #tpu.memory_space<vmem>>, vector<1x1x128xf32>
    %414 = vector.shape_cast %413 : vector<1x1x128xf32> to vector<1x128xf32>
    %415 = arith.addf %410, %381 : vector<16x128xf32>
    %cst_161 = arith.constant dense<0.000000e+00> : vector<16xf32>
    %416 = vector.multi_reduction <add>, %415, %cst_161 [1] : vector<16x128xf32> to vector<16xf32>
    %417 = vector.shape_cast %416 : vector<16xf32> to vector<16x1xf32>
    %cst_162 = arith.constant 3.125000e-02 : f32
    %418 = vector.broadcast %cst_162 : f32 to vector<16x1xf32>
    %419 = arith.mulf %417, %418 : vector<16x1xf32>
    %420 = vector.broadcast %419 : vector<16x1xf32> to vector<16x128xf32>
    %421 = arith.subf %415, %420 : vector<16x128xf32>
    %422 = vector.broadcast %4 : vector<1x128xf32> to vector<16x128xf32>
    %423 = arith.mulf %421, %422 : vector<16x128xf32>
    %424 = arith.mulf %423, %423 : vector<16x128xf32>
    %cst_163 = arith.constant dense<0.000000e+00> : vector<16xf32>
    %425 = vector.multi_reduction <add>, %424, %cst_163 [1] : vector<16x128xf32> to vector<16xf32>
    %426 = vector.shape_cast %425 : vector<16xf32> to vector<16x1xf32>
    %cst_164 = arith.constant 3.125000e-02 : f32
    %427 = vector.broadcast %cst_164 : f32 to vector<16x1xf32>
    %428 = arith.mulf %426, %427 : vector<16x1xf32>
    %cst_165 = arith.constant 9.99999996E-13 : f32
    %429 = vector.broadcast %cst_165 : f32 to vector<16x1xf32>
    %430 = arith.addf %428, %429 : vector<16x1xf32>
    %431 = math.rsqrt %430 : vector<16x1xf32>
    %432 = vector.broadcast %431 : vector<16x1xf32> to vector<16x128xf32>
    %433 = arith.mulf %423, %432 : vector<16x128xf32>
    %434 = vector.broadcast %412 : vector<1x128xf32> to vector<16x128xf32>
    %435 = arith.mulf %433, %434 : vector<16x128xf32>
    %436 = vector.broadcast %414 : vector<1x128xf32> to vector<16x128xf32>
    %437 = arith.addf %435, %436 : vector<16x128xf32>
    %438 = vector.extract_strided_slice %437 {offsets = [0, 0], sizes = [1, 128], strides = [1, 1]} : vector<16x128xf32> to vector<1x128xf32>
    %439 = vector.extract_strided_slice %437 {offsets = [8, 0], sizes = [1, 128], strides = [1, 1]} : vector<16x128xf32> to vector<1x128xf32>
    %440 = tpu.concatenate %438, %439 in 0 : vector<1x128xf32>, vector<1x128xf32> -> vector<2x128xf32>
    %c0_166 = arith.constant 0 : index
    %c0_167 = arith.constant 0 : index
    %441 = vector.load %arg16[%c0_166, %c0_167] : memref<128x128xbf16, #tpu.memory_space<vmem>>, vector<128x128xbf16>
    %442 = arith.truncf %440 : vector<2x128xf32> to vector<2x128xbf16>
    %cst_168 = arith.constant dense<0.000000e+00> : vector<2x128xf32>
    %443 = tpu.matmul %442, %441, %cst_168 {dimension_numbers = #tpu.dot_dimension_numbers<[1], [0], [0], [1], [0, 0, 1, 1], [], []>} : vector<2x128xbf16>, vector<128x128xbf16>, vector<2x128xf32> -> vector<2x128xf32>
    %c0_169 = arith.constant 0 : index
    %c0_170 = arith.constant 0 : index
    %444 = vector.load %arg17[%c0_169, %c0_170] : memref<1x128xf32, #tpu.memory_space<vmem>>, vector<1x128xf32>
    %445 = vector.broadcast %444 : vector<1x128xf32> to vector<2x128xf32>
    %446 = arith.addf %443, %445 : vector<2x128xf32>
    %447 = math.tanh %446 : vector<2x128xf32>
    %c0_171 = arith.constant 0 : index
    %c0_172 = arith.constant 0 : index
    %448 = vector.load %arg18[%c0_171, %c0_172] : memref<128x128xbf16, #tpu.memory_space<vmem>>, vector<128x128xbf16>
    %449 = arith.truncf %447 : vector<2x128xf32> to vector<2x128xbf16>
    %cst_173 = arith.constant dense<0.000000e+00> : vector<2x128xf32>
    %450 = tpu.matmul %449, %448, %cst_173 {dimension_numbers = #tpu.dot_dimension_numbers<[1], [0], [0], [1], [0, 0, 1, 1], [], []>} : vector<2x128xbf16>, vector<128x128xbf16>, vector<2x128xf32> -> vector<2x128xf32>
    %c0_174 = arith.constant 0 : index
    %c0_175 = arith.constant 0 : index
    %451 = vector.load %arg19[%c0_174, %c0_175] : memref<1x128xf32, #tpu.memory_space<vmem>>, vector<1x128xf32>
    %452 = vector.broadcast %451 : vector<1x128xf32> to vector<2x128xf32>
    %453 = arith.addf %450, %452 : vector<2x128xf32>
    %c3_i32 = arith.constant 3 : i32
    %454 = vector.broadcast %c3_i32 : i32 to vector<1x128xi32>
    %455 = arith.cmpi sge, %0, %454 : vector<1x128xi32>
    %456 = arith.extui %455 : vector<1x128xi1> to vector<1x128xi32>
    %457 = arith.sitofp %456 : vector<1x128xi32> to vector<1x128xf32>
    %cst_176 = arith.constant -1.000000e+09 : f32
    %458 = vector.broadcast %cst_176 : f32 to vector<1x128xf32>
    %459 = arith.mulf %457, %458 : vector<1x128xf32>
    %460 = vector.broadcast %459 : vector<1x128xf32> to vector<2x128xf32>
    %461 = arith.addf %453, %460 : vector<2x128xf32>
    %cst_177 = arith.constant dense<0xFF800000> : vector<2xf32>
    %462 = vector.multi_reduction <maximumf>, %461, %cst_177 [1] : vector<2x128xf32> to vector<2xf32>
    %463 = vector.shape_cast %462 : vector<2xf32> to vector<2x1xf32>
    %464 = vector.broadcast %463 : vector<2x1xf32> to vector<2x128xf32>
    %465 = arith.subf %461, %464 : vector<2x128xf32>
    %466 = math.exp %465 : vector<2x128xf32>
    %cst_178 = arith.constant dense<0.000000e+00> : vector<2xf32>
    %467 = vector.multi_reduction <add>, %466, %cst_178 [1] : vector<2x128xf32> to vector<2xf32>
    %468 = vector.shape_cast %467 : vector<2xf32> to vector<2x1xf32>
    %469 = vector.broadcast %468 : vector<2x1xf32> to vector<2x128xf32>
    %470 = arith.divf %466, %469 : vector<2x128xf32>
    %c0_179 = arith.constant 0 : index
    %c0_180 = arith.constant 0 : index
    %471 = vector.load %arg20[%c0_179, %c0_180] : memref<2x128xf32, #tpu.memory_space<vmem>>, vector<2x128xf32>
    tpu.vector_store %arg20[%c0_179, %c0_180], %470 {strides = array<i32>} : memref<2x128xf32, #tpu.memory_space<vmem>>, vector<2x128xf32>,
    return
  }
}

</mosaic_0001>

<bundles_post_ra>
// kernel: bert_sentence_classification_forward.1
= control target key start
LH: loop header
LB: loop body
LE: loop exit
PB: predicated region body
PF: predicated region fallthrough
CT: control target
= control target key end

     0   :  { %s6615_s0 = inlined_call_operand.vmem [shape: f32[16,32], index: 0, kind: input, shape index: {}]   ;;  %s6616_s1 = inlined_call_operand.vmem [shape: f32[1,16], index: 1, kind: input, shape index: {}]   ;;  %s6617_s2 = inlined_call_operand.vmem [shape: f32[1,128], index: 2, kind: input, shape index: {}]   ;;  %s6618_s3 = inlined_call_operand.hbm [shape: f32[1,128], index: 3, kind: input, shape index: {}]   ;;  %s6619_s4 = inlined_call_operand.hbm [shape: bf16[2,128,1536], index: 4, kind: input, shape index: {}]   ;;  %s6620_s5 = inlined_call_operand.vmem [shape: f32[2,1,1536], index: 5, kind: input, shape index: {}]   ;;  %s6621_s6 = inlined_call_operand.vmem [shape: bf16[2,128,128], index: 6, kind: input, shape index: {}]   ;;  %s6622_s7 = inlined_call_operand.vmem [shape: f32[2,1,128], index: 7, kind: input, shape index: {}]   ;;  %s6623_s8 = inlined_call_operand.hbm [shape: f32[2,1,128], index: 8, kind: input, shape index: {}]   ;;  %s6624_s9 = inlined_call_operand.hbm [shape: f32[2,1,128], index: 9, kind: input, shape index: {}]   ;;  %s6625_s10 = inlined_call_operand.vmem [shape: bf16[2,128,128], index: 10, kind: input, shape index: {}]   ;;  %s6626_s11 = inlined_call_operand.hbm [shape: f32[2,1,128], index: 11, kind: input, shape index: {}]   ;;  %s6627_s12 = inlined_call_operand.vmem [shape: bf16[2,128,128], index: 12, kind: input, shape index: {}]   ;;  %s6628_s13 = inlined_call_operand.hbm [shape: f32[2,1,128], index: 13, kind: input, shape index: {}]   ;;  %s6629_s14 = inlined_call_operand.hbm [shape: f32[2,1,128], index: 14, kind: input, shape index: {}]   ;;  %s6630_s15 = inlined_call_operand.hbm [shape: f32[2,1,128], index: 15, kind: input, shape index: {}]   ;;  %s6631_s16 = inlined_call_operand.hbm [shape: bf16[128,128], index: 16, kind: input, shape index: {}]   ;;  %s6632_s17 = inlined_call_operand.hbm [shape: f32[1,128], index: 17, kind: input, shape index: {}]   ;;  %s6633_s18 = inlined_call_operand.hbm [shape: bf16[128,128], index: 18, kind: input, shape index: {}]   ;;  %s6634_s19 = inlined_call_operand.hbm [shape: f32[1,128], index: 19, kind: input, shape index: {}]   ;;  %s6635_s20 = inlined_call_operand.hbm [shape: f32[2,128], index: 20, kind: output, shape index: {}]  }
   0x1   :  { %6641 = sst [smem:[#allocation31_spill]] %s6615_s0 }
   0x2   :  { %6642 = sst [smem:[#allocation32_spill]] %s6616_s1 }
   0x3   :  { %6643 = sst [smem:[#allocation33_spill]] %s6617_s2 }
   0x4   :  { %6644 = sst [smem:[#allocation34_spill]] %s6618_s3 }
   0x5   :  { %6645 = sst [smem:[#allocation35_spill]] %s6619_s4 }
   0x6   :  { %6646 = sst [smem:[#allocation36_spill]] %s6627_s12 }
   0x7   :  { %6647 = sst [smem:[#allocation37_spill]] %s6635_s20 }
   0x8   :  { %25 = vsyncpa [#allocation3], 0 }
   0x9   :  { %26 = vsyncpa [#allocation6], 0 }
   0xa   :  { %27 = vsyncpa [#allocation9], 0 }
   0xb   :  { %28 = vsyncpa [#allocation12], 0 }
   0xc   :  { %29 = vsyncpa [#allocation15], 0 }
   0xd   :  { %30 = vsyncpa [#allocation18], 0 }
   0xe   :  { %31 = vsyncpa [#allocation21], 0 }
   0xf   :  { %32 = vsyncpa [#allocation4], 0  ;;  %s5703_s1 = smov [#allocation5]   ;;  %s6648_s2 = sld [smem:[#allocation35_spill]] }
  0x10   :  { %s54_s22 = sshll.u32 %s5703_s1, 4  ;;  %s55_s22 = int_to_ptr.vmem [resolvable:$true] %s54_s22 }
  0x15   :  { %s5401_s25 = scalar_lea.hbm %s6648_s2, 24576 }
  0x16   :  { %p5402_p0 = scmp.ne.s32.totalorder %s6648_s2, %s5401_s25  ;;  %p5405_p1 = scmp.lt.u32.totalorder %s5401_s25, %s6648_s2 }
  0x18   :  { %p5407_p2 = pnand %p5405_p1, %p5402_p0 }
  0x1a   :  { %5410 = shalt.err (!%p5407_p2)
}
  0x1b   :  { %s5411_s4 = scalar_lea.vmem %s55_s22, 24576  ;;  %p5416_p4 = scmp.lt.s32.totalorder %s55_s22, %s55_s22 }
  0x1c   :  { %p5412_p3 = scmp.ne.s32.totalorder %s55_s22, %s5411_s4  ;;  %p5417_p5 = scmp.lt.s32.totalorder %s5411_s4, %s5411_s4 }
  0x1e   :  { %p5418_p6 = por %p5417_p5, %p5416_p4 }
  0x20   :  { %p5419_p7 = pnand %p5418_p6, %p5412_p3 }
  0x22   :  { %5422 = shalt.err (!%p5419_p7)
}
  0x23   :  { %s5704_s29 = smov 768   ;;  %s5705_s30 = smov 48  }
  0x24   :  { %60 = dma.hbm_to_vmem [thread:$0]  %s6648_s2, 24576, %s55_s22, [#allocation6], %s5704_s29, %s5704_s29, %s5705_s30  }
  0x25   :  { %s5706_s1 = smov [#allocation8]   ;;  %s5707_s24 = smov [#allocation11]  }
  0x26   :  { %s84_s23 = sshll.u32 %s5706_s1, 4  ;;  %s112_s25 = sshll.u32 %s5707_s24, 4  ;;  %s85_s23 = int_to_ptr.vmem [resolvable:$true] %s84_s23  ;;  %s113_s25 = int_to_ptr.vmem [resolvable:$true] %s112_s25 }
  0x27   :  { %s5423_s27 = scalar_lea.hbm %s6624_s9, 32 }
  0x28   :  { %p5424_p8 = scmp.ne.s32.totalorder %s6624_s9, %s5423_s27  ;;  %p5427_p9 = scmp.lt.u32.totalorder %s5423_s27, %s6624_s9 }
  0x2a   :  { %p5429_p10 = pnand %p5427_p9, %p5424_p8 }
  0x2c   :  { %5432 = shalt.err (!%p5429_p10)
}
  0x2d   :  { %s5433_s22 = scalar_lea.vmem %s85_s23, 32  ;;  %p5438_p12 = scmp.lt.s32.totalorder %s85_s23, %s85_s23 }
  0x2e   :  { %p5434_p11 = scmp.ne.s32.totalorder %s85_s23, %s5433_s22  ;;  %p5439_p13 = scmp.lt.s32.totalorder %s5433_s22, %s5433_s22 }
  0x30   :  { %p5440_p0 = por %p5439_p13, %p5438_p12 }
  0x32   :  { %p5441_p1 = pnand %p5440_p0, %p5434_p11 }
  0x34   :  { %5444 = shalt.err (!%p5441_p1)
}
  0x35   :  { %s5708_s2 = smov 16   ;;  %s5709_s29 = smov 1  }
  0x36   :  { %90 = dma.hbm_to_vmem [thread:$0]  %s6624_s9, 32, %s85_s23, [#allocation9], %s5708_s2, %s5708_s2, %s5709_s29  }
  0x37   :  { %s5445_s21 = scalar_lea.hbm %s6628_s13, 32 }
  0x38   :  { %p5446_p2 = scmp.ne.s32.totalorder %s6628_s13, %s5445_s21  ;;  %p5449_p3 = scmp.lt.u32.totalorder %s5445_s21, %s6628_s13 }
  0x3a   :  { %p5451_p4 = pnand %p5449_p3, %p5446_p2 }
  0x3c   :  { %5454 = shalt.err (!%p5451_p4)
}
  0x3d   :  { %s5455_s27 = scalar_lea.vmem %s113_s25, 32  ;;  %p5460_p6 = scmp.lt.s32.totalorder %s113_s25, %s113_s25 }
  0x3e   :  { %p5456_p5 = scmp.ne.s32.totalorder %s113_s25, %s5455_s27  ;;  %p5461_p7 = scmp.lt.s32.totalorder %s5455_s27, %s5455_s27 }
  0x40   :  { %p5462_p8 = por %p5461_p7, %p5460_p6 }
  0x42   :  { %p5463_p9 = pnand %p5462_p8, %p5456_p5 }
  0x44   :  { %5466 = shalt.err (!%p5463_p9)
}
  0x45   :  { %118 = dma.hbm_to_vmem [thread:$0]  %s6628_s13, 32, %s113_s25, [#allocation12], %s5708_s2, %s5708_s2, %s5709_s29  }
  0x46   :  { %s5710_s28 = smov [#allocation14]   ;;  %s5711_s22 = smov [#allocation17]  }
  0x47   :  { %s136_s4 = sshll.u32 %s5710_s28, 4  ;;  %s161_s30 = sshll.u32 %s5711_s22, 4  ;;  %s137_s4 = int_to_ptr.vmem [resolvable:$true] %s136_s4  ;;  %s162_s30 = int_to_ptr.vmem [resolvable:$true] %s161_s30 }
  0x48   :  { %s5467_s20 = scalar_lea.hbm %s6630_s15, 32 }
  0x49   :  { %p5468_p10 = scmp.ne.s32.totalorder %s6630_s15, %s5467_s20  ;;  %p5471_p11 = scmp.lt.u32.totalorder %s5467_s20, %s6630_s15 }
  0x4b   :  { %p5473_p12 = pnand %p5471_p11, %p5468_p10 }
  0x4d   :  { %5476 = shalt.err (!%p5473_p12)
}
  0x4e   :  { %s5477_s13 = scalar_lea.vmem %s137_s4, 32  ;;  %p5482_p0 = scmp.lt.s32.totalorder %s137_s4, %s137_s4 }
  0x4f   :  { %p5478_p13 = scmp.ne.s32.totalorder %s137_s4, %s5477_s13  ;;  %p5483_p1 = scmp.lt.s32.totalorder %s5477_s13, %s5477_s13 }
  0x51   :  { %p5484_p2 = por %p5483_p1, %p5482_p0 }
  0x53   :  { %p5485_p3 = pnand %p5484_p2, %p5478_p13 }
  0x55   :  { %5488 = shalt.err (!%p5485_p3)
}
  0x56   :  { %142 = dma.hbm_to_vmem [thread:$0]  %s6630_s15, 32, %s137_s4, [#allocation15], %s5708_s2, %s5708_s2, %s5709_s29  }
  0x57   :  { %s5489_s23 = scalar_lea.hbm %s6632_s17, 16 }
  0x58   :  { %p5490_p4 = scmp.ne.s32.totalorder %s6632_s17, %s5489_s23  ;;  %p5493_p5 = scmp.lt.u32.totalorder %s5489_s23, %s6632_s17 }
  0x5a   :  { %p5495_p6 = pnand %p5493_p5, %p5490_p4 }
  0x5c   :  { %5498 = shalt.err (!%p5495_p6)
}
  0x5d   :  { %s5499_s20 = scalar_lea.vmem %s162_s30, 16  ;;  %s5503_s21 = scalar_lea.vmem %s162_s30, 32 }
  0x5e   :  { %p5500_p7 = scmp.ne.s32.totalorder %s162_s30, %s5499_s20  ;;  %p5504_p8 = scmp.lt.s32.totalorder %s162_s30, %s162_s30 }
  0x5f   :  { %p5505_p9 = scmp.lt.s32.totalorder %s5503_s21, %s5499_s20 }
  0x61   :  { %p5506_p10 = por %p5505_p9, %p5504_p8 }
  0x63   :  { %p5507_p11 = pnand %p5506_p10, %p5500_p7 }
  0x65   :  { %5510 = shalt.err (!%p5507_p11)
}
  0x66   :  { %164 = dma.hbm_to_vmem [thread:$0]  %s6632_s17, 16, %s162_s30, [#allocation18]  }
  0x67   :  { %s5712_s1 = smov [#allocation2]   ;;  %s5713_s3 = smov [#allocation7]  }
  0x68   :  { %s45_s24 = sshll.u32 %s5712_s1, 4  ;;  %s72_s13 = sshll.u32 %s5713_s3, 4  ;;  %s46_s24 = int_to_ptr.vmem [resolvable:$true] %s45_s24  ;;  %s73_s13 = int_to_ptr.vmem [resolvable:$true] %s72_s13 }
  0x69   :  { %s6649_s27 = sld [smem:[#allocation34_spill]] }
  0x6f   :  { %s5511_s9 = scalar_lea.hbm %s6649_s27, 16 }
  0x70   :  { %p5512_p12 = scmp.ne.s32.totalorder %s6649_s27, %s5511_s9  ;;  %p5515_p13 = scmp.lt.u32.totalorder %s5511_s9, %s6649_s27 }
  0x72   :  { %p5517_p0 = pnand %p5515_p13, %p5512_p12 }
  0x74   :  { %5520 = shalt.err (!%p5517_p0)
}
  0x75   :  { %s5521_s17 = scalar_lea.vmem %s46_s24, 16  ;;  %s5525_s30 = scalar_lea.vmem %s46_s24, 32 }
  0x76   :  { %p5522_p1 = scmp.ne.s32.totalorder %s46_s24, %s5521_s17  ;;  %p5526_p2 = scmp.lt.s32.totalorder %s46_s24, %s46_s24 }
  0x77   :  { %p5527_p3 = scmp.lt.s32.totalorder %s5525_s30, %s5521_s17 }
  0x79   :  { %p5528_p4 = por %p5527_p3, %p5526_p2 }
  0x7b   :  { %p5529_p5 = pnand %p5528_p4, %p5522_p1 }
  0x7d   :  { %5532 = shalt.err (!%p5529_p5)
}
  0x7e   :  { %48 = dma.hbm_to_vmem [thread:$0]  %s6649_s27, 16, %s46_s24, [#allocation3]  }
  0x7f   :  { %s5533_s4 = scalar_lea.hbm %s6623_s8, 32 }
  0x80   :  { %p5534_p6 = scmp.ne.s32.totalorder %s6623_s8, %s5533_s4  ;;  %p5537_p7 = scmp.lt.u32.totalorder %s5533_s4, %s6623_s8 }
  0x82   :  { %p5539_p8 = pnand %p5537_p7, %p5534_p6 }
  0x84   :  { %5542 = shalt.err (!%p5539_p8)
}
  0x85   :  { %s5543_s9 = scalar_lea.vmem %s73_s13, 32  ;;  %p5548_p10 = scmp.lt.s32.totalorder %s73_s13, %s73_s13 }
  0x86   :  { %p5544_p9 = scmp.ne.s32.totalorder %s73_s13, %s5543_s9  ;;  %p5549_p11 = scmp.lt.s32.totalorder %s5543_s9, %s5543_s9 }
  0x88   :  { %p5550_p12 = por %p5549_p11, %p5548_p10 }
  0x8a   :  { %p5551_p13 = pnand %p5550_p12, %p5544_p9 }
  0x8c   :  { %5554 = shalt.err (!%p5551_p13)
}
  0x8d   :  { %78 = dma.hbm_to_vmem [thread:$0]  %s6623_s8, 32, %s73_s13, [#allocation6], %s5708_s2, %s5708_s2, %s5709_s29  }
  0x8e   :  { %s5714_s23 = smov [#allocation10]   ;;  %s5715_s22 = smov [#allocation13]  }
  0x8f   :  { %s98_s28 = sshll.u32 %s5714_s23, 4  ;;  %s124_s0 = sshll.u32 %s5715_s22, 4  ;;  %s99_s28 = int_to_ptr.vmem [resolvable:$true] %s98_s28  ;;  %s125_s0 = int_to_ptr.vmem [resolvable:$true] %s124_s0 }
  0x90   :  { %s5555_s12 = scalar_lea.hbm %s6626_s11, 32 }
  0x91   :  { %p5556_p0 = scmp.ne.s32.totalorder %s6626_s11, %s5555_s12  ;;  %p5559_p1 = scmp.lt.u32.totalorder %s5555_s12, %s6626_s11 }
  0x93   :  { %p5561_p2 = pnand %p5559_p1, %p5556_p0 }
  0x95   :  { %5564 = shalt.err (!%p5561_p2)
}
  0x96   :  { %s5565_s8 = scalar_lea.vmem %s99_s28, 32  ;;  %p5570_p4 = scmp.lt.s32.totalorder %s99_s28, %s99_s28 }
  0x97   :  { %p5566_p3 = scmp.ne.s32.totalorder %s99_s28, %s5565_s8  ;;  %p5571_p5 = scmp.lt.s32.totalorder %s5565_s8, %s5565_s8 }
  0x99   :  { %p5572_p6 = por %p5571_p5, %p5570_p4 }
  0x9b   :  { %p5573_p7 = pnand %p5572_p6, %p5566_p3 }
  0x9d   :  { %5576 = shalt.err (!%p5573_p7)
}
  0x9e   :  { %104 = dma.hbm_to_vmem [thread:$0]  %s6626_s11, 32, %s99_s28, [#allocation9], %s5708_s2, %s5708_s2, %s5709_s29  }
  0x9f   :  { %s5577_s26 = scalar_lea.hbm %s6629_s14, 32 }
  0xa0   :  { %p5578_p8 = scmp.ne.s32.totalorder %s6629_s14, %s5577_s26  ;;  %p5581_p9 = scmp.lt.u32.totalorder %s5577_s26, %s6629_s14 }
  0xa2   :  { %p5583_p10 = pnand %p5581_p9, %p5578_p8 }
  0xa4   :  { %5586 = shalt.err (!%p5583_p10)
}
  0xa5   :  { %s5587_s22 = scalar_lea.vmem %s125_s0, 32  ;;  %p5592_p12 = scmp.lt.s32.totalorder %s125_s0, %s125_s0 }
  0xa6   :  { %p5588_p11 = scmp.ne.s32.totalorder %s125_s0, %s5587_s22  ;;  %p5593_p13 = scmp.lt.s32.totalorder %s5587_s22, %s5587_s22 }
  0xa8   :  { %p5594_p0 = por %p5593_p13, %p5592_p12 }
  0xaa   :  { %p5595_p1 = pnand %p5594_p0, %p5588_p11 }
  0xac   :  { %5598 = shalt.err (!%p5595_p1)
}
  0xad   :  { %130 = dma.hbm_to_vmem [thread:$0]  %s6629_s14, 32, %s125_s0, [#allocation12], %s5708_s2, %s5708_s2, %s5709_s29  }
  0xae   :  { %s5716_s17 = smov [#allocation16]   ;;  %s5599_s21 = scalar_lea.hbm %s6631_s16, 1024 }
  0xaf   :  { %s148_s30 = sshll.u32 %s5716_s17, 4  ;;  %p5600_p2 = scmp.ne.s32.totalorder %s6631_s16, %s5599_s21  ;;  %s149_s30 = int_to_ptr.vmem [resolvable:$true] %s148_s30 }
  0xb0   :  { %p5603_p3 = scmp.lt.u32.totalorder %s5599_s21, %s6631_s16 }
  0xb2   :  { %p5605_p4 = pnand %p5603_p3, %p5600_p2 }
  0xb4   :  { %5608 = shalt.err (!%p5605_p4)
}
  0xb5   :  { %s5609_s1 = scalar_lea.vmem %s149_s30, 1024  ;;  %p5614_p6 = scmp.lt.s32.totalorder %s149_s30, %s149_s30 }
  0xb6   :  { %p5610_p5 = scmp.ne.s32.totalorder %s149_s30, %s5609_s1  ;;  %p5615_p7 = scmp.lt.s32.totalorder %s5609_s1, %s5609_s1 }
  0xb8   :  { %p5616_p8 = por %p5615_p7, %p5614_p6 }
  0xba   :  { %p5617_p9 = pnand %p5616_p8, %p5610_p5 }
  0xbc   :  { %5620 = shalt.err (!%p5617_p9)
}
  0xbd   :  { %s5717_s14 = smov 64   ;;  %s5718_s2 = smov 4  }
  0xbe   :  { %154 = dma.hbm_to_vmem [thread:$0]  %s6631_s16, 1024, %s149_s30, [#allocation15], %s5717_s14, %s5717_s14, %s5718_s2  }
  0xbf   :  { %s5719_s3 = smov [#allocation19]   ;;  %s5720_s26 = smov [#allocation20]  }
  0xc0   :  { %s170_s25 = sshll.u32 %s5719_s3, 4  ;;  %s183_s9 = sshll.u32 %s5720_s26, 4  ;;  %s171_s25 = int_to_ptr.vmem [resolvable:$true] %s170_s25  ;;  %s184_s9 = int_to_ptr.vmem [resolvable:$true] %s183_s9 }
  0xc1   :  { %s5621_s23 = scalar_lea.hbm %s6633_s18, 1024 }
  0xc2   :  { %p5622_p10 = scmp.ne.s32.totalorder %s6633_s18, %s5621_s23  ;;  %p5625_p11 = scmp.lt.u32.totalorder %s5621_s23, %s6633_s18 }
  0xc4   :  { %p5627_p12 = pnand %p5625_p11, %p5622_p10 }
  0xc6   :  { %5630 = shalt.err (!%p5627_p12)
}
  0xc7   :  { %s5631_s16 = scalar_lea.vmem %s171_s25, 1024  ;;  %p5636_p0 = scmp.lt.s32.totalorder %s171_s25, %s171_s25 }
  0xc8   :  { %p5632_p13 = scmp.ne.s32.totalorder %s171_s25, %s5631_s16  ;;  %p5637_p1 = scmp.lt.s32.totalorder %s5631_s16, %s5631_s16 }
  0xca   :  { %p5638_p2 = por %p5637_p1, %p5636_p0 }
  0xcc   :  { %p5639_p3 = pnand %p5638_p2, %p5632_p13 }
  0xce   :  { %5642 = shalt.err (!%p5639_p3)
}
  0xcf   :  { %176 = dma.hbm_to_vmem [thread:$0]  %s6633_s18, 1024, %s171_s25, [#allocation18], %s5717_s14, %s5717_s14, %s5718_s2  }
  0xd0   :  { %s5643_s15 = scalar_lea.hbm %s6634_s19, 16 }
  0xd1   :  { %p5644_p4 = scmp.ne.s32.totalorder %s6634_s19, %s5643_s15  ;;  %p5647_p5 = scmp.lt.u32.totalorder %s5643_s15, %s6634_s19 }
  0xd3   :  { %p5649_p6 = pnand %p5647_p5, %p5644_p4 }
  0xd5   :  { %5652 = shalt.err (!%p5649_p6)
}
  0xd6   :  { %s5653_s29 = scalar_lea.vmem %s184_s9, 16  ;;  %s5657_s0 = scalar_lea.vmem %s184_s9, 32 }
  0xd7   :  { %p5654_p7 = scmp.ne.s32.totalorder %s184_s9, %s5653_s29  ;;  %p5658_p8 = scmp.lt.s32.totalorder %s184_s9, %s184_s9 }
  0xd8   :  { %p5659_p9 = scmp.lt.s32.totalorder %s5657_s0, %s5653_s29 }
  0xda   :  { %p5660_p10 = por %p5659_p9, %p5658_p8 }
  0xdc   :  { %p5661_p11 = pnand %p5660_p10, %p5654_p7 }
  0xde   :  { %5664 = shalt.err (!%p5661_p11)
}
  0xdf   :  { %186 = dma.hbm_to_vmem [thread:$0]  %s6634_s19, 16, %s184_s9, [#allocation21]  }
  0xe0   :  { %5687 = dma.done.wait [#allocation3], 16  }
  0xe1   :  { %5688 = vsyncadd [#allocation3], 4294967280 }
  0xe2   :  { %5689 = dma.done.wait [#allocation6], 24608  }
  0xe3   :  { %5690 = vsyncadd [#allocation6], 4294942688 }
  0xe4   :  { %5691 = dma.done.wait [#allocation9], 64  }
  0xe5   :  { %5692 = vsyncadd [#allocation9], 4294967232 }
  0xe6   :  { %5693 = dma.done.wait [#allocation12], 64  }
  0xe7   :  { %5694 = vsyncadd [#allocation12], 4294967232 }
  0xe8   :  { %5695 = dma.done.wait [#allocation15], 1056  }
  0xe9   :  { %5696 = vsyncadd [#allocation15], 4294966240 }
  0xea   :  { %5697 = dma.done.wait [#allocation18], 1040  }
  0xeb   :  { %5698 = vsyncadd [#allocation18], 4294966256 }
  0xec   :  { %5699 = dma.done.wait [#allocation21], 16  }
  0xed   :  { %5700 = vsyncadd [#allocation21], 4294967280  ;;  %vm262_vm0 = vcmask 261120   ;;  %s6650_s25 = sld [smem:[#allocation31_spill]]  ;;  %v4951_v4 = vld [vmem:[#allocation5 + $0x4] ss:$48 sps:$4 sm:$0xff]   ;;  %v224_v12 = vlaneseq }
  0xee   :  { %v4953_v5 = vld [vmem:[#allocation5 + $0xc] ss:$48 sps:$4 sm:$0xff]   ;;  %v4955_v6 = vld [vmem:[#allocation5] ss:$48 sps:$4 sm:$0xff]   ;;  %v4956_v7 = vld [vmem:[#allocation5 + $0x8] ss:$48 sps:$4 sm:$0xff]   ;;  %950 = vmatprep.subr.bf16.mxu0 %v4951_v4 }
  0xef   :  { %v4957_v8 = vld [vmem:[#allocation5 + $0x64] ss:$48 sps:$4 sm:$0xff]   ;;  %v4959_v9 = vld [vmem:[#allocation5 + $0x6c] ss:$48 sps:$4 sm:$0xff]   ;;  %993 = vmatprep.subr.bf16.mxu1 %v4953_v5  ;;  %v4961_v10 = vld [vmem:[#allocation5 + $0x60] ss:$48 sps:$4 sm:$0xff]   ;;  %951 = vmatpush1.bf16.msra.mxu0 %v4955_v6 }
  0xf0   :  { %994 = vmatpush1.bf16.msra.mxu1 %v4956_v7  ;;  %v4962_v11 = vld [vmem:[#allocation5 + $0x68] ss:$48 sps:$4 sm:$0xff]   ;;  %952 = vmatprep.subr.bf16.mxu0 %v4957_v8  ;;  %v5999_v13 = vand.u32 127, %v224_v12  ;;  %v5721_v16 = vmov 0.0   ;;  %v4963_v26 = vld [vmem:[#allocation5 + $0xc4] ss:$48 sps:$4 sm:$0xff]  }
  0xf1   :  { %995 = vmatprep.subr.bf16.mxu1 %v4959_v9  ;;  %v4965_v27 = vld [vmem:[#allocation5 + $0xcc] ss:$48 sps:$4 sm:$0xff]   ;;  %v4967_v28 = vld [vmem:[#allocation5 + $0xc0] ss:$48 sps:$4 sm:$0xff]   ;;  %v4968_v29 = vld [vmem:[#allocation5 + $0xc8] ss:$48 sps:$4 sm:$0xff]  }
  0xf2   :  { %vm226_vm1 = vcmp.lt.s32.totalorder %v5999_v13, 32  ;;  %v4969_v30 = vld [vmem:[#allocation5 + $0x124] ss:$48 sps:$4 sm:$0xff]   ;;  %v4971_v31 = vld [vmem:[#allocation5 + $0x12c] ss:$48 sps:$4 sm:$0xff]   ;;  %v5722_v51 = vmov 0  }
  0xf3   :  { %v260_v0 = vld [vmem:[%s6650_s25] sm:$0xff]  ;;  %v261_v1 = vld [vmem:[%s6650_s25 + $0x8] sm:$0xff]  ;;  %953 = vmatpush1.bf16.msra.mxu0 %v4961_v10  ;;  %v6003_v17 = vsel %vm226_vm1, 1.0, %v5721_v16  ;;  %982 = vmatprep.mubr.bf16.mxu0 %v5722_v51  ;;  %s6651_s27 = sld [smem:[#allocation33_spill]]  ;;  %vm5723_vm2 = vmmov 0   ;;  %s6652_s30 = sld [smem:[#allocation32_spill]] }
  0xf4   :  { %v263_v2 = vsel %vm262_vm0, %v260_v0, 0.0  ;;  %v264_v3 = vsel %vm262_vm0, %v261_v1, 0.0  ;;  %996 = vmatpush1.bf16.msra.mxu1 %v4962_v11  ;;  %954 = vmatprep.subr.bf16.mxu0 %v4963_v26  ;;  %v4973_v32 = vld [vmem:[#allocation5 + $0x120] ss:$48 sps:$4 sm:$0xff]   ;;  %v4974_v33 = vld [vmem:[#allocation5 + $0x128] ss:$48 sps:$4 sm:$0xff]  }
  0xf5   :  { %269 = vadd.xlane.f32.xlu0 %v263_v2  ;;  %997 = vmatprep.subr.bf16.mxu1 %v4965_v27  ;;  %v4975_v34 = vld [vmem:[#allocation5 + $0x184] ss:$48 sps:$4 sm:$0xff]   ;;  %v4977_v35 = vld [vmem:[#allocation5 + $0x18c] ss:$48 sps:$4 sm:$0xff]   ;;  %v4979_v36 = vld [vmem:[#allocation5 + $0x180] ss:$48 sps:$4 sm:$0xff]  }
  0xf6   :  { %v4980_v37 = vld [vmem:[#allocation5 + $0x188] ss:$48 sps:$4 sm:$0xff]   ;;  %v4981_v38 = vld [vmem:[#allocation5 + $0x1e4] ss:$48 sps:$4 sm:$0xff]   ;;  %v4983_v39 = vld [vmem:[#allocation5 + $0x1ec] ss:$48 sps:$4 sm:$0xff]   ;;  %1025 = vmatprep.mubr.bf16.mxu1 %v5722_v51 }
  0xf7   :  { %955 = vmatpush1.bf16.msra.mxu0 %v4967_v28  ;;  %v4985_v40 = vld [vmem:[#allocation5 + $0x1e0] ss:$48 sps:$4 sm:$0xff]   ;;  %v4986_v41 = vld [vmem:[#allocation5 + $0x1e8] ss:$48 sps:$4 sm:$0xff]   ;;  %v4987_v42 = vld [vmem:[#allocation5 + $0x244] ss:$48 sps:$4 sm:$0xff]  }
  0xf8   :  { %998 = vmatpush1.bf16.msra.mxu1 %v4968_v29  ;;  %956 = vmatprep.subr.bf16.mxu0 %v4969_v30  ;;  %v4989_v43 = vld [vmem:[#allocation5 + $0x24c] ss:$48 sps:$4 sm:$0xff]   ;;  %v4991_v44 = vld [vmem:[#allocation5 + $0x240] ss:$48 sps:$4 sm:$0xff]   ;;  %v4992_v45 = vld [vmem:[#allocation5 + $0x248] ss:$48 sps:$4 sm:$0xff]  }
  0xf9   :  { %271 = vadd.xlane.f32.xlu0 %v264_v3  ;;  %999 = vmatprep.subr.bf16.mxu1 %v4971_v31  ;;  %v4993_v46 = vld [vmem:[#allocation5 + $0x2a4] ss:$48 sps:$4 sm:$0xff]   ;;  %v4995_v47 = vld [vmem:[#allocation5 + $0x2ac] ss:$48 sps:$4 sm:$0xff]   ;;  %v4997_v48 = vld [vmem:[#allocation5 + $0x2a0] ss:$48 sps:$4 sm:$0xff]  }
  0xfa   :  { %v4998_v49 = vld [vmem:[#allocation5 + $0x2a8] ss:$48 sps:$4 sm:$0xff]   ;;  %v5001_v50 = vld [vmem:[#allocation5 + $0x14] ss:$48 sps:$4 sm:$0xff]   ;;  %v5004_v52 = vld [vmem:[#allocation5 + $0x1c] ss:$48 sps:$4 sm:$0xff]  }
  0xfb   :  { %957 = vmatpush1.bf16.msra.mxu0 %v4973_v32  ;;  %v4211_v61 = vld [vmem:[%s6651_s27] ss:$0 sm:$0xff]  ;;  %v4999_v5 = vld [vmem:[#allocation5 + $0x10] ss:$48 sps:$4 sm:$0xff]   ;;  %v5002_v6 = vld [vmem:[#allocation5 + $0x18] ss:$48 sps:$4 sm:$0xff]  }
  0xfc   :  { %1000 = vmatpush1.bf16.msra.mxu1 %v4974_v33  ;;  %958 = vmatprep.subr.bf16.mxu0 %v4975_v34  ;;  %v4212_v1 = vld [vmem:[#allocation2] ss:$0 sm:$0xff]  ;;  %v5007_v8 = vld [vmem:[#allocation5 + $0x74] ss:$48 sps:$4 sm:$0xff]   ;;  %v5005_v10 = vld [vmem:[#allocation5 + $0x70] ss:$48 sps:$4 sm:$0xff]  }
  0xfd   :  { %1001 = vmatprep.subr.bf16.mxu1 %v4977_v35  ;;  %v5010_v9 = vld [vmem:[#allocation5 + $0x7c] ss:$48 sps:$4 sm:$0xff]   ;;  %v5008_v11 = vld [vmem:[#allocation5 + $0x78] ss:$48 sps:$4 sm:$0xff]   ;;  %v5023_v26 = vld [vmem:[#allocation5 + $0x190] ss:$48 sps:$4 sm:$0xff]  }
  0xfe   :  { %v5026_v27 = vld [vmem:[#allocation5 + $0x198] ss:$48 sps:$4 sm:$0xff]   ;;  %v5031_v28 = vld [vmem:[#allocation5 + $0x1f4] ss:$48 sps:$4 sm:$0xff]   ;;  %v5034_v29 = vld [vmem:[#allocation5 + $0x1fc] ss:$48 sps:$4 sm:$0xff]  }
  0xff   :  { %959 = vmatpush1.bf16.msra.mxu0 %v4979_v36  ;;  %v5029_v30 = vld [vmem:[#allocation5 + $0x1f0] ss:$48 sps:$4 sm:$0xff]   ;;  %v5032_v31 = vld [vmem:[#allocation5 + $0x1f8] ss:$48 sps:$4 sm:$0xff]   ;;  %v5037_v32 = vld [vmem:[#allocation5 + $0x254] ss:$48 sps:$4 sm:$0xff]  }
 0x100   :  { %1002 = vmatpush1.bf16.msra.mxu1 %v4980_v37  ;;  %960 = vmatprep.subr.bf16.mxu0 %v4981_v38  ;;  %v5040_v33 = vld [vmem:[#allocation5 + $0x25c] ss:$48 sps:$4 sm:$0xff]   ;;  %v5035_v34 = vld [vmem:[#allocation5 + $0x250] ss:$48 sps:$4 sm:$0xff]   ;;  %v5038_v35 = vld [vmem:[#allocation5 + $0x258] ss:$48 sps:$4 sm:$0xff]  }
 0x101   :  { %1003 = vmatprep.subr.bf16.mxu1 %v4983_v39  ;;  %v5043_v36 = vld [vmem:[#allocation5 + $0x2b4] ss:$48 sps:$4 sm:$0xff]   ;;  %v5046_v37 = vld [vmem:[#allocation5 + $0x2bc] ss:$48 sps:$4 sm:$0xff]   ;;  %v5041_v38 = vld [vmem:[#allocation5 + $0x2b0] ss:$48 sps:$4 sm:$0xff]  }
 0x102   :  { %v5044_v39 = vld [vmem:[#allocation5 + $0x2b8] ss:$48 sps:$4 sm:$0xff]   ;;  %vm1255_vm5 = vcmask 130048   ;;  %s6653_s0 = sld [smem:[#allocation36_spill]]  ;;  %vm3941_vm6 = vcmask 1040384   ;;  %vm4168_vm7 = vcmp.ge.s32.totalorder %v5999_v13, 3 }
 0x103   :  { %961 = vmatpush1.bf16.msra.mxu0 %v4985_v40  ;;  %v5049_v40 = vld [vmem:[#allocation5 + $0x24] ss:$48 sps:$4 sm:$0xff]   ;;  %vm4173_vm8 = vcmask 1041408  }
 0x104   :  { %1004 = vmatpush1.bf16.msra.mxu1 %v4986_v41  ;;  %962 = vmatprep.subr.bf16.mxu0 %v4987_v42  ;;  %v5052_v41 = vld [vmem:[#allocation5 + $0x2c] ss:$48 sps:$4 sm:$0xff]   ;;  %v5047_v42 = vld [vmem:[#allocation5 + $0x20] ss:$48 sps:$4 sm:$0xff]  }
 0x105   :  { %1005 = vmatprep.subr.bf16.mxu1 %v4989_v43  ;;  %v5050_v43 = vld [vmem:[#allocation5 + $0x28] ss:$48 sps:$4 sm:$0xff]  }
 0x107   :  { %963 = vmatpush1.bf16.msra.mxu0 %v4991_v44  ;;  %v5055_v44 = vld [vmem:[#allocation5 + $0x84] ss:$48 sps:$4 sm:$0xff]  }
 0x108   :  { %1006 = vmatpush1.bf16.msra.mxu1 %v4992_v45  ;;  %964 = vmatprep.subr.bf16.mxu0 %v4993_v46  ;;  %v5058_v45 = vld [vmem:[#allocation5 + $0x8c] ss:$48 sps:$4 sm:$0xff]   ;;  %v5053_v46 = vld [vmem:[#allocation5 + $0x80] ss:$48 sps:$4 sm:$0xff]  }
 0x109   :  { %1007 = vmatprep.subr.bf16.mxu1 %v4995_v47  ;;  %v5056_v47 = vld [vmem:[#allocation5 + $0x88] ss:$48 sps:$4 sm:$0xff]  }
 0x10b   :  { %965 = vmatpush1.bf16.msra.mxu0 %v4997_v48  ;;  %v5061_v48 = vld [vmem:[#allocation5 + $0xe4] ss:$48 sps:$4 sm:$0xff]  }
 0x10c   :  { %1008 = vmatpush1.bf16.msra.mxu1 %v4998_v49  ;;  %1036 = vmatprep.subr.bf16.mxu0 %v5001_v50  ;;  %v5064_v49 = vld [vmem:[#allocation5 + $0xec] ss:$48 sps:$4 sm:$0xff]   ;;  %v5059_v50 = vld [vmem:[#allocation5 + $0xe0] ss:$48 sps:$4 sm:$0xff]  }
 0x10d   :  { %1079 = vmatprep.subr.bf16.mxu1 %v5004_v52  ;;  %v5062_v52 = vld [vmem:[#allocation5 + $0xe8] ss:$48 sps:$4 sm:$0xff]  }
 0x182   :  { %v270_v14 = vpop.xlane.xlu0 %269 }
 0x183   :  { %v273_v15 = vmul.f32 0.03125, %v270_v14  ;;  %v5013_v14 = vld [vmem:[#allocation5 + $0xd4] ss:$48 sps:$4 sm:$0xff]  }
 0x185   :  { %v275_v18 = vsub.f32 %v263_v2, %v273_v15  ;;  %v5016_v15 = vld [vmem:[#allocation5 + $0xdc] ss:$48 sps:$4 sm:$0xff]  }
 0x186   :  { %v272_v19 = vpop.xlane.xlu0 %271 }
 0x187   :  { %v274_v20 = vmul.f32 0.03125, %v272_v19  ;;  %v6006_v21 = vmul.f32 %v6003_v17, %v275_v18  ;;  %v5011_v18 = vld [vmem:[#allocation5 + $0xd0] ss:$48 sps:$4 sm:$0xff]   ;;  %v5014_v19 = vld [vmem:[#allocation5 + $0xd8] ss:$48 sps:$4 sm:$0xff]  }
 0x189   :  { %v276_v22 = vsub.f32 %v264_v3, %v274_v20  ;;  %v279_v23 = vmul.f32 %v6006_v21, %v6006_v21  ;;  %v5019_v20 = vld [vmem:[#allocation5 + $0x134] ss:$48 sps:$4 sm:$0xff]  }
 0x18b   :  { %281 = vadd.xlane.f32.xlu1 %v279_v23  ;;  %v6011_v24 = vmul.f32 %v6003_v17, %v276_v22  ;;  %v5017_v22 = vld [vmem:[#allocation5 + $0x130] ss:$48 sps:$4 sm:$0xff]   ;;  %v5020_v23 = vld [vmem:[#allocation5 + $0x138] ss:$48 sps:$4 sm:$0xff]  }
 0x18d   :  { %v280_v25 = vmul.f32 %v6011_v24, %v6011_v24 }
 0x18f   :  { %283 = vadd.xlane.f32.xlu1 %v280_v25  ;;  %v5028_v25 = vld [vmem:[#allocation5 + $0x19c] ss:$48 sps:$4 sm:$0xff]  }
 0x218   :  { %v282_v53 = vpop.xlane.xlu1 %281 }
 0x219   :  { %v285_v54 = vmul.f32 0.03125, %v282_v53  ;;  %v5067_v53 = vld [vmem:[#allocation5 + $0x144] ss:$48 sps:$4 sm:$0xff]  }
 0x21b   :  { %v287_v55 = vadd.f32 1e-12, %v285_v54  ;;  %v5070_v54 = vld [vmem:[#allocation5 + $0x14c] ss:$48 sps:$4 sm:$0xff]  }
 0x21c   :  { %v284_v56 = vpop.xlane.xlu1 %283 }
 0x21d   :  { %5303 = vrsqrt.f32 %v287_v55  ;;  %v286_v57 = vmul.f32 0.03125, %v284_v56  ;;  %v5065_v55 = vld [vmem:[#allocation5 + $0x140] ss:$48 sps:$4 sm:$0xff]   ;;  %v5068_v56 = vld [vmem:[#allocation5 + $0x148] ss:$48 sps:$4 sm:$0xff]  }
 0x21f   :  { %v288_v58 = vadd.f32 1e-12, %v286_v57  ;;  %v5073_v57 = vld [vmem:[#allocation5 + $0x1a4] ss:$48 sps:$4 sm:$0xff]  }
 0x221   :  { %5305 = vrsqrt.f32 %v288_v58  ;;  %v5076_v58 = vld [vmem:[#allocation5 + $0x1ac] ss:$48 sps:$4 sm:$0xff]  }
 0x227   :  { %v5304_v59 = vpop.eup %5303 }
 0x228   :  { %v291_v60 = vmul.f32 %v5304_v59, %v6006_v21  ;;  %v5022_v21 = vld [vmem:[#allocation5 + $0x13c] ss:$48 sps:$4 sm:$0xff]   ;;  %v5071_v59 = vld [vmem:[#allocation5 + $0x1a0] ss:$48 sps:$4 sm:$0xff]  }
 0x22a   :  { %v299_v63 = vmul.f32 %v4211_v61, %v291_v60  ;;  %v5074_v60 = vld [vmem:[#allocation5 + $0x1a8] ss:$48 sps:$4 sm:$0xff]  }
 0x22b   :  { %v5306_v62 = vpop.eup %5305 }
 0x22c   :  { %v292_v0 = vmul.f32 %v5306_v62, %v6011_v24  ;;  %v6022_v3 = vadd.f32 %v4212_v1, %v299_v63  ;;  %v5025_v24 = vld [vmem:[#allocation5 + $0x194] ss:$48 sps:$4 sm:$0xff]   ;;  %v5082_v62 = vld [vmem:[#allocation5 + $0x20c] ss:$48 sps:$4 sm:$0xff]   ;;  %v5077_v63 = vld [vmem:[#allocation5 + $0x200] ss:$48 sps:$4 sm:$0xff]  }
 0x22e   :  { %v300_v2 = vmul.f32 %v4211_v61, %v292_v0  ;;  %v5079_v61 = vld [vmem:[#allocation5 + $0x204] ss:$48 sps:$4 sm:$0xff]   ;;  %v5080_v0 = vld [vmem:[#allocation5 + $0x208] ss:$48 sps:$4 sm:$0xff]  }
 0x230   :  { %v6024_v4 = vadd.f32 %v4212_v1, %v300_v2  ;;  %v5085_v1 = vld [vmem:[#allocation5 + $0x264] ss:$48 sps:$4 sm:$0xff]   ;;  %v5088_v2 = vld [vmem:[#allocation5 + $0x26c] ss:$48 sps:$4 sm:$0xff]  }
 0x232   :  { %v6028_v7 = vpack.c.bf16 %v6024_v4, %v6022_v3 }
 0x234   :  { %983 = vmatmul.mubr.bf16.vlgmr.msra.gmra.mrb[0].mxu0 %v6028_v7  ;;  %1026 = vmatmul.mubr.bf16.vlgmr.msra.gmra.mrb[0].mxu1 %v6028_v7 }
 0x235   :  { %1037 = vmatpush1.bf16.msra.mxu0 %v4999_v5  ;;  %1080 = vmatpush1.bf16.msra.mxu1 %v5002_v6  ;;  %v5083_v5 = vld [vmem:[#allocation5 + $0x260] ss:$48 sps:$4 sm:$0xff]   ;;  %v5086_v6 = vld [vmem:[#allocation5 + $0x268] ss:$48 sps:$4 sm:$0xff]  }
 0x236   :  { %1038 = vmatprep.subr.bf16.mxu0 %v5007_v8  ;;  %1081 = vmatprep.subr.bf16.mxu1 %v5010_v9  ;;  %v5091_v8 = vld [vmem:[#allocation5 + $0x2c4] ss:$48 sps:$4 sm:$0xff]   ;;  %v5094_v9 = vld [vmem:[#allocation5 + $0x2cc] ss:$48 sps:$4 sm:$0xff]  }
 0x237   :  { %1068 = vmatprep.mubr.bf16.mxu0 %v5722_v51  ;;  %1111 = vmatprep.mubr.bf16.mxu1 %v5722_v51 }
 0x239   :  { %1039 = vmatpush1.bf16.msra.mxu0 %v5005_v10  ;;  %1082 = vmatpush1.bf16.msra.mxu1 %v5008_v11  ;;  %v5089_v10 = vld [vmem:[#allocation5 + $0x2c0] ss:$48 sps:$4 sm:$0xff]   ;;  %v5092_v11 = vld [vmem:[#allocation5 + $0x2c8] ss:$48 sps:$4 sm:$0xff]  }
 0x23a   :  { %1040 = vmatprep.subr.bf16.mxu0 %v5013_v14  ;;  %1083 = vmatprep.subr.bf16.mxu1 %v5016_v15  ;;  %v6047_v14 = vshrl.u32 %v224_v12, 7 }
 0x23c   :  { %v6050_v15 = vsub.s32 0, %v6047_v14 }
 0x23d   :  { %1041 = vmatpush1.bf16.msra.mxu0 %v5011_v18  ;;  %1084 = vmatpush1.bf16.msra.mxu1 %v5014_v19  ;;  %v6053_v18 = vsub.s32 2, %v6047_v14  ;;  %v6059_v19 = vsub.s32 1, %v6047_v14 }
 0x23e   :  { %1042 = vmatprep.subr.bf16.mxu0 %v5019_v20  ;;  %1085 = vmatprep.subr.bf16.mxu1 %v5022_v21  ;;  %v6062_v20 = vsub.s32 3, %v6047_v14 }
 0x241   :  { %1043 = vmatpush1.bf16.msra.mxu0 %v5017_v22  ;;  %1086 = vmatpush1.bf16.msra.mxu1 %v5020_v23 }
 0x242   :  { %1044 = vmatprep.subr.bf16.mxu0 %v5025_v24  ;;  %1087 = vmatprep.subr.bf16.mxu1 %v5028_v25 }
 0x245   :  { %1045 = vmatpush1.bf16.msra.mxu0 %v5023_v26  ;;  %1088 = vmatpush1.bf16.msra.mxu1 %v5026_v27 }
 0x246   :  { %1046 = vmatprep.subr.bf16.mxu0 %v5031_v28  ;;  %1089 = vmatprep.subr.bf16.mxu1 %v5034_v29 }
 0x249   :  { %1047 = vmatpush1.bf16.msra.mxu0 %v5029_v30  ;;  %1090 = vmatpush1.bf16.msra.mxu1 %v5032_v31 }
 0x24a   :  { %1048 = vmatprep.subr.bf16.mxu0 %v5037_v32  ;;  %1091 = vmatprep.subr.bf16.mxu1 %v5040_v33 }
 0x24d   :  { %1049 = vmatpush1.bf16.msra.mxu0 %v5035_v34  ;;  %1092 = vmatpush1.bf16.msra.mxu1 %v5038_v35 }
 0x24e   :  { %1050 = vmatprep.subr.bf16.mxu0 %v5043_v36  ;;  %1093 = vmatprep.subr.bf16.mxu1 %v5046_v37 }
 0x251   :  { %1051 = vmatpush1.bf16.msra.mxu0 %v5041_v38  ;;  %1094 = vmatpush1.bf16.msra.mxu1 %v5044_v39 }
 0x252   :  { %1122 = vmatprep.subr.bf16.mxu0 %v5049_v40  ;;  %1165 = vmatprep.subr.bf16.mxu1 %v5052_v41 }
 0x254   :  { %1069 = vmatmul.mubr.bf16.vlgmr.msra.gmra.mrb[4].mxu0 %v6028_v7  ;;  %1112 = vmatmul.mubr.bf16.vlgmr.msra.gmra.mrb[4].mxu1 %v6028_v7 }
 0x255   :  { %1123 = vmatpush1.bf16.msra.mxu0 %v5047_v42  ;;  %1166 = vmatpush1.bf16.msra.mxu1 %v5050_v43 }
 0x256   :  { %1124 = vmatprep.subr.bf16.mxu0 %v5055_v44  ;;  %1167 = vmatprep.subr.bf16.mxu1 %v5058_v45  ;;  %v428_v44 = vsub.s32 4, %v6047_v14  ;;  %v436_v45 = vsub.s32 6, %v6047_v14 }
 0x257   :  { %1154 = vmatprep.mubr.bf16.mxu0 %v5722_v51  ;;  %1197 = vmatprep.mubr.bf16.mxu1 %v5722_v51 }
 0x259   :  { %1125 = vmatpush1.bf16.msra.mxu0 %v5053_v46  ;;  %1168 = vmatpush1.bf16.msra.mxu1 %v5056_v47  ;;  %v432_v46 = vsub.s32 5, %v6047_v14  ;;  %v440_v47 = vsub.s32 7, %v6047_v14 }
 0x25a   :  { %1126 = vmatprep.subr.bf16.mxu0 %v5061_v48  ;;  %1169 = vmatprep.subr.bf16.mxu1 %v5064_v49 }
 0x25d   :  { %1127 = vmatpush1.bf16.msra.mxu0 %v5059_v50  ;;  %1170 = vmatpush1.bf16.msra.mxu1 %v5062_v52 }
 0x25e   :  { %1128 = vmatprep.subr.bf16.mxu0 %v5067_v53  ;;  %1171 = vmatprep.subr.bf16.mxu1 %v5070_v54 }
 0x261   :  { %1129 = vmatpush1.bf16.msra.mxu0 %v5065_v55  ;;  %1172 = vmatpush1.bf16.msra.mxu1 %v5068_v56 }
 0x262   :  { %1130 = vmatprep.subr.bf16.mxu0 %v5073_v57  ;;  %1173 = vmatprep.subr.bf16.mxu1 %v5076_v58 }
 0x265   :  { %1131 = vmatpush1.bf16.msra.mxu0 %v5071_v59  ;;  %1174 = vmatpush1.bf16.msra.mxu1 %v5074_v60 }
 0x266   :  { %1132 = vmatprep.subr.bf16.mxu0 %v5079_v61  ;;  %1175 = vmatprep.subr.bf16.mxu1 %v5082_v62 }
 0x269   :  { %1133 = vmatpush1.bf16.msra.mxu0 %v5077_v63  ;;  %1176 = vmatpush1.bf16.msra.mxu1 %v5080_v0 }
 0x26a   :  { %1134 = vmatprep.subr.bf16.mxu0 %v5085_v1  ;;  %1177 = vmatprep.subr.bf16.mxu1 %v5088_v2 }
 0x26d   :  { %1135 = vmatpush1.bf16.msra.mxu0 %v5083_v5  ;;  %1178 = vmatpush1.bf16.msra.mxu1 %v5086_v6 }
 0x26e   :  { %1136 = vmatprep.subr.bf16.mxu0 %v5091_v8  ;;  %1179 = vmatprep.subr.bf16.mxu1 %v5094_v9 }
 0x271   :  { %1137 = vmatpush1.bf16.msra.mxu0 %v5089_v10  ;;  %1180 = vmatpush1.bf16.msra.mxu1 %v5092_v11 }
 0x272   :  { %4649 = vmatprep.subr.bf16.mxu0 %v5721_v16  ;;  %4673 = vmatprep.subr.bf16.mxu1 %v5721_v16 }
 0x274   :  { %1155 = vmatmul.mubr.bf16.vlgmr.msra.gmra.mrb[8].mxu0 %v6028_v7  ;;  %1198 = vmatmul.mubr.bf16.vlgmr.msra.gmra.mrb[8].mxu1 %v6028_v7  ;;  %v406_v7 = vld [vmem:[%s6620_s5] sm:$0xff] }
 0x275   :  { %4651 = vmatprep.mubr.msk.bf16.mxu0 %vm5723_vm2, %v5721_v16  ;;  %4675 = vmatprep.mubr.msk.bf16.mxu1 %vm5723_vm2, %v5721_v16  ;;  %v413_v21 = vrot.slane %v406_v7, %v6050_v15  ;;  %v421_v12 = vrot.slane %v406_v7, %v6053_v18  ;;  %v417_v24 = vrot.slane %v406_v7, %v6059_v19 }
 0x276   :  { %v425_v25 = vrot.slane %v406_v7, %v6062_v20  ;;  %v429_v48 = vrot.slane %v406_v7, %v428_v44  ;;  %v437_v49 = vrot.slane %v406_v7, %v436_v45  ;;  %v433_v53 = vrot.slane %v406_v7, %v432_v46 }
 0x277   :  { %v441_v54 = vrot.slane %v406_v7, %v440_v47  ;;  %v407_v7 = vld [vmem:[%s6620_s5 + $0x8] sm:$0xf] }
 0x307   :  { %v984_v22 = vpop.f32.mrb[0].mxu0  ;;  %v1027_v23 = vpop.f32.mrb[0].mxu1 }
 0x308   :  { %v986_v26 = vpop.f32.mrb[1].mxu0  ;;  %v1029_v27 = vpop.f32.mrb[1].mxu1  ;;  %v985_v30 = vadd.f32 %v984_v22, %v413_v21  ;;  %v1028_v31 = vadd.f32 %v1027_v23, %v421_v12  ;;  %v457_v22 = vrot.slane %v407_v7, %v6062_v20 }
 0x309   :  { %v988_v28 = vpop.f32.mrb[2].mxu0  ;;  %v1031_v29 = vpop.f32.mrb[2].mxu1  ;;  %v987_v36 = vadd.f32 %v986_v26, %v417_v24  ;;  %v1030_v37 = vadd.f32 %v1029_v27, %v425_v25 }
 0x30a   :  { %v989_v32 = vadd.f32 %v988_v28, %v413_v21  ;;  %v1032_v33 = vadd.f32 %v1031_v29, %v421_v12  ;;  %v990_v34 = vpop.f32.mrb[3].mxu0  ;;  %v1033_v35 = vpop.f32.mrb[3].mxu1  ;;  %v445_v21 = vrot.slane %v407_v7, %v6050_v15  ;;  %v453_v12 = vrot.slane %v407_v7, %v6053_v18 }
 0x30b   :  { %v991_v38 = vadd.f32 %v990_v34, %v417_v24  ;;  %v1034_v39 = vadd.f32 %v1033_v35, %v425_v25  ;;  %v449_v25 = vrot.slane %v407_v7, %v6059_v19 }
 0x30c   :  { %v1208_v40 = vpack.c.bf16 %v989_v32, %v985_v30  ;;  %v1439_v41 = vpack.c.bf16 %v1032_v33, %v1028_v31 }
 0x30d   :  { %v1280_v42 = vpack.c.bf16 %v991_v38, %v987_v36  ;;  %v1556_v43 = vpack.c.bf16 %v1034_v39, %v1030_v37 }
 0x327   :  { %v1070_v50 = vpop.f32.mrb[4].mxu0  ;;  %v1113_v52 = vpop.f32.mrb[4].mxu1 }
 0x328   :  { %v1072_v55 = vpop.f32.mrb[5].mxu0  ;;  %v1115_v56 = vpop.f32.mrb[5].mxu1  ;;  %v1071_v59 = vadd.f32 %v1070_v50, %v429_v48  ;;  %v1114_v60 = vadd.f32 %v1113_v52, %v437_v49  ;;  %v233_v50 = vcvt.s32.f32 %v6047_v14 }
 0x329   :  { %v1074_v57 = vpop.f32.mrb[6].mxu0  ;;  %v1117_v58 = vpop.f32.mrb[6].mxu1  ;;  %v1073_v1 = vadd.f32 %v1072_v55, %v433_v53  ;;  %v1116_v2 = vadd.f32 %v1115_v56, %v441_v54 }
 0x32a   :  { %v1075_v61 = vadd.f32 %v1074_v57, %v429_v48  ;;  %v1118_v62 = vadd.f32 %v1117_v58, %v437_v49  ;;  %v1076_v63 = vpop.f32.mrb[7].mxu0  ;;  %v1119_v0 = vpop.f32.mrb[7].mxu1  ;;  %v232_v48 = vadd.s32 8, %v6047_v14  ;;  %v235_v49 = vcvt.s32.f32 %v5999_v13  ;;  %v4345_v14 = vld [vmem:[%s6620_s5 + $0x14] sm:$0xf] }
 0x32b   :  { %v1077_v5 = vadd.f32 %v1076_v63, %v433_v53  ;;  %v1120_v6 = vadd.f32 %v1119_v0, %v441_v54  ;;  %v236_v54 = vmul.f32 0.125, %v233_v50 }
 0x32c   :  { %v1209_v8 = vpack.c.bf16 %v1075_v61, %v1071_v59  ;;  %v1440_v9 = vpack.c.bf16 %v1118_v62, %v1114_v60  ;;  %v234_v52 = vcvt.s32.f32 %v232_v48  ;;  %v240_v53 = vmul.f32 0.125, %v235_v49  ;;  %v4210_v59 = vld [vmem:[%s6652_s30] ss:$0 sm:$0xff] }
 0x32d   :  { %v1281_v10 = vpack.c.bf16 %v1077_v5, %v1073_v1  ;;  %v1557_v11 = vpack.c.bf16 %v1120_v6, %v1116_v2  ;;  %v238_v57 = vfloor.f32 %v236_v54 }
 0x32e   :  { %4650 = vmatpush3.bf16.xpose.msra.mxu0 %v1209_v8  ;;  %4674 = vmatpush3.bf16.xpose.msra.mxu1 %v1440_v9  ;;  %v237_v55 = vmul.f32 0.125, %v234_v52  ;;  %v241_v56 = vfloor.f32 %v240_v53 }
 0x32f   :  { %4655 = vmatprep.subr.bf16.mxu0 %v5721_v16  ;;  %4685 = vmatprep.subr.bf16.mxu1 %v5721_v16 }
 0x330   :  { %v239_v58 = vfloor.f32 %v237_v55  ;;  %vm242_vm3 = vcmp.eq.f32.partialorder %v238_v57, %v241_v56 }
 0x331   :  { %v4208_v60 = vsel %vm242_vm3, 1.0, %v5721_v16 }
 0x332   :  { %vm243_vm4 = vcmp.eq.f32.partialorder %v239_v58, %v241_v56  ;;  %v254_v0 = vmul.f32 %v4210_v59, %v4208_v60 }
 0x333   :  { %v4209_v61 = vsel %vm243_vm4, 1.0, %v5721_v16 }
 0x334   :  { %v255_v8 = vmul.f32 %v4210_v59, %v4209_v61 }
 0x335   :  { %4652 = vmatmul.mubr.bf16.vlgmr.msra.gmra.mrb[12].mxu0 %v1208_v40  ;;  %4676 = vmatmul.mubr.bf16.vlgmr.msra.gmra.mrb[12].mxu1 %v1439_v41 }
 0x336   :  { %4656 = vmatpush3.bf16.xpose.msra.mxu0 %v1281_v10  ;;  %4686 = vmatpush3.bf16.xpose.msra.mxu1 %v1557_v11  ;;  %v256_v11 = vsub.f32 1.0, %v254_v0  ;;  %v257_v7 = vsub.f32 1.0, %v255_v8 }
 0x337   :  { %4657 = vmatprep.mubr.msk.bf16.mxu0 %vm5723_vm2, %v5721_v16  ;;  %4687 = vmatprep.mubr.msk.bf16.mxu1 %vm5723_vm2, %v5721_v16 }
 0x338   :  { %4661 = vmatprep.subr.bf16.mxu0 %v5721_v16  ;;  %4697 = vmatprep.subr.bf16.mxu1 %v5721_v16 }
 0x33d   :  { %4658 = vmatmul.mubr.bf16.vlgmr.msra.gmra.mrb[16].mxu0 %v1280_v42  ;;  %4688 = vmatmul.mubr.bf16.vlgmr.msra.gmra.mrb[16].mxu1 %v1556_v43 }
 0x33e   :  { %4663 = vmatprep.mubr.msk.bf16.mxu0 %vm5723_vm2, %v5721_v16  ;;  %4713 = vmatprep.mubr.msk.bf16.mxu1 %vm5723_vm2, %v5721_v16 }
 0x347   :  { %v1156_v23 = vpop.f32.mrb[8].mxu0  ;;  %v1199_v24 = vpop.f32.mrb[8].mxu1 }
 0x348   :  { %v6099_v26 = vadd.f32 %v1156_v23, %v445_v21  ;;  %v6101_v27 = vadd.f32 %v1199_v24, %v453_v12  ;;  %v1158_v28 = vpop.f32.mrb[9].mxu0  ;;  %v1201_v29 = vpop.f32.mrb[9].mxu1 }
 0x349   :  { %v6103_v30 = vadd.f32 %v1201_v29, %v457_v22  ;;  %v1160_v31 = vpop.f32.mrb[10].mxu0  ;;  %v1203_v32 = vpop.f32.mrb[10].mxu1  ;;  %v1159_v37 = vadd.f32 %v1158_v28, %v449_v25 }
 0x34a   :  { %v6105_v33 = vadd.f32 %v1160_v31, %v445_v21  ;;  %v6107_v34 = vadd.f32 %v1203_v32, %v453_v12  ;;  %v1162_v35 = vpop.f32.mrb[11].mxu0  ;;  %v1205_v36 = vpop.f32.mrb[11].mxu1  ;;  %v6128_v32 = vmul.f32 -10000.0, %v257_v7 }
 0x34b   :  { %v1163_v38 = vadd.f32 %v1162_v35, %v449_v25  ;;  %v6109_v39 = vadd.f32 %v1205_v36, %v457_v22  ;;  %v6126_v22 = vmul.f32 -10000.0, %v256_v11 }
 0x34c   :  { %v1279_v40 = vpack.c.bf16 %v6105_v33, %v6099_v26  ;;  %v1509_v41 = vpack.c.bf16 %v6107_v34, %v6101_v27 }
 0x34d   :  { %v1350_v42 = vpack.c.bf16 %v1163_v38, %v1159_v37  ;;  %v1626_v43 = vpack.c.bf16 %v6109_v39, %v6103_v30  ;;  %v5102_v30 = vld [vmem:[%s6621_s6 + $0x38] sm:$0xff]  }
 0x34f   :  { %4662 = vmatpush3.bf16.msra.mxu0 %v1350_v42 }
 0x350   :  { %4667 = vmatprep.subr.bf16.mxu0 %v5721_v16 }
 0x408   :  { %v1244_v62 = vpop.f32.mrb[12].mxu0  ;;  %v1475_v63 = vpop.f32.mrb[12].mxu1 }
 0x409   :  { %v4653_v1 = vpop.f32.mrb[13].mxu0  ;;  %v4677_v2 = vpop.f32.mrb[13].mxu1  ;;  %v1251_v23 = vmul.f32 0.35355338, %v1244_v62  ;;  %v1482_v48 = vmul.f32 0.35355338, %v1475_v63 }
 0x40a   :  { %v1247_v5 = vpop.f32.mrb[14].mxu0  ;;  %v1478_v6 = vpop.f32.mrb[14].mxu1 }
 0x40b   :  { %v4654_v9 = vpop.f32.mrb[15].mxu0  ;;  %v4678_v10 = vpop.f32.mrb[15].mxu1  ;;  %v1252_v35 = vmul.f32 0.35355338, %v1247_v5  ;;  %v1253_v52 = vadd.f32 %v1251_v23, %v6126_v22  ;;  %v1483_v53 = vmul.f32 0.35355338, %v1478_v6  ;;  %v1484_v58 = vadd.f32 %v1482_v48, %v6126_v22 }
 0x40d   :  { %v1254_v55 = vadd.f32 %v1252_v35, %v6128_v32  ;;  %v1256_v57 = vsel %vm1255_vm5, %v1253_v52, -inf  ;;  %v1485_v61 = vadd.f32 %v1483_v53, %v6128_v32  ;;  %v1486_v62 = vsel %vm1255_vm5, %v1484_v58, -inf }
 0x40f   :  { %v1259_v60 = vsel %vm1255_vm5, %v1254_v55, -inf  ;;  %v1489_v0 = vsel %vm1255_vm5, %v1485_v61, -inf }
 0x410   :  { %v1316_v21 = vpop.f32.mrb[16].mxu0  ;;  %v1592_v12 = vpop.f32.mrb[16].mxu1 }
 0x411   :  { %v1323_v24 = vmul.f32 0.35355338, %v1316_v21  ;;  %v4659_v25 = vpop.f32.mrb[17].mxu0  ;;  %v4689_v28 = vpop.f32.mrb[17].mxu1  ;;  %v1599_v56 = vmul.f32 0.35355338, %v1592_v12 }
 0x412   :  { %v1319_v29 = vpop.f32.mrb[18].mxu0  ;;  %v1595_v31 = vpop.f32.mrb[18].mxu1 }
 0x413   :  { %v1324_v36 = vmul.f32 0.35355338, %v1319_v29  ;;  %v4660_v37 = vpop.f32.mrb[19].mxu0  ;;  %v4690_v38 = vpop.f32.mrb[19].mxu1  ;;  %v1325_v42 = vadd.f32 %v1323_v24, %v6126_v22  ;;  %v1600_v59 = vmul.f32 0.35355338, %v1595_v31  ;;  %v1601_v63 = vadd.f32 %v1599_v56, %v6126_v22 }
 0x415   :  { %v1327_v49 = vsel %vm1255_vm5, %v1325_v42, -inf  ;;  %v1326_v50 = vadd.f32 %v1324_v36, %v6128_v32  ;;  %v1602_v1 = vadd.f32 %v1600_v59, %v6128_v32  ;;  %v1603_v2 = vsel %vm1255_vm5, %v1601_v63, -inf }
 0x416   :  { %1328 = vmax.xlane.f32.xlu0 %v1327_v49 }
 0x417   :  { %v1330_v54 = vsel %vm1255_vm5, %v1326_v50, -inf  ;;  %v1606_v5 = vsel %vm1255_vm5, %v1602_v1, -inf }
 0x418   :  { %1331 = vmax.xlane.f32.xlu1 %v1330_v54 }
 0x41a   :  { %1257 = vmax.xlane.f32.xlu0 %v1256_v57 }
 0x41c   :  { %1260 = vmax.xlane.f32.xlu1 %v1259_v60 }
 0x41e   :  { %1487 = vmax.xlane.f32.xlu0 %v1486_v62 }
 0x420   :  { %1490 = vmax.xlane.f32.xlu1 %v1489_v0 }
 0x422   :  { %1604 = vmax.xlane.f32.xlu0 %v1603_v2 }
 0x424   :  { %1607 = vmax.xlane.f32.xlu1 %v1606_v5 }
 0x4a3   :  { %v1329_v6 = vpop.xlane.xlu0 %1328 }
 0x4a4   :  { %v1333_v8 = vsub.f32 %v1325_v42, %v1329_v6 }
 0x4a5   :  { %v1332_v9 = vpop.xlane.xlu1 %1331 }
 0x4a6   :  { %v1335_v10 = vmul.f32 1.442695, %v1333_v8  ;;  %v1334_v11 = vsub.f32 %v1326_v50, %v1332_v9  ;;  %v5095_v9 = vld [vmem:[%s6621_s6] sm:$0xff]  }
 0x4a7   :  { %v1258_v7 = vpop.xlane.xlu0 %1257  ;;  %4698 = vmatpush3.bf16.msra.mxu1 %v5095_v9 }
 0x4a8   :  { %5307 = vpow2.f32 %v1335_v10  ;;  %v1337_v21 = vmul.f32 1.442695, %v1334_v11  ;;  %v1262_v12 = vsub.f32 %v1253_v52, %v1258_v7  ;;  %v5096_v10 = vld [vmem:[%s6621_s6 + $0x8] sm:$0xff]   ;;  %4699 = vmatprep.subr.bf16.mxu1 %v5721_v16  ;;  %v5097_v11 = vld [vmem:[%s6621_s6 + $0x10] sm:$0xff]   ;;  %v5098_v7 = vld [vmem:[%s6621_s6 + $0x18] sm:$0xff]  }
 0x4a9   :  { %v1261_v23 = vpop.xlane.xlu1 %1260 }
 0x4aa   :  { %5309 = vpow2.f32 %v1337_v21  ;;  %v1264_v24 = vmul.f32 1.442695, %v1262_v12  ;;  %v1263_v25 = vsub.f32 %v1254_v55, %v1261_v23  ;;  %v5099_v21 = vld [vmem:[%s6621_s6 + $0x20] sm:$0xff]   ;;  %v5100_v12 = vld [vmem:[%s6621_s6 + $0x28] sm:$0xff]   ;;  %v5101_v23 = vld [vmem:[%s6621_s6 + $0x30] sm:$0xff]  }
 0x4ab   :  { %v1488_v28 = vpop.xlane.xlu0 %1487  ;;  %4700 = vmatpush3.bf16.msra.mxu1 %v5096_v10 }
 0x4ac   :  { %5311 = vpow2.f32 %v1264_v24  ;;  %v1266_v29 = vmul.f32 1.442695, %v1263_v25  ;;  %v1492_v31 = vsub.f32 %v1484_v58, %v1488_v28  ;;  %4701 = vmatprep.subr.bf16.mxu1 %v5721_v16 }
 0x4ad   :  { %v1491_v35 = vpop.xlane.xlu1 %1490 }
 0x4ae   :  { %5313 = vpow2.f32 %v1266_v29  ;;  %v1494_v36 = vmul.f32 1.442695, %v1492_v31  ;;  %v1493_v37 = vsub.f32 %v1485_v61, %v1491_v35 }
 0x4af   :  { %v1605_v38 = vpop.xlane.xlu0 %1604  ;;  %4702 = vmatpush3.bf16.msra.mxu1 %v5097_v11 }
 0x4b0   :  { %5315 = vpow2.f32 %v1494_v36  ;;  %v1496_v42 = vmul.f32 1.442695, %v1493_v37  ;;  %v1609_v48 = vsub.f32 %v1601_v63, %v1605_v38  ;;  %4703 = vmatprep.subr.bf16.mxu1 %v5721_v16 }
 0x4b1   :  { %v1608_v49 = vpop.xlane.xlu1 %1607 }
 0x4b2   :  { %v5308_v50 = vpop.eup %5307  ;;  %5317 = vpow2.f32 %v1496_v42  ;;  %v1611_v52 = vmul.f32 1.442695, %v1609_v48  ;;  %v1610_v53 = vsub.f32 %v1602_v1, %v1608_v49 }
 0x4b3   :  { %v1339_v54 = vsel %vm1255_vm5, %v5308_v50, 0.0  ;;  %4704 = vmatpush3.bf16.msra.mxu1 %v5098_v7  ;;  %v5103_v7 = vld [vmem:[%s6625_s10] sm:$0xff]  }
 0x4b4   :  { %v5310_v55 = vpop.eup %5309  ;;  %5319 = vpow2.f32 %v1611_v52  ;;  %v1613_v56 = vmul.f32 1.442695, %v1610_v53  ;;  %1340 = vadd.xlane.f32.xlu0 %v1339_v54  ;;  %4705 = vmatprep.subr.bf16.mxu1 %v5721_v16 }
 0x4b5   :  { %v1342_v57 = vsel %vm1255_vm5, %v5310_v55, 0.0 }
 0x4b6   :  { %v6148_v58 = vpop.eup %5311  ;;  %5321 = vpow2.f32 %v1613_v56  ;;  %1343 = vadd.xlane.f32.xlu1 %v1342_v57 }
 0x4b7   :  { %v1268_v59 = vsel %vm1255_vm5, %v6148_v58, 0.0  ;;  %4706 = vmatpush3.bf16.msra.mxu1 %v5099_v21  ;;  %v5104_v21 = vld [vmem:[%s6625_s10 + $0x8] sm:$0xff]  }
 0x4b8   :  { %v5314_v60 = vpop.eup %5313  ;;  %1269 = vadd.xlane.f32.xlu0 %v1268_v59  ;;  %4707 = vmatprep.subr.bf16.mxu1 %v5721_v16 }
 0x4b9   :  { %v1271_v61 = vsel %vm1255_vm5, %v5314_v60, 0.0 }
 0x4ba   :  { %v6153_v62 = vpop.eup %5315  ;;  %1272 = vadd.xlane.f32.xlu1 %v1271_v61 }
 0x4bb   :  { %v1498_v63 = vsel %vm1255_vm5, %v6153_v62, 0.0  ;;  %4708 = vmatpush3.bf16.msra.mxu1 %v5100_v12 }
 0x4bc   :  { %v6157_v0 = vpop.eup %5317  ;;  %1499 = vadd.xlane.f32.xlu0 %v1498_v63  ;;  %4709 = vmatprep.subr.bf16.mxu1 %v5721_v16 }
 0x4bd   :  { %v1501_v1 = vsel %vm1255_vm5, %v6157_v0, 0.0 }
 0x4be   :  { %v6161_v2 = vpop.eup %5319  ;;  %1502 = vadd.xlane.f32.xlu1 %v1501_v1 }
 0x4bf   :  { %v1615_v5 = vsel %vm1255_vm5, %v6161_v2, 0.0  ;;  %4710 = vmatpush3.bf16.msra.mxu1 %v5101_v23 }
 0x4c0   :  { %v6165_v6 = vpop.eup %5321  ;;  %1616 = vadd.xlane.f32.xlu0 %v1615_v5  ;;  %4711 = vmatprep.subr.bf16.mxu1 %v5721_v16 }
 0x4c1   :  { %v1618_v8 = vsel %vm1255_vm5, %v6165_v6, 0.0 }
 0x4c2   :  { %1619 = vadd.xlane.f32.xlu1 %v1618_v8 }
 0x4c3   :  { %4712 = vmatpush3.bf16.msra.mxu1 %v5102_v30 }
 0x4c4   :  { %4737 = vmatprep.subr.bf16.mxu1 %v5721_v16 }
 0x541   :  { %v1341_v24 = vpop.xlane.xlu0 %1340 }
 0x542   :  { %5323 = vrcp.f32 %v1341_v24 }
 0x543   :  { %v1344_v25 = vpop.xlane.xlu1 %1343 }
 0x544   :  { %5325 = vrcp.f32 %v1344_v25 }
 0x545   :  { %v1270_v29 = vpop.xlane.xlu0 %1269 }
 0x547   :  { %v1273_v28 = vpop.xlane.xlu1 %1272 }
 0x548   :  { %5327 = vrcp.f32 %v1273_v28 }
 0x549   :  { %5329 = vrcp.f32 %v1270_v29  ;;  %v1500_v49 = vpop.xlane.xlu0 %1499 }
 0x54b   :  { %v1503_v42 = vpop.xlane.xlu1 %1502 }
 0x54c   :  { %v5324_v31 = vpop.eup %5323  ;;  %5331 = vrcp.f32 %v1503_v42  ;;  %v5108_v42 = vld [vmem:[%s6625_s10 + $0x28] sm:$0xff]  }
 0x54d   :  { %v1347_v36 = vmul.f32 %v5324_v31, %v5308_v50  ;;  %5333 = vrcp.f32 %v1500_v49  ;;  %v5110_v49 = vld [vmem:[%s6625_s10 + $0x38] sm:$0xff]  }
 0x54e   :  { %v5326_v35 = vpop.eup %5325 }
 0x54f   :  { %v1348_v37 = vmul.f32 %v5326_v35, %v5310_v55  ;;  %v1620_v26 = vpop.xlane.xlu1 %1619 }
 0x550   :  { %5335 = vrcp.f32 %v1620_v26 }
 0x551   :  { %v1349_v38 = vpack.c.bf16 %v1348_v37, %v1347_v36  ;;  %v5105_v36 = vld [vmem:[%s6625_s10 + $0x10] sm:$0xff]   ;;  %v5106_v37 = vld [vmem:[%s6625_s10 + $0x18] sm:$0xff]  }
 0x552   :  { %v5328_v48 = vpop.eup %5327 }
 0x553   :  { %4664 = vmatmul.mubr.msk.bf16.vlgmr.msra.gmra.mrb[20].mxu0 %vm1255_vm5, %v1349_v38  ;;  %v5330_v52 = vpop.eup %5329  ;;  %v1277_v53 = vmul.f32 %v5328_v48, %v5314_v60  ;;  %v5107_v38 = vld [vmem:[%s6625_s10 + $0x20] sm:$0xff]   ;;  %v5109_v48 = vld [vmem:[%s6625_s10 + $0x30] sm:$0xff]  }
 0x554   :  { %4668 = vmatpush3.bf16.msra.mxu0 %v1279_v40  ;;  %4669 = vmatprep.mubr.msk.bf16.mxu0 %vm5723_vm2, %v5721_v16  ;;  %v1276_v50 = vmul.f32 %v5330_v52, %v6148_v58  ;;  %v1617_v40 = vpop.xlane.xlu0 %1616 }
 0x555   :  { %4679 = vmatprep.subr.bf16.mxu0 %v5721_v16  ;;  %5337 = vrcp.f32 %v1617_v40 }
 0x556   :  { %v1278_v54 = vpack.c.bf16 %v1277_v53, %v1276_v50  ;;  %v5332_v33 = vpop.eup %5331 }
 0x557   :  { %v5334_v55 = vpop.eup %5333  ;;  %v1507_v56 = vmul.f32 %v5332_v33, %v6157_v0  ;;  %v4313_v0 = vld [vmem:[%s6622_s7] ss:$0 sm:$0xff] }
 0x558   :  { %v1506_v57 = vmul.f32 %v5334_v55, %v6153_v62  ;;  %v4322_v55 = vld [vmem:[#allocation7] ss:$0 sm:$0xff] }
 0x55a   :  { %v1508_v58 = vpack.c.bf16 %v1507_v56, %v1506_v57  ;;  %v5336_v27 = vpop.eup %5335 }
 0x55f   :  { %4670 = vmatmul.mubr.msk.bf16.vlgmr.msra.gmra.mrb[20].mxu0 %vm1255_vm5, %v1278_v54  ;;  %v5338_v34 = vpop.eup %5337 }
 0x560   :  { %4680 = vmatpush3.bf16.msra.mxu0 %v1509_v41  ;;  %4681 = vmatprep.mubr.msk.bf16.mxu0 %vm5723_vm2, %v5721_v16  ;;  %v1624_v41 = vmul.f32 %v5336_v27, %v6165_v6  ;;  %v1623_v59 = vmul.f32 %v5338_v34, %v6161_v2  ;;  %v4323_v34 = vld [vmem:[#allocation8] ss:$0 sm:$0xff] }
 0x561   :  { %4691 = vmatprep.subr.bf16.mxu0 %v5721_v16 }
 0x562   :  { %v1625_v60 = vpack.c.bf16 %v1624_v41, %v1623_v59 }
 0x56b   :  { %4682 = vmatmul.mubr.msk.bf16.vlgmr.msra.gmra.mrb[20].mxu0 %vm1255_vm5, %v1508_v58 }
 0x56c   :  { %4692 = vmatpush3.bf16.msra.mxu0 %v1626_v43  ;;  %4693 = vmatprep.mubr.msk.bf16.mxu0 %vm5723_vm2, %v5721_v16 }
 0x56d   :  { %4717 = vmatprep.subr.bf16.mxu0 %v5721_v16 }
 0x577   :  { %4694 = vmatmul.mubr.msk.bf16.vlgmr.msra.gmra.mrb[20].mxu0 %vm1255_vm5, %v1625_v60 }
 0x578   :  { %4733 = vmatprep.mubr.msk.bf16.mxu0 %vm5723_vm2, %v5721_v16  ;;  %4718 = vmatpush3.bf16.msra.mxu0 %v5103_v7 }
 0x579   :  { %4719 = vmatprep.subr.bf16.mxu0 %v5721_v16 }
 0x57c   :  { %4720 = vmatpush3.bf16.msra.mxu0 %v5104_v21 }
 0x57d   :  { %4721 = vmatprep.subr.bf16.mxu0 %v5721_v16 }
 0x580   :  { %4722 = vmatpush3.bf16.msra.mxu0 %v5105_v36 }
 0x581   :  { %4723 = vmatprep.subr.bf16.mxu0 %v5721_v16 }
 0x584   :  { %4724 = vmatpush3.bf16.msra.mxu0 %v5106_v37 }
 0x585   :  { %4725 = vmatprep.subr.bf16.mxu0 %v5721_v16 }
 0x588   :  { %4726 = vmatpush3.bf16.msra.mxu0 %v5107_v38 }
 0x589   :  { %4727 = vmatprep.subr.bf16.mxu0 %v5721_v16 }
 0x58c   :  { %4728 = vmatpush3.bf16.msra.mxu0 %v5108_v42 }
 0x58d   :  { %4729 = vmatprep.subr.bf16.mxu0 %v5721_v16 }
 0x590   :  { %4730 = vmatpush3.bf16.msra.mxu0 %v5109_v48 }
 0x591   :  { %4731 = vmatprep.subr.bf16.mxu0 %v5721_v16 }
 0x594   :  { %4732 = vmatpush3.bf16.msra.mxu0 %v5110_v49 }
 0x64a   :  { %v1664_v39 = vpop.f32.mrb[20].mxu0 }
 0x64b   :  { %v4695_v43 = vpop.f32.mrb[21].mxu0 }
 0x64c   :  { %v1667_v61 = vpop.f32.mrb[22].mxu0  ;;  %v5112_v43 = vld [vmem:[%s6653_s0 + $0x8] sm:$0xff]  }
 0x64d   :  { %v1689_v62 = vpack.c.bf16 %v1667_v61, %v1664_v39  ;;  %v4696_v63 = vpop.f32.mrb[23].mxu0  ;;  %v5111_v39 = vld [vmem:[%s6653_s0] sm:$0xff]   ;;  %v5113_v61 = vld [vmem:[%s6653_s0 + $0x10] sm:$0xff]  }
 0x64e   :  { %v5115_v63 = vld [vmem:[%s6653_s0 + $0x20] sm:$0xff]  }
 0x64f   :  { %4714 = vmatmul.mubr.bf16.vlgmr.msra.gmra.mrb[20].mxu1 %v1689_v62  ;;  %v5114_v62 = vld [vmem:[%s6653_s0 + $0x18] sm:$0xff]  }
 0x650   :  { %4753 = vmatprep.mubr.msk.bf16.mxu1 %vm5723_vm2, %v5721_v16  ;;  %4738 = vmatpush3.bf16.msra.mxu1 %v5111_v39  ;;  %v5127_v39 = vld [vmem:[#allocation5 + $0x364] ss:$48 sps:$4 sm:$0xff]  }
 0x651   :  { %4739 = vmatprep.subr.bf16.mxu1 %v5721_v16 }
 0x654   :  { %4740 = vmatpush3.bf16.msra.mxu1 %v5112_v43  ;;  %v5130_v43 = vld [vmem:[#allocation5 + $0x36c] ss:$48 sps:$4 sm:$0xff]  }
 0x655   :  { %4741 = vmatprep.subr.bf16.mxu1 %v5721_v16 }
 0x658   :  { %4742 = vmatpush3.bf16.msra.mxu1 %v5113_v61  ;;  %v5125_v61 = vld [vmem:[#allocation5 + $0x360] ss:$48 sps:$4 sm:$0xff]  }
 0x659   :  { %4743 = vmatprep.subr.bf16.mxu1 %v5721_v16 }
 0x65c   :  { %4744 = vmatpush3.bf16.msra.mxu1 %v5114_v62  ;;  %v5128_v62 = vld [vmem:[#allocation5 + $0x368] ss:$48 sps:$4 sm:$0xff]  }
 0x65d   :  { %4745 = vmatprep.subr.bf16.mxu1 %v5721_v16 }
 0x660   :  { %4746 = vmatpush3.bf16.msra.mxu1 %v5115_v63 }
 0x661   :  { %4747 = vmatprep.subr.bf16.mxu1 %v5721_v16 }
 0x722   :  { %v1779_v1 = vpop.f32.mrb[20].mxu1 }
 0x723   :  { %v1780_v2 = vadd.f32 %v4313_v0, %v1779_v1  ;;  %v4715_v5 = vpop.f32.mrb[21].mxu1  ;;  %v5117_v1 = vld [vmem:[%s6653_s0 + $0x30] sm:$0xff]  }
 0x724   :  { %v1782_v6 = vpop.f32.mrb[22].mxu1  ;;  %v4324_v5 = vld [vmem:[#allocation10] ss:$0 sm:$0xff] }
 0x725   :  { %v1783_v8 = vadd.f32 %v4313_v0, %v1782_v6  ;;  %v4716_v9 = vpop.f32.mrb[23].mxu1  ;;  %v1788_v10 = vadd.f32 %v1780_v2, %v6022_v3  ;;  %v5116_v0 = vld [vmem:[%s6653_s0 + $0x28] sm:$0xff]   ;;  %v5118_v2 = vld [vmem:[%s6653_s0 + $0x38] sm:$0xff]  }
 0x726   :  { %4748 = vmatpush3.bf16.msra.mxu1 %v5116_v0 }
 0x727   :  { %1790 = vadd.xlane.f32.xlu0 %v1788_v10  ;;  %v1789_v11 = vadd.f32 %v1783_v8, %v6024_v4  ;;  %4749 = vmatprep.subr.bf16.mxu1 %v5721_v16 }
 0x729   :  { %1792 = vadd.xlane.f32.xlu1 %v1789_v11 }
 0x72a   :  { %4750 = vmatpush3.bf16.msra.mxu1 %v5117_v1 }
 0x72b   :  { %4751 = vmatprep.subr.bf16.mxu1 %v5721_v16 }
 0x72e   :  { %4752 = vmatpush3.bf16.msra.mxu1 %v5118_v2 }
 0x7b4   :  { %v1791_v12 = vpop.xlane.xlu0 %1790 }
 0x7b5   :  { %v1794_v3 = vmul.f32 0.03125, %v1791_v12 }
 0x7b6   :  { %v1793_v23 = vpop.xlane.xlu1 %1792 }
 0x7b7   :  { %v1796_v24 = vsub.f32 %v1788_v10, %v1794_v3  ;;  %v1795_v4 = vmul.f32 0.03125, %v1793_v23 }
 0x7b9   :  { %v1797_v25 = vsub.f32 %v1789_v11, %v1795_v4  ;;  %v1798_v28 = vmul.f32 %v6003_v17, %v1796_v24 }
 0x7bb   :  { %v1800_v29 = vmul.f32 %v1798_v28, %v1798_v28  ;;  %v1799_v31 = vmul.f32 %v6003_v17, %v1797_v25 }
 0x7bd   :  { %1802 = vadd.xlane.f32.xlu0 %v1800_v29  ;;  %v1801_v35 = vmul.f32 %v1799_v31, %v1799_v31 }
 0x7bf   :  { %1804 = vadd.xlane.f32.xlu1 %v1801_v35 }
 0x84a   :  { %v1803_v52 = vpop.xlane.xlu0 %1802 }
 0x84b   :  { %v1806_v53 = vmul.f32 0.03125, %v1803_v52 }
 0x84c   :  { %v1805_v50 = vpop.xlane.xlu1 %1804 }
 0x84d   :  { %v1808_v54 = vadd.f32 1e-12, %v1806_v53  ;;  %v1807_v26 = vmul.f32 0.03125, %v1805_v50  ;;  %v4333_v50 = vld [vmem:[#allocation11] ss:$0 sm:$0xff] }
 0x84f   :  { %5339 = vrsqrt.f32 %v1808_v54  ;;  %v1809_v33 = vadd.f32 1e-12, %v1807_v26 }
 0x851   :  { %5341 = vrsqrt.f32 %v1809_v33 }
 0x859   :  { %v5340_v40 = vpop.eup %5339 }
 0x85a   :  { %v1812_v56 = vmul.f32 %v5340_v40, %v1798_v28 }
 0x85b   :  { %v5342_v57 = vpop.eup %5341 }
 0x85c   :  { %v1813_v58 = vmul.f32 %v5342_v57, %v1799_v31  ;;  %v1820_v27 = vmul.f32 %v4322_v55, %v1812_v56 }
 0x85e   :  { %v1821_v41 = vmul.f32 %v4322_v55, %v1813_v58  ;;  %v6270_v59 = vadd.f32 %v4323_v34, %v1820_v27  ;;  %v5119_v27 = vld [vmem:[#allocation5 + $0x300] ss:$48 sps:$4 sm:$0xff]  }
 0x860   :  { %v6272_v60 = vadd.f32 %v4323_v34, %v1821_v41  ;;  %v5121_v34 = vld [vmem:[#allocation5 + $0x304] ss:$48 sps:$4 sm:$0xff]   ;;  %v5122_v41 = vld [vmem:[#allocation5 + $0x308] ss:$48 sps:$4 sm:$0xff]  }
 0x861   :  { %2761 = vmatprep.subr.bf16.mxu0 %v5121_v34 }
 0x862   :  { %v1846_v30 = vpack.c.bf16 %v6272_v60, %v6270_v59 }
 0x864   :  { %4734 = vmatmul.mubr.bf16.vlgmr.msra.gmra.mrb[24].mxu0 %v1846_v30  ;;  %v5124_v30 = vld [vmem:[#allocation5 + $0x30c] ss:$48 sps:$4 sm:$0xff]  }
 0x865   :  { %2793 = vmatprep.mubr.bf16.mxu0 %v5722_v51  ;;  %2804 = vmatprep.subr.bf16.mxu1 %v5124_v30 }
 0x866   :  { %2762 = vmatpush1.bf16.msra.mxu0 %v5119_v27 }
 0x867   :  { %2763 = vmatprep.subr.bf16.mxu0 %v5127_v39 }
 0x86a   :  { %2764 = vmatpush1.bf16.msra.mxu0 %v5125_v61 }
 0x937   :  { %v1936_v6 = vpop.f32.mrb[24].mxu0 }
 0x938   :  { %v1937_v8 = vadd.f32 %v4324_v5, %v1936_v6  ;;  %v4735_v9 = vpop.f32.mrb[25].mxu0 }
 0x939   :  { %v1939_v10 = vpop.f32.mrb[26].mxu0 }
 0x93a   :  { %v1945_v11 = vmul.f32 0.044715, %v1937_v8  ;;  %v1940_v7 = vadd.f32 %v4324_v5, %v1939_v10  ;;  %v4736_v21 = vpop.f32.mrb[27].mxu0  ;;  %v1943_v38 = vmul.f32 0.5, %v1937_v8  ;;  %v5133_v10 = vld [vmem:[#allocation5 + $0x3c4] ss:$48 sps:$4 sm:$0xff]  }
 0x93b   :  { %v5134_v21 = vld [vmem:[#allocation5 + $0x3c8] ss:$48 sps:$4 sm:$0xff]   ;;  %2765 = vmatprep.subr.bf16.mxu0 %v5133_v10  ;;  %v5181_v10 = vld [vmem:[#allocation5 + $0x3d4] ss:$48 sps:$4 sm:$0xff]  }
 0x93c   :  { %v1947_v12 = vmul.f32 %v1945_v11, %v1937_v8  ;;  %v1946_v3 = vmul.f32 0.044715, %v1940_v7  ;;  %v1944_v42 = vmul.f32 0.5, %v1940_v7  ;;  %v5136_v11 = vld [vmem:[#allocation5 + $0x3cc] ss:$48 sps:$4 sm:$0xff]  }
 0x93e   :  { %v1949_v23 = vmul.f32 %v1947_v12, %v1937_v8  ;;  %v1948_v24 = vmul.f32 %v1946_v3, %v1940_v7  ;;  %v5139_v12 = vld [vmem:[#allocation5 + $0x424] ss:$48 sps:$4 sm:$0xff]   ;;  %v5142_v3 = vld [vmem:[#allocation5 + $0x42c] ss:$48 sps:$4 sm:$0xff]  }
 0x940   :  { %v1951_v4 = vadd.f32 %v1949_v23, %v1937_v8  ;;  %v1950_v25 = vmul.f32 %v1948_v24, %v1940_v7  ;;  %v5137_v23 = vld [vmem:[#allocation5 + $0x420] ss:$48 sps:$4 sm:$0xff]   ;;  %v5140_v24 = vld [vmem:[#allocation5 + $0x428] ss:$48 sps:$4 sm:$0xff]  }
 0x942   :  { %v1953_v28 = vmul.f32 0.7978846, %v1951_v4  ;;  %v1952_v29 = vadd.f32 %v1950_v25, %v1940_v7  ;;  %v5131_v7 = vld [vmem:[#allocation5 + $0x3c0] ss:$48 sps:$4 sm:$0xff]   ;;  %v5145_v4 = vld [vmem:[#allocation5 + $0x484] ss:$48 sps:$4 sm:$0xff]  }
 0x943   :  { %2766 = vmatpush1.bf16.msra.mxu0 %v5131_v7  ;;  %v5148_v25 = vld [vmem:[#allocation5 + $0x48c] ss:$48 sps:$4 sm:$0xff]   ;;  %v5179_v7 = vld [vmem:[#allocation5 + $0x3d0] ss:$48 sps:$4 sm:$0xff]  }
 0x944   :  { %5343 = vtanh.f32 %v1953_v28  ;;  %v1954_v31 = vmul.f32 0.7978846, %v1952_v29  ;;  %2767 = vmatprep.subr.bf16.mxu0 %v5139_v12  ;;  %v5143_v28 = vld [vmem:[#allocation5 + $0x480] ss:$48 sps:$4 sm:$0xff]   ;;  %v5146_v29 = vld [vmem:[#allocation5 + $0x488] ss:$48 sps:$4 sm:$0xff]  }
 0x945   :  { %v5187_v12 = vld [vmem:[#allocation5 + $0x434] ss:$48 sps:$4 sm:$0xff]  }
 0x946   :  { %5345 = vtanh.f32 %v1954_v31  ;;  %v5151_v31 = vld [vmem:[#allocation5 + $0x4e4] ss:$48 sps:$4 sm:$0xff]  }
 0x947   :  { %2768 = vmatpush1.bf16.msra.mxu0 %v5137_v23  ;;  %v5185_v23 = vld [vmem:[#allocation5 + $0x430] ss:$48 sps:$4 sm:$0xff]  }
 0x948   :  { %2769 = vmatprep.subr.bf16.mxu0 %v5145_v4  ;;  %v5193_v4 = vld [vmem:[#allocation5 + $0x494] ss:$48 sps:$4 sm:$0xff]  }
 0x94b   :  { %2770 = vmatpush1.bf16.msra.mxu0 %v5143_v28  ;;  %v5191_v28 = vld [vmem:[#allocation5 + $0x490] ss:$48 sps:$4 sm:$0xff]  }
 0x94c   :  { %2771 = vmatprep.subr.bf16.mxu0 %v5151_v31  ;;  %v5199_v31 = vld [vmem:[#allocation5 + $0x4f4] ss:$48 sps:$4 sm:$0xff]  }
 0x94e   :  { %v5344_v35 = vpop.eup %5343 }
 0x94f   :  { %v1957_v36 = vadd.f32 1.0, %v5344_v35  ;;  %v5154_v35 = vld [vmem:[#allocation5 + $0x4ec] ss:$48 sps:$4 sm:$0xff]  }
 0x950   :  { %v5346_v37 = vpop.eup %5345 }
 0x951   :  { %v1958_v48 = vadd.f32 1.0, %v5346_v37  ;;  %v1959_v49 = vmul.f32 %v1957_v36, %v1943_v38  ;;  %v5149_v36 = vld [vmem:[#allocation5 + $0x4e0] ss:$48 sps:$4 sm:$0xff]   ;;  %v5152_v37 = vld [vmem:[#allocation5 + $0x4e8] ss:$48 sps:$4 sm:$0xff]  }
 0x952   :  { %2772 = vmatpush1.bf16.msra.mxu0 %v5149_v36  ;;  %v5157_v38 = vld [vmem:[#allocation5 + $0x544] ss:$48 sps:$4 sm:$0xff]   ;;  %v5197_v36 = vld [vmem:[#allocation5 + $0x4f0] ss:$48 sps:$4 sm:$0xff]  }
 0x953   :  { %v1960_v52 = vmul.f32 %v1958_v48, %v1944_v42  ;;  %v5160_v42 = vld [vmem:[#allocation5 + $0x54c] ss:$48 sps:$4 sm:$0xff]   ;;  %v5155_v48 = vld [vmem:[#allocation5 + $0x540] ss:$48 sps:$4 sm:$0xff]   ;;  %2773 = vmatprep.subr.bf16.mxu0 %v5157_v38  ;;  %v5205_v38 = vld [vmem:[#allocation5 + $0x554] ss:$48 sps:$4 sm:$0xff]  }
 0x955   :  { %v1977_v53 = vpack.c.bf16 %v1960_v52, %v1959_v49  ;;  %v5158_v49 = vld [vmem:[#allocation5 + $0x548] ss:$48 sps:$4 sm:$0xff]   ;;  %v5163_v52 = vld [vmem:[#allocation5 + $0x5a4] ss:$48 sps:$4 sm:$0xff]  }
 0x956   :  { %2774 = vmatpush1.bf16.msra.mxu0 %v5155_v48  ;;  %v5203_v48 = vld [vmem:[#allocation5 + $0x550] ss:$48 sps:$4 sm:$0xff]  }
 0x957   :  { %4754 = vmatmul.mubr.bf16.vlgmr.msra.gmra.mrb[24].mxu1 %v1977_v53  ;;  %v5166_v53 = vld [vmem:[#allocation5 + $0x5ac] ss:$48 sps:$4 sm:$0xff]   ;;  %2775 = vmatprep.subr.bf16.mxu0 %v5163_v52  ;;  %v5211_v52 = vld [vmem:[#allocation5 + $0x5b4] ss:$48 sps:$4 sm:$0xff]  }
 0x958   :  { %2836 = vmatprep.mubr.bf16.mxu1 %v5722_v51  ;;  %2805 = vmatpush1.bf16.msra.mxu1 %v5122_v41  ;;  %v4342_v41 = vld [vmem:[#allocation13] ss:$0 sm:$0xff] }
 0x959   :  { %2806 = vmatprep.subr.bf16.mxu1 %v5130_v43 }
 0x95c   :  { %2807 = vmatpush1.bf16.msra.mxu1 %v5128_v62  ;;  %v4343_v62 = vld [vmem:[#allocation14] ss:$0 sm:$0xff] }
 0x95d   :  { %2808 = vmatprep.subr.bf16.mxu1 %v5136_v11  ;;  %v5184_v11 = vld [vmem:[#allocation5 + $0x3dc] ss:$48 sps:$4 sm:$0xff]  }
 0x960   :  { %2809 = vmatpush1.bf16.msra.mxu1 %v5134_v21  ;;  %v5182_v21 = vld [vmem:[#allocation5 + $0x3d8] ss:$48 sps:$4 sm:$0xff]  }
 0x961   :  { %2810 = vmatprep.subr.bf16.mxu1 %v5142_v3  ;;  %v5190_v3 = vld [vmem:[#allocation5 + $0x43c] ss:$48 sps:$4 sm:$0xff]  }
 0x964   :  { %2811 = vmatpush1.bf16.msra.mxu1 %v5140_v24  ;;  %v5188_v24 = vld [vmem:[#allocation5 + $0x438] ss:$48 sps:$4 sm:$0xff]  }
 0x965   :  { %2812 = vmatprep.subr.bf16.mxu1 %v5148_v25  ;;  %v5196_v25 = vld [vmem:[#allocation5 + $0x49c] ss:$48 sps:$4 sm:$0xff]  }
 0x968   :  { %2813 = vmatpush1.bf16.msra.mxu1 %v5146_v29  ;;  %v5194_v29 = vld [vmem:[#allocation5 + $0x498] ss:$48 sps:$4 sm:$0xff]  }
 0x969   :  { %2814 = vmatprep.subr.bf16.mxu1 %v5154_v35  ;;  %v5202_v35 = vld [vmem:[#allocation5 + $0x4fc] ss:$48 sps:$4 sm:$0xff]  }
 0x96c   :  { %2815 = vmatpush1.bf16.msra.mxu1 %v5152_v37  ;;  %v5200_v37 = vld [vmem:[#allocation5 + $0x4f8] ss:$48 sps:$4 sm:$0xff]  }
 0x96d   :  { %2816 = vmatprep.subr.bf16.mxu1 %v5160_v42  ;;  %v5208_v42 = vld [vmem:[#allocation5 + $0x55c] ss:$48 sps:$4 sm:$0xff]  }
 0x970   :  { %2817 = vmatpush1.bf16.msra.mxu1 %v5158_v49  ;;  %v5206_v49 = vld [vmem:[#allocation5 + $0x558] ss:$48 sps:$4 sm:$0xff]  }
 0x971   :  { %2818 = vmatprep.subr.bf16.mxu1 %v5166_v53  ;;  %v5214_v53 = vld [vmem:[#allocation5 + $0x5bc] ss:$48 sps:$4 sm:$0xff]  }
 0xa2a   :  { %v2067_v54 = vpop.f32.mrb[24].mxu1 }
 0xa2b   :  { %v2068_v26 = vadd.f32 %v4333_v50, %v2067_v54  ;;  %v4755_v33 = vpop.f32.mrb[25].mxu1  ;;  %v5164_v54 = vld [vmem:[#allocation5 + $0x5a8] ss:$48 sps:$4 sm:$0xff]  }
 0xa2c   :  { %v2070_v40 = vpop.f32.mrb[26].mxu1  ;;  %2819 = vmatpush1.bf16.msra.mxu1 %v5164_v54  ;;  %v5172_v33 = vld [vmem:[#allocation5 + $0x31c] ss:$48 sps:$4 sm:$0xff]   ;;  %v5212_v54 = vld [vmem:[#allocation5 + $0x5b8] ss:$48 sps:$4 sm:$0xff]  }
 0xa2d   :  { %v2071_v55 = vadd.f32 %v4333_v50, %v2070_v40  ;;  %v4756_v56 = vpop.f32.mrb[27].mxu1  ;;  %v2076_v57 = vadd.f32 %v2068_v26, %v6270_v59  ;;  %v5161_v50 = vld [vmem:[#allocation5 + $0x5a0] ss:$48 sps:$4 sm:$0xff]   ;;  %v5169_v26 = vld [vmem:[#allocation5 + $0x314] ss:$48 sps:$4 sm:$0xff]   ;;  %2890 = vmatprep.subr.bf16.mxu1 %v5172_v33 }
 0xa2e   :  { %2776 = vmatpush1.bf16.msra.mxu0 %v5161_v50  ;;  %v5209_v50 = vld [vmem:[#allocation5 + $0x5b0] ss:$48 sps:$4 sm:$0xff]   ;;  %v5220_v33 = vld [vmem:[#allocation5 + $0x32c] ss:$48 sps:$4 sm:$0xff]  }
 0xa2f   :  { %2078 = vadd.xlane.f32.xlu0 %v2076_v57  ;;  %v2077_v58 = vadd.f32 %v2071_v55, %v6272_v60  ;;  %2847 = vmatprep.subr.bf16.mxu0 %v5169_v26  ;;  %v5217_v26 = vld [vmem:[#allocation5 + $0x324] ss:$48 sps:$4 sm:$0xff]  }
 0xa31   :  { %2080 = vadd.xlane.f32.xlu1 %v2077_v58 }
 0xabc   :  { %v2079_v59 = vpop.xlane.xlu0 %2078 }
 0xabd   :  { %v2082_v63 = vmul.f32 0.03125, %v2079_v59 }
 0xabe   :  { %v2081_v60 = vpop.xlane.xlu1 %2080 }
 0xabf   :  { %v2084_v0 = vsub.f32 %v2076_v57, %v2082_v63  ;;  %v2083_v1 = vmul.f32 0.03125, %v2081_v60 }
 0xac1   :  { %v2085_v2 = vsub.f32 %v2077_v58, %v2083_v1  ;;  %v6312_v5 = vmul.f32 %v6003_v17, %v2084_v0  ;;  %v5167_v0 = vld [vmem:[#allocation5 + $0x310] ss:$48 sps:$4 sm:$0xff]   ;;  %v5170_v1 = vld [vmem:[#allocation5 + $0x318] ss:$48 sps:$4 sm:$0xff]  }
 0xac3   :  { %v2088_v6 = vmul.f32 %v6312_v5, %v6312_v5  ;;  %v6317_v8 = vmul.f32 %v6003_v17, %v2085_v2 }
 0xac5   :  { %2090 = vadd.xlane.f32.xlu0 %v2088_v6  ;;  %v2089_v9 = vmul.f32 %v6317_v8, %v6317_v8  ;;  %v5175_v6 = vld [vmem:[#allocation5 + $0x374] ss:$48 sps:$4 sm:$0xff]  }
 0xac7   :  { %2092 = vadd.xlane.f32.xlu1 %v2089_v9  ;;  %v5178_v9 = vld [vmem:[#allocation5 + $0x37c] ss:$48 sps:$4 sm:$0xff]  }
 0xb52   :  { %v2091_v40 = vpop.xlane.xlu0 %2090 }
 0xb53   :  { %v2094_v55 = vmul.f32 0.03125, %v2091_v40  ;;  %v5215_v40 = vld [vmem:[#allocation5 + $0x320] ss:$48 sps:$4 sm:$0xff]  }
 0xb54   :  { %v2093_v56 = vpop.xlane.xlu1 %2092 }
 0xb55   :  { %v2096_v57 = vadd.f32 1e-12, %v2094_v55  ;;  %v2095_v58 = vmul.f32 0.03125, %v2093_v56  ;;  %v5218_v55 = vld [vmem:[#allocation5 + $0x328] ss:$48 sps:$4 sm:$0xff]  }
 0xb56   :  { %v5223_v56 = vld [vmem:[#allocation5 + $0x384] ss:$48 sps:$4 sm:$0xff]  }
 0xb57   :  { %5347 = vrsqrt.f32 %v2096_v57  ;;  %v2097_v27 = vadd.f32 1e-12, %v2095_v58  ;;  %v5226_v57 = vld [vmem:[#allocation5 + $0x38c] ss:$48 sps:$4 sm:$0xff]   ;;  %v5221_v58 = vld [vmem:[#allocation5 + $0x380] ss:$48 sps:$4 sm:$0xff]  }
 0xb59   :  { %5349 = vrsqrt.f32 %v2097_v27  ;;  %v5224_v27 = vld [vmem:[#allocation5 + $0x388] ss:$48 sps:$4 sm:$0xff]  }
 0xb61   :  { %v5348_v34 = vpop.eup %5347 }
 0xb62   :  { %v2100_v30 = vmul.f32 %v5348_v34, %v6312_v5  ;;  %v5173_v5 = vld [vmem:[#allocation5 + $0x370] ss:$48 sps:$4 sm:$0xff]   ;;  %v5229_v34 = vld [vmem:[#allocation5 + $0x3e4] ss:$48 sps:$4 sm:$0xff]  }
 0xb63   :  { %v5350_v39 = vpop.eup %5349 }
 0xb64   :  { %v2108_v43 = vmul.f32 %v4342_v41, %v2100_v30  ;;  %v2101_v61 = vmul.f32 %v5350_v39, %v6317_v8  ;;  %v5176_v8 = vld [vmem:[#allocation5 + $0x378] ss:$48 sps:$4 sm:$0xff]   ;;  %v5227_v30 = vld [vmem:[#allocation5 + $0x3e0] ss:$48 sps:$4 sm:$0xff]  }
 0xb65   :  { %v5230_v39 = vld [vmem:[#allocation5 + $0x3e8] ss:$48 sps:$4 sm:$0xff]  }
 0xb66   :  { %v2109_v59 = vmul.f32 %v4342_v41, %v2101_v61  ;;  %v6323_v63 = vadd.f32 %v4343_v62, %v2108_v43  ;;  %v5232_v41 = vld [vmem:[#allocation5 + $0x3ec] ss:$48 sps:$4 sm:$0xff]   ;;  %v5235_v43 = vld [vmem:[#allocation5 + $0x444] ss:$48 sps:$4 sm:$0xff]  }
 0xb67   :  { %v5238_v61 = vld [vmem:[#allocation5 + $0x44c] ss:$48 sps:$4 sm:$0xff]  }
 0xb68   :  { %v6325_v60 = vadd.f32 %v4343_v62, %v2109_v59  ;;  %v5233_v62 = vld [vmem:[#allocation5 + $0x440] ss:$48 sps:$4 sm:$0xff]   ;;  %v5236_v59 = vld [vmem:[#allocation5 + $0x448] ss:$48 sps:$4 sm:$0xff]  }
 0xb6a   :  { %v6329_v2 = vpack.c.bf16 %v6325_v60, %v6323_v63 }
 0xb6c   :  { %2794 = vmatmul.mubr.bf16.vlgmr.msra.gmra.mrb[28].mxu0 %v6329_v2  ;;  %2837 = vmatmul.mubr.bf16.vlgmr.msra.gmra.mrb[28].mxu1 %v6329_v2 }
 0xb6d   :  { %2848 = vmatpush1.bf16.msra.mxu0 %v5167_v0  ;;  %2891 = vmatpush1.bf16.msra.mxu1 %v5170_v1  ;;  %v5241_v0 = vld [vmem:[#allocation5 + $0x4a4] ss:$48 sps:$4 sm:$0xff]   ;;  %v5244_v1 = vld [vmem:[#allocation5 + $0x4ac] ss:$48 sps:$4 sm:$0xff]  }
 0xb6e   :  { %2849 = vmatprep.subr.bf16.mxu0 %v5175_v6  ;;  %2892 = vmatprep.subr.bf16.mxu1 %v5178_v9  ;;  %v5239_v6 = vld [vmem:[#allocation5 + $0x4a0] ss:$48 sps:$4 sm:$0xff]   ;;  %v5247_v9 = vld [vmem:[#allocation5 + $0x504] ss:$48 sps:$4 sm:$0xff]  }
 0xb6f   :  { %2879 = vmatprep.mubr.bf16.mxu0 %v5722_v51  ;;  %2922 = vmatprep.mubr.bf16.mxu1 %v5722_v51 }
 0xb71   :  { %2850 = vmatpush1.bf16.msra.mxu0 %v5173_v5  ;;  %2893 = vmatpush1.bf16.msra.mxu1 %v5176_v8  ;;  %v5250_v5 = vld [vmem:[#allocation5 + $0x50c] ss:$48 sps:$4 sm:$0xff]   ;;  %v5245_v8 = vld [vmem:[#allocation5 + $0x500] ss:$48 sps:$4 sm:$0xff]  }
 0xb72   :  { %2851 = vmatprep.subr.bf16.mxu0 %v5181_v10  ;;  %2894 = vmatprep.subr.bf16.mxu1 %v5184_v11  ;;  %v5248_v10 = vld [vmem:[#allocation5 + $0x508] ss:$48 sps:$4 sm:$0xff]   ;;  %v5253_v11 = vld [vmem:[#allocation5 + $0x564] ss:$48 sps:$4 sm:$0xff]  }
 0xb75   :  { %2852 = vmatpush1.bf16.msra.mxu0 %v5179_v7  ;;  %2895 = vmatpush1.bf16.msra.mxu1 %v5182_v21  ;;  %v5256_v7 = vld [vmem:[#allocation5 + $0x56c] ss:$48 sps:$4 sm:$0xff]   ;;  %v5251_v21 = vld [vmem:[#allocation5 + $0x560] ss:$48 sps:$4 sm:$0xff]  }
 0xb76   :  { %2853 = vmatprep.subr.bf16.mxu0 %v5187_v12  ;;  %2896 = vmatprep.subr.bf16.mxu1 %v5190_v3  ;;  %v5254_v12 = vld [vmem:[#allocation5 + $0x568] ss:$48 sps:$4 sm:$0xff]   ;;  %v5259_v3 = vld [vmem:[#allocation5 + $0x5c4] ss:$48 sps:$4 sm:$0xff]  }
 0xb79   :  { %2854 = vmatpush1.bf16.msra.mxu0 %v5185_v23  ;;  %2897 = vmatpush1.bf16.msra.mxu1 %v5188_v24  ;;  %v5262_v23 = vld [vmem:[#allocation5 + $0x5cc] ss:$48 sps:$4 sm:$0xff]   ;;  %v5257_v24 = vld [vmem:[#allocation5 + $0x5c0] ss:$48 sps:$4 sm:$0xff]  }
 0xb7a   :  { %2855 = vmatprep.subr.bf16.mxu0 %v5193_v4  ;;  %2898 = vmatprep.subr.bf16.mxu1 %v5196_v25  ;;  %v5260_v4 = vld [vmem:[#allocation5 + $0x5c8] ss:$48 sps:$4 sm:$0xff]  }
 0xb7b   :  { %v4344_v25 = vld [vmem:[%s6620_s5 + $0xc] sm:$0xff] }
 0xb7d   :  { %2856 = vmatpush1.bf16.msra.mxu0 %v5191_v28  ;;  %2899 = vmatpush1.bf16.msra.mxu1 %v5194_v29  ;;  %v2224_v28 = vrot.slane %v4344_v25, %v6050_v15  ;;  %v2232_v29 = vrot.slane %v4344_v25, %v6053_v18 }
 0xb7e   :  { %2857 = vmatprep.subr.bf16.mxu0 %v5199_v31  ;;  %2900 = vmatprep.subr.bf16.mxu1 %v5202_v35 }
 0xb81   :  { %2858 = vmatpush1.bf16.msra.mxu0 %v5197_v36  ;;  %2901 = vmatpush1.bf16.msra.mxu1 %v5200_v37  ;;  %v2228_v36 = vrot.slane %v4344_v25, %v6059_v19 }
 0xb82   :  { %2859 = vmatprep.subr.bf16.mxu0 %v5205_v38  ;;  %2902 = vmatprep.subr.bf16.mxu1 %v5208_v42 }
 0xb85   :  { %2860 = vmatpush1.bf16.msra.mxu0 %v5203_v48  ;;  %2903 = vmatpush1.bf16.msra.mxu1 %v5206_v49 }
 0xb86   :  { %2861 = vmatprep.subr.bf16.mxu0 %v5211_v52  ;;  %2904 = vmatprep.subr.bf16.mxu1 %v5214_v53 }
 0xb89   :  { %2862 = vmatpush1.bf16.msra.mxu0 %v5209_v50  ;;  %2905 = vmatpush1.bf16.msra.mxu1 %v5212_v54 }
 0xb8a   :  { %2933 = vmatprep.subr.bf16.mxu0 %v5217_v26  ;;  %2976 = vmatprep.subr.bf16.mxu1 %v5220_v33 }
 0xb8c   :  { %2880 = vmatmul.mubr.bf16.vlgmr.msra.gmra.mrb[32].mxu0 %v6329_v2  ;;  %2923 = vmatmul.mubr.bf16.vlgmr.msra.gmra.mrb[32].mxu1 %v6329_v2 }
 0xb8d   :  { %2934 = vmatpush1.bf16.msra.mxu0 %v5215_v40  ;;  %2977 = vmatpush1.bf16.msra.mxu1 %v5218_v55 }
 0xb8e   :  { %2935 = vmatprep.subr.bf16.mxu0 %v5223_v56  ;;  %2978 = vmatprep.subr.bf16.mxu1 %v5226_v57 }
 0xb8f   :  { %2965 = vmatprep.mubr.bf16.mxu0 %v5722_v51  ;;  %3008 = vmatprep.mubr.bf16.mxu1 %v5722_v51  ;;  %v5242_v51 = vld [vmem:[#allocation5 + $0x4a8] ss:$48 sps:$4 sm:$0xff]  }
 0xb91   :  { %2936 = vmatpush1.bf16.msra.mxu0 %v5221_v58  ;;  %2979 = vmatpush1.bf16.msra.mxu1 %v5224_v27 }
 0xb92   :  { %2937 = vmatprep.subr.bf16.mxu0 %v5229_v34  ;;  %2980 = vmatprep.subr.bf16.mxu1 %v5232_v41  ;;  %v2240_v41 = vrot.slane %v4344_v25, %v428_v44 }
 0xb95   :  { %2938 = vmatpush1.bf16.msra.mxu0 %v5227_v30  ;;  %2981 = vmatpush1.bf16.msra.mxu1 %v5230_v39  ;;  %v2248_v30 = vrot.slane %v4344_v25, %v436_v45 }
 0xb96   :  { %2939 = vmatprep.subr.bf16.mxu0 %v5235_v43  ;;  %2982 = vmatprep.subr.bf16.mxu1 %v5238_v61  ;;  %v2244_v61 = vrot.slane %v4344_v25, %v432_v46 }
 0xb99   :  { %2940 = vmatpush1.bf16.msra.mxu0 %v5233_v62  ;;  %2983 = vmatpush1.bf16.msra.mxu1 %v5236_v59  ;;  %v2252_v62 = vrot.slane %v4344_v25, %v440_v47  ;;  %v2256_v47 = vrot.slane %v4345_v14, %v6050_v15 }
 0xb9a   :  { %2941 = vmatprep.subr.bf16.mxu0 %v5241_v0  ;;  %2984 = vmatprep.subr.bf16.mxu1 %v5244_v1 }
 0xb9d   :  { %2942 = vmatpush1.bf16.msra.mxu0 %v5239_v6  ;;  %2985 = vmatpush1.bf16.msra.mxu1 %v5242_v51 }
 0xb9e   :  { %2943 = vmatprep.subr.bf16.mxu0 %v5247_v9  ;;  %2986 = vmatprep.subr.bf16.mxu1 %v5250_v5 }
 0xba1   :  { %2944 = vmatpush1.bf16.msra.mxu0 %v5245_v8  ;;  %2987 = vmatpush1.bf16.msra.mxu1 %v5248_v10 }
 0xba2   :  { %2945 = vmatprep.subr.bf16.mxu0 %v5253_v11  ;;  %2988 = vmatprep.subr.bf16.mxu1 %v5256_v7 }
 0xba5   :  { %2946 = vmatpush1.bf16.msra.mxu0 %v5251_v21  ;;  %2989 = vmatpush1.bf16.msra.mxu1 %v5254_v12 }
 0xba6   :  { %2947 = vmatprep.subr.bf16.mxu0 %v5259_v3  ;;  %2990 = vmatprep.subr.bf16.mxu1 %v5262_v23 }
 0xba9   :  { %2948 = vmatpush1.bf16.msra.mxu0 %v5257_v24  ;;  %2991 = vmatpush1.bf16.msra.mxu1 %v5260_v4  ;;  %v2264_v24 = vrot.slane %v4345_v14, %v6053_v18  ;;  %v2268_v4 = vrot.slane %v4345_v14, %v6062_v20 }
 0xbaa   :  { %4757 = vmatprep.subr.bf16.mxu0 %v5721_v16  ;;  %4781 = vmatprep.subr.bf16.mxu1 %v5721_v16 }
 0xbac   :  { %2966 = vmatmul.mubr.bf16.vlgmr.msra.gmra.mrb[36].mxu0 %v6329_v2  ;;  %3009 = vmatmul.mubr.bf16.vlgmr.msra.gmra.mrb[36].mxu1 %v6329_v2  ;;  %v2236_v2 = vrot.slane %v4344_v25, %v6062_v20 }
 0xbad   :  { %4759 = vmatprep.mubr.msk.bf16.mxu0 %vm5723_vm2, %v5721_v16  ;;  %4783 = vmatprep.mubr.msk.bf16.mxu1 %vm5723_vm2, %v5721_v16 }
 0xc3f   :  { %v2795_v31 = vpop.f32.mrb[28].mxu0  ;;  %v2838_v35 = vpop.f32.mrb[28].mxu1 }
 0xc40   :  { %v2797_v37 = vpop.f32.mrb[29].mxu0  ;;  %v2840_v38 = vpop.f32.mrb[29].mxu1  ;;  %v2796_v49 = vadd.f32 %v2795_v31, %v2224_v28  ;;  %v2839_v52 = vadd.f32 %v2838_v35, %v2232_v29 }
 0xc41   :  { %v2799_v42 = vpop.f32.mrb[30].mxu0  ;;  %v2842_v48 = vpop.f32.mrb[30].mxu1  ;;  %v2798_v33 = vadd.f32 %v2797_v37, %v2228_v36  ;;  %v2841_v40 = vadd.f32 %v2840_v38, %v2236_v2 }
 0xc42   :  { %v2800_v53 = vadd.f32 %v2799_v42, %v2224_v28  ;;  %v2843_v50 = vadd.f32 %v2842_v48, %v2232_v29  ;;  %v2801_v54 = vpop.f32.mrb[31].mxu0  ;;  %v2844_v26 = vpop.f32.mrb[31].mxu1  ;;  %v2260_v29 = vrot.slane %v4345_v14, %v6059_v19 }
 0xc43   :  { %v2802_v55 = vadd.f32 %v2801_v54, %v2228_v36  ;;  %v2845_v56 = vadd.f32 %v2844_v26, %v2236_v2 }
 0xc44   :  { %v3019_v57 = vpack.c.bf16 %v2800_v53, %v2796_v49  ;;  %v3249_v58 = vpack.c.bf16 %v2843_v50, %v2839_v52 }
 0xc45   :  { %v3090_v27 = vpack.c.bf16 %v2802_v55, %v2798_v33  ;;  %v3366_v34 = vpack.c.bf16 %v2845_v56, %v2841_v40 }
 0xc5f   :  { %v2881_v39 = vpop.f32.mrb[32].mxu0  ;;  %v2924_v43 = vpop.f32.mrb[32].mxu1 }
 0xc60   :  { %v2883_v59 = vpop.f32.mrb[33].mxu0  ;;  %v2926_v0 = vpop.f32.mrb[33].mxu1  ;;  %v2882_v51 = vadd.f32 %v2881_v39, %v2240_v41  ;;  %v2925_v9 = vadd.f32 %v2924_v43, %v2248_v30 }
 0xc61   :  { %v2885_v1 = vpop.f32.mrb[34].mxu0  ;;  %v2928_v6 = vpop.f32.mrb[34].mxu1  ;;  %v2884_v11 = vadd.f32 %v2883_v59, %v2244_v61  ;;  %v2927_v45 = vadd.f32 %v2926_v0, %v2252_v62 }
 0xc62   :  { %v2886_v5 = vadd.f32 %v2885_v1, %v2240_v41  ;;  %v2929_v8 = vadd.f32 %v2928_v6, %v2248_v30  ;;  %v2887_v44 = vpop.f32.mrb[35].mxu0  ;;  %v2930_v10 = vpop.f32.mrb[35].mxu1 }
 0xc63   :  { %v2888_v7 = vadd.f32 %v2887_v44, %v2244_v61  ;;  %v2931_v21 = vadd.f32 %v2930_v10, %v2252_v62 }
 0xc64   :  { %v3020_v12 = vpack.c.bf16 %v2886_v5, %v2882_v51  ;;  %v3250_v3 = vpack.c.bf16 %v2929_v8, %v2925_v9 }
 0xc65   :  { %v3091_v46 = vpack.c.bf16 %v2888_v7, %v2884_v11  ;;  %v3367_v23 = vpack.c.bf16 %v2931_v21, %v2927_v45 }
 0xc66   :  { %4758 = vmatpush3.bf16.xpose.msra.mxu0 %v3020_v12  ;;  %4782 = vmatpush3.bf16.xpose.msra.mxu1 %v3250_v3 }
 0xc67   :  { %4763 = vmatprep.subr.bf16.mxu0 %v5721_v16  ;;  %4793 = vmatprep.subr.bf16.mxu1 %v5721_v16 }
 0xc6d   :  { %4760 = vmatmul.mubr.bf16.vlgmr.msra.gmra.mrb[40].mxu0 %v3019_v57  ;;  %4784 = vmatmul.mubr.bf16.vlgmr.msra.gmra.mrb[40].mxu1 %v3249_v58 }
 0xc6e   :  { %4764 = vmatpush3.bf16.xpose.msra.mxu0 %v3091_v46  ;;  %4794 = vmatpush3.bf16.xpose.msra.mxu1 %v3367_v23 }
 0xc6f   :  { %4765 = vmatprep.mubr.msk.bf16.mxu0 %vm5723_vm2, %v5721_v16  ;;  %4795 = vmatprep.mubr.msk.bf16.mxu1 %vm5723_vm2, %v5721_v16 }
 0xc70   :  { %4769 = vmatprep.subr.bf16.mxu0 %v5721_v16  ;;  %4805 = vmatprep.subr.bf16.mxu1 %v5721_v16 }
 0xc75   :  { %4766 = vmatmul.mubr.bf16.vlgmr.msra.gmra.mrb[44].mxu0 %v3090_v27  ;;  %4796 = vmatmul.mubr.bf16.vlgmr.msra.gmra.mrb[44].mxu1 %v3366_v34 }
 0xc76   :  { %4771 = vmatprep.mubr.msk.bf16.mxu0 %vm5723_vm2, %v5721_v16  ;;  %4821 = vmatprep.mubr.msk.bf16.mxu1 %vm5723_vm2, %v5721_v16 }
 0xc7f   :  { %v2967_v25 = vpop.f32.mrb[36].mxu0  ;;  %v3010_v28 = vpop.f32.mrb[36].mxu1 }
 0xc80   :  { %v6381_v31 = vadd.f32 %v2967_v25, %v2256_v47  ;;  %v6383_v35 = vadd.f32 %v3010_v28, %v2264_v24  ;;  %v2969_v36 = vpop.f32.mrb[37].mxu0  ;;  %v3012_v2 = vpop.f32.mrb[37].mxu1 }
 0xc81   :  { %v6385_v37 = vadd.f32 %v3012_v2, %v2268_v4  ;;  %v2971_v38 = vpop.f32.mrb[38].mxu0  ;;  %v3014_v42 = vpop.f32.mrb[38].mxu1  ;;  %v2970_v49 = vadd.f32 %v2969_v36, %v2260_v29 }
 0xc82   :  { %v6387_v48 = vadd.f32 %v2971_v38, %v2256_v47  ;;  %v6389_v15 = vadd.f32 %v3014_v42, %v2264_v24  ;;  %v2973_v18 = vpop.f32.mrb[39].mxu0  ;;  %v3016_v20 = vpop.f32.mrb[39].mxu1 }
 0xc83   :  { %v2974_v52 = vadd.f32 %v2973_v18, %v2260_v29  ;;  %v6391_v53 = vadd.f32 %v3016_v20, %v2268_v4 }
 0xc84   :  { %v3089_v19 = vpack.c.bf16 %v6387_v48, %v6381_v31  ;;  %v3319_v50 = vpack.c.bf16 %v6389_v15, %v6383_v35 }
 0xc85   :  { %v3160_v54 = vpack.c.bf16 %v2974_v52, %v2970_v49  ;;  %v3436_v26 = vpack.c.bf16 %v6391_v53, %v6385_v37  ;;  %v5270_v37 = vld [vmem:[%s6621_s6 + $0x78] sm:$0xff]  }
 0xc87   :  { %4770 = vmatpush3.bf16.msra.mxu0 %v3160_v54 }
 0xc88   :  { %4775 = vmatprep.subr.bf16.mxu0 %v5721_v16 }
 0xd40   :  { %v3055_v33 = vpop.f32.mrb[40].mxu0  ;;  %v3285_v40 = vpop.f32.mrb[40].mxu1 }
 0xd41   :  { %v4761_v55 = vpop.f32.mrb[41].mxu0  ;;  %v4785_v56 = vpop.f32.mrb[41].mxu1  ;;  %v3062_v39 = vmul.f32 0.35355338, %v3055_v33  ;;  %v3292_v8 = vmul.f32 0.35355338, %v3285_v40 }
 0xd42   :  { %v3058_v57 = vpop.f32.mrb[42].mxu0  ;;  %v3288_v58 = vpop.f32.mrb[42].mxu1 }
 0xd43   :  { %v4762_v27 = vpop.f32.mrb[43].mxu0  ;;  %v4786_v34 = vpop.f32.mrb[43].mxu1  ;;  %v3063_v1 = vmul.f32 0.35355338, %v3058_v57  ;;  %v3064_v11 = vadd.f32 %v3062_v39, %v6126_v22  ;;  %v3293_v45 = vmul.f32 0.35355338, %v3288_v58  ;;  %v3294_v46 = vadd.f32 %v3292_v8, %v6126_v22 }
 0xd45   :  { %v3065_v21 = vadd.f32 %v3063_v1, %v6128_v32  ;;  %v3066_v3 = vsel %vm1255_vm5, %v3064_v11, -inf  ;;  %v3295_v47 = vadd.f32 %v3293_v45, %v6128_v32  ;;  %v3296_v24 = vsel %vm1255_vm5, %v3294_v46, -inf }
 0xd47   :  { %v3069_v14 = vsel %vm1255_vm5, %v3065_v21, -inf  ;;  %v3299_v25 = vsel %vm1255_vm5, %v3295_v47, -inf }
 0xd48   :  { %v3126_v41 = vpop.f32.mrb[44].mxu0  ;;  %v3402_v30 = vpop.f32.mrb[44].mxu1 }
 0xd49   :  { %v3133_v43 = vmul.f32 0.35355338, %v3126_v41  ;;  %v4767_v61 = vpop.f32.mrb[45].mxu0  ;;  %v4797_v62 = vpop.f32.mrb[45].mxu1  ;;  %v3409_v12 = vmul.f32 0.35355338, %v3402_v30 }
 0xd4a   :  { %v3129_v59 = vpop.f32.mrb[46].mxu0  ;;  %v3405_v0 = vpop.f32.mrb[46].mxu1 }
 0xd4b   :  { %v3134_v6 = vmul.f32 0.35355338, %v3129_v59  ;;  %v4768_v51 = vpop.f32.mrb[47].mxu0  ;;  %v4798_v9 = vpop.f32.mrb[47].mxu1  ;;  %v3135_v5 = vadd.f32 %v3133_v43, %v6126_v22  ;;  %v3410_v23 = vmul.f32 0.35355338, %v3405_v0  ;;  %v3411_v4 = vadd.f32 %v3409_v12, %v6126_v22 }
 0xd4d   :  { %v3137_v44 = vsel %vm1255_vm5, %v3135_v5, -inf  ;;  %v3136_v10 = vadd.f32 %v3134_v6, %v6128_v32  ;;  %v3412_v28 = vadd.f32 %v3410_v23, %v6128_v32  ;;  %v3413_v29 = vsel %vm1255_vm5, %v3411_v4, -inf  ;;  %v5264_v23 = vld [vmem:[%s6621_s6 + $0x48] sm:$0xff]  }
 0xd4e   :  { %3138 = vmax.xlane.f32.xlu0 %v3137_v44 }
 0xd4f   :  { %v3140_v7 = vsel %vm1255_vm5, %v3136_v10, -inf  ;;  %v3416_v36 = vsel %vm1255_vm5, %v3412_v28, -inf }
 0xd50   :  { %3141 = vmax.xlane.f32.xlu1 %v3140_v7 }
 0xd52   :  { %3067 = vmax.xlane.f32.xlu0 %v3066_v3 }
 0xd54   :  { %3070 = vmax.xlane.f32.xlu1 %v3069_v14  ;;  %v5265_v14 = vld [vmem:[%s6621_s6 + $0x50] sm:$0xff]  }
 0xd56   :  { %3297 = vmax.xlane.f32.xlu0 %v3296_v24  ;;  %v5267_v24 = vld [vmem:[%s6621_s6 + $0x60] sm:$0xff]  }
 0xd58   :  { %3300 = vmax.xlane.f32.xlu1 %v3299_v25  ;;  %v5269_v25 = vld [vmem:[%s6621_s6 + $0x70] sm:$0xff]  }
 0xd5a   :  { %3414 = vmax.xlane.f32.xlu0 %v3413_v29 }
 0xd5c   :  { %3417 = vmax.xlane.f32.xlu1 %v3416_v36 }
 0xddb   :  { %v3139_v2 = vpop.xlane.xlu0 %3138 }
 0xddc   :  { %v3143_v38 = vsub.f32 %v3135_v5, %v3139_v2 }
 0xddd   :  { %v3142_v42 = vpop.xlane.xlu1 %3141 }
 0xdde   :  { %v3145_v18 = vmul.f32 1.442695, %v3143_v38  ;;  %v3144_v20 = vsub.f32 %v3136_v10, %v3142_v42 }
 0xddf   :  { %v3068_v49 = vpop.xlane.xlu0 %3067 }
 0xde0   :  { %5351 = vpow2.f32 %v3145_v18  ;;  %v3147_v22 = vmul.f32 1.442695, %v3144_v20  ;;  %v3072_v52 = vsub.f32 %v3064_v11, %v3068_v49 }
 0xde1   :  { %v3071_v54 = vpop.xlane.xlu1 %3070 }
 0xde2   :  { %5353 = vpow2.f32 %v3147_v22  ;;  %v3074_v33 = vmul.f32 1.442695, %v3072_v52  ;;  %v3073_v32 = vsub.f32 %v3065_v21, %v3071_v54 }
 0xde3   :  { %v3298_v40 = vpop.xlane.xlu0 %3297 }
 0xde4   :  { %5355 = vpow2.f32 %v3074_v33  ;;  %v3076_v55 = vmul.f32 1.442695, %v3073_v32  ;;  %v3302_v56 = vsub.f32 %v3294_v46, %v3298_v40  ;;  %v5263_v46 = vld [vmem:[%s6621_s6 + $0x40] sm:$0xff]  }
 0xde5   :  { %v3301_v57 = vpop.xlane.xlu1 %3300  ;;  %4806 = vmatpush3.bf16.msra.mxu1 %v5263_v46 }
 0xde6   :  { %5357 = vpow2.f32 %v3076_v55  ;;  %v3304_v58 = vmul.f32 1.442695, %v3302_v56  ;;  %v3303_v27 = vsub.f32 %v3295_v47, %v3301_v57  ;;  %4807 = vmatprep.subr.bf16.mxu1 %v5721_v16  ;;  %v5266_v47 = vld [vmem:[%s6621_s6 + $0x58] sm:$0xff]  }
 0xde7   :  { %v3415_v34 = vpop.xlane.xlu0 %3414 }
 0xde8   :  { %5359 = vpow2.f32 %v3304_v58  ;;  %v3306_v41 = vmul.f32 1.442695, %v3303_v27  ;;  %v3419_v30 = vsub.f32 %v3411_v4, %v3415_v34  ;;  %v5268_v4 = vld [vmem:[%s6621_s6 + $0x68] sm:$0xff]  }
 0xde9   :  { %v3418_v39 = vpop.xlane.xlu1 %3417  ;;  %4808 = vmatpush3.bf16.msra.mxu1 %v5264_v23  ;;  %v5273_v23 = vld [vmem:[%s6625_s10 + $0x50] sm:$0xff]  }
 0xdea   :  { %v5352_v43 = vpop.eup %5351  ;;  %5361 = vpow2.f32 %v3306_v41  ;;  %v3421_v61 = vmul.f32 1.442695, %v3419_v30  ;;  %v3420_v62 = vsub.f32 %v3412_v28, %v3418_v39  ;;  %4809 = vmatprep.subr.bf16.mxu1 %v5721_v16 }
 0xdeb   :  { %v3149_v59 = vsel %vm1255_vm5, %v5352_v43, 0.0 }
 0xdec   :  { %v5354_v0 = vpop.eup %5353  ;;  %5363 = vpow2.f32 %v3421_v61  ;;  %v3423_v1 = vmul.f32 1.442695, %v3420_v62  ;;  %3150 = vadd.xlane.f32.xlu0 %v3149_v59  ;;  %v4463_v61 = vld [vmem:[%s6622_s7 + $0x1] ss:$0 sm:$0xff] }
 0xded   :  { %v3152_v6 = vsel %vm1255_vm5, %v5354_v0, 0.0  ;;  %4810 = vmatpush3.bf16.msra.mxu1 %v5265_v14  ;;  %v5274_v14 = vld [vmem:[%s6625_s10 + $0x58] sm:$0xff]  }
 0xdee   :  { %v6418_v51 = vpop.eup %5355  ;;  %5365 = vpow2.f32 %v3423_v1  ;;  %3153 = vadd.xlane.f32.xlu1 %v3152_v6  ;;  %4811 = vmatprep.subr.bf16.mxu1 %v5721_v16 }
 0xdef   :  { %v3078_v9 = vsel %vm1255_vm5, %v6418_v51, 0.0 }
 0xdf0   :  { %v5358_v5 = vpop.eup %5357  ;;  %3079 = vadd.xlane.f32.xlu0 %v3078_v9 }
 0xdf1   :  { %v3081_v8 = vsel %vm1255_vm5, %v5358_v5, 0.0  ;;  %4812 = vmatpush3.bf16.msra.mxu1 %v5266_v47  ;;  %v5275_v47 = vld [vmem:[%s6625_s10 + $0x60] sm:$0xff]  }
 0xdf2   :  { %v6423_v44 = vpop.eup %5359  ;;  %3082 = vadd.xlane.f32.xlu1 %v3081_v8  ;;  %4813 = vmatprep.subr.bf16.mxu1 %v5721_v16  ;;  %v5271_v8 = vld [vmem:[%s6625_s10 + $0x40] sm:$0xff]  }
 0xdf3   :  { %v3308_v10 = vsel %vm1255_vm5, %v6423_v44, 0.0 }
 0xdf4   :  { %v6427_v11 = vpop.eup %5361  ;;  %3309 = vadd.xlane.f32.xlu0 %v3308_v10 }
 0xdf5   :  { %v3311_v45 = vsel %vm1255_vm5, %v6427_v11, 0.0  ;;  %4814 = vmatpush3.bf16.msra.mxu1 %v5267_v24  ;;  %v5276_v24 = vld [vmem:[%s6625_s10 + $0x68] sm:$0xff]  }
 0xdf6   :  { %v6431_v7 = vpop.eup %5363  ;;  %3312 = vadd.xlane.f32.xlu1 %v3311_v45  ;;  %4815 = vmatprep.subr.bf16.mxu1 %v5721_v16 }
 0xdf7   :  { %v3425_v21 = vsel %vm1255_vm5, %v6431_v7, 0.0 }
 0xdf8   :  { %v6435_v12 = vpop.eup %5365  ;;  %3426 = vadd.xlane.f32.xlu0 %v3425_v21 }
 0xdf9   :  { %v3428_v3 = vsel %vm1255_vm5, %v6435_v12, 0.0  ;;  %4816 = vmatpush3.bf16.msra.mxu1 %v5268_v4  ;;  %v5277_v4 = vld [vmem:[%s6625_s10 + $0x70] sm:$0xff]  }
 0xdfa   :  { %3429 = vadd.xlane.f32.xlu1 %v3428_v3  ;;  %4817 = vmatprep.subr.bf16.mxu1 %v5721_v16 }
 0xdfd   :  { %4818 = vmatpush3.bf16.msra.mxu1 %v5269_v25  ;;  %v5278_v25 = vld [vmem:[%s6625_s10 + $0x78] sm:$0xff]  }
 0xdfe   :  { %4819 = vmatprep.subr.bf16.mxu1 %v5721_v16 }
 0xe01   :  { %4820 = vmatpush3.bf16.msra.mxu1 %v5270_v37 }
 0xe02   :  { %4845 = vmatprep.subr.bf16.mxu1 %v5721_v16 }
 0xe79   :  { %v3151_v28 = vpop.xlane.xlu0 %3150 }
 0xe7a   :  { %5367 = vrcp.f32 %v3151_v28 }
 0xe7b   :  { %v3154_v29 = vpop.xlane.xlu1 %3153 }
 0xe7c   :  { %5369 = vrcp.f32 %v3154_v29 }
 0xe7d   :  { %v3080_v2 = vpop.xlane.xlu0 %3079 }
 0xe7f   :  { %v3083_v36 = vpop.xlane.xlu1 %3082 }
 0xe80   :  { %5371 = vrcp.f32 %v3083_v36 }
 0xe81   :  { %5373 = vrcp.f32 %v3080_v2  ;;  %v3310_v54 = vpop.xlane.xlu0 %3309 }
 0xe83   :  { %v3313_v22 = vpop.xlane.xlu1 %3312 }
 0xe84   :  { %v5368_v38 = vpop.eup %5367  ;;  %5375 = vrcp.f32 %v3313_v22 }
 0xe85   :  { %v3157_v18 = vmul.f32 %v5368_v38, %v5352_v43  ;;  %5377 = vrcp.f32 %v3310_v54 }
 0xe86   :  { %v5370_v42 = vpop.eup %5369 }
 0xe87   :  { %v3158_v20 = vmul.f32 %v5370_v42, %v5354_v0  ;;  %v3430_v31 = vpop.xlane.xlu1 %3429 }
 0xe88   :  { %5379 = vrcp.f32 %v3430_v31 }
 0xe89   :  { %v3159_v49 = vpack.c.bf16 %v3158_v20, %v3157_v18  ;;  %v4472_v20 = vld [vmem:[#allocation7 + $0x1] ss:$0 sm:$0xff] }
 0xe8a   :  { %v5372_v52 = vpop.eup %5371 }
 0xe8b   :  { %4772 = vmatmul.mubr.msk.bf16.vlgmr.msra.gmra.mrb[48].mxu0 %vm1255_vm5, %v3159_v49  ;;  %v5374_v33 = vpop.eup %5373  ;;  %v3087_v32 = vmul.f32 %v5372_v52, %v5358_v5 }
 0xe8c   :  { %4776 = vmatpush3.bf16.msra.mxu0 %v3089_v19  ;;  %4777 = vmatprep.mubr.msk.bf16.mxu0 %vm5723_vm2, %v5721_v16  ;;  %v3086_v40 = vmul.f32 %v5374_v33, %v6418_v51  ;;  %v3427_v19 = vpop.xlane.xlu0 %3426  ;;  %v4473_v33 = vld [vmem:[#allocation8 + $0x1] ss:$0 sm:$0xff] }
 0xe8d   :  { %4787 = vmatprep.subr.bf16.mxu0 %v5721_v16  ;;  %5381 = vrcp.f32 %v3427_v19  ;;  %v5280_v19 = vld [vmem:[%s6653_s0 + $0x48] sm:$0xff]  }
 0xe8e   :  { %v3088_v55 = vpack.c.bf16 %v3087_v32, %v3086_v40  ;;  %v5376_v48 = vpop.eup %5375 }
 0xe8f   :  { %v5378_v56 = vpop.eup %5377  ;;  %v3317_v57 = vmul.f32 %v5376_v48, %v6427_v11  ;;  %v5279_v48 = vld [vmem:[%s6653_s0 + $0x40] sm:$0xff]  }
 0xe90   :  { %v3316_v58 = vmul.f32 %v5378_v56, %v6423_v44  ;;  %v5272_v44 = vld [vmem:[%s6625_s10 + $0x48] sm:$0xff]   ;;  %v5281_v56 = vld [vmem:[%s6653_s0 + $0x50] sm:$0xff]  }
 0xe92   :  { %v3318_v27 = vpack.c.bf16 %v3317_v57, %v3316_v58  ;;  %v5380_v35 = vpop.eup %5379  ;;  %v5282_v57 = vld [vmem:[%s6653_s0 + $0x58] sm:$0xff]   ;;  %v5283_v58 = vld [vmem:[%s6653_s0 + $0x60] sm:$0xff]  }
 0xe97   :  { %4778 = vmatmul.mubr.msk.bf16.vlgmr.msra.gmra.mrb[48].mxu0 %vm1255_vm5, %v3088_v55  ;;  %v5382_v15 = vpop.eup %5381 }
 0xe98   :  { %4788 = vmatpush3.bf16.msra.mxu0 %v3319_v50  ;;  %4789 = vmatprep.mubr.msk.bf16.mxu0 %vm5723_vm2, %v5721_v16  ;;  %v3434_v50 = vmul.f32 %v5380_v35, %v6435_v12  ;;  %v3433_v34 = vmul.f32 %v5382_v15, %v6431_v7  ;;  %v5285_v35 = vld [vmem:[%s6653_s0 + $0x70] sm:$0xff]   ;;  %v5286_v15 = vld [vmem:[%s6653_s0 + $0x78] sm:$0xff]  }
 0xe99   :  { %4799 = vmatprep.subr.bf16.mxu0 %v5721_v16 }
 0xe9a   :  { %v3435_v41 = vpack.c.bf16 %v3434_v50, %v3433_v34  ;;  %v4490_v50 = vld [vmem:[#allocation10 + $0x1] ss:$0 sm:$0xff] }
 0xea3   :  { %4790 = vmatmul.mubr.msk.bf16.vlgmr.msra.gmra.mrb[48].mxu0 %vm1255_vm5, %v3318_v27  ;;  %v5284_v27 = vld [vmem:[%s6653_s0 + $0x68] sm:$0xff]   ;;  %s5724_s0 = smov [#allocation22]  }
 0xea4   :  { %4800 = vmatpush3.bf16.msra.mxu0 %v3436_v26  ;;  %4801 = vmatprep.mubr.msk.bf16.mxu0 %vm5723_vm2, %v5721_v16  ;;  %s4192_s23 = sshll.u32 %s5724_s0, 4  ;;  %s4193_s23 = int_to_ptr.vmem [resolvable:$true] %s4192_s23 }
 0xea5   :  { %4825 = vmatprep.subr.bf16.mxu0 %v5721_v16  ;;  %s5665_s22 = scalar_lea.vmem %s4193_s23, 32  ;;  %p5670_p13 = scmp.lt.s32.totalorder %s4193_s23, %s4193_s23 }
 0xea6   :  { %p5666_p12 = scmp.ne.s32.totalorder %s4193_s23, %s5665_s22  ;;  %p5671_p0 = scmp.lt.s32.totalorder %s5665_s22, %s5665_s22 }
 0xea8   :  { %p5672_p1 = por %p5671_p0, %p5670_p13 }
 0xeaa   :  { %p5673_p2 = pnand %p5672_p1, %p5666_p12 }
 0xeaf   :  { %4802 = vmatmul.mubr.msk.bf16.vlgmr.msra.gmra.mrb[48].mxu0 %vm1255_vm5, %v3435_v41 }
 0xeb0   :  { %4841 = vmatprep.mubr.msk.bf16.mxu0 %vm5723_vm2, %v5721_v16  ;;  %4826 = vmatpush3.bf16.msra.mxu0 %v5271_v8 }
 0xeb1   :  { %4827 = vmatprep.subr.bf16.mxu0 %v5721_v16 }
 0xeb4   :  { %4828 = vmatpush3.bf16.msra.mxu0 %v5272_v44 }
 0xeb5   :  { %4829 = vmatprep.subr.bf16.mxu0 %v5721_v16 }
 0xeb8   :  { %4830 = vmatpush3.bf16.msra.mxu0 %v5273_v23 }
 0xeb9   :  { %4831 = vmatprep.subr.bf16.mxu0 %v5721_v16 }
 0xebc   :  { %4832 = vmatpush3.bf16.msra.mxu0 %v5274_v14 }
 0xebd   :  { %4833 = vmatprep.subr.bf16.mxu0 %v5721_v16 }
 0xec0   :  { %4834 = vmatpush3.bf16.msra.mxu0 %v5275_v47 }
 0xec1   :  { %4835 = vmatprep.subr.bf16.mxu0 %v5721_v16 }
 0xec4   :  { %4836 = vmatpush3.bf16.msra.mxu0 %v5276_v24 }
 0xec5   :  { %4837 = vmatprep.subr.bf16.mxu0 %v5721_v16 }
 0xec8   :  { %4838 = vmatpush3.bf16.msra.mxu0 %v5277_v4 }
 0xec9   :  { %4839 = vmatprep.subr.bf16.mxu0 %v5721_v16 }
 0xecc   :  { %4840 = vmatpush3.bf16.msra.mxu0 %v5278_v25  ;;  %v5287_v25 = vld [vmem:[#allocation16] sm:$0xff]  }
 0xecd   :  { %4865 = vmatprep.subr.bf16.mxu0 %v5721_v16 }
 0xf82   :  { %v3474_v53 = vpop.f32.mrb[48].mxu0 }
 0xf83   :  { %v4803_v26 = vpop.f32.mrb[49].mxu0 }
 0xf84   :  { %v3477_v30 = vpop.f32.mrb[50].mxu0 }
 0xf85   :  { %v3500_v39 = vpack.c.bf16 %v3477_v30, %v3474_v53  ;;  %v4804_v43 = vpop.f32.mrb[51].mxu0 }
 0xf87   :  { %4822 = vmatmul.mubr.bf16.vlgmr.msra.gmra.mrb[48].mxu1 %v3500_v39 }
 0xf88   :  { %4861 = vmatprep.mubr.msk.bf16.mxu1 %vm5723_vm2, %v5721_v16  ;;  %4846 = vmatpush3.bf16.msra.mxu1 %v5279_v48  ;;  %v5296_v48 = vld [vmem:[#allocation19 + $0x8] sm:$0xff]  }
 0xf89   :  { %4847 = vmatprep.subr.bf16.mxu1 %v5721_v16 }
 0xf8c   :  { %4848 = vmatpush3.bf16.msra.mxu1 %v5280_v19  ;;  %v5297_v19 = vld [vmem:[#allocation19 + $0x10] sm:$0xff]  }
 0xf8d   :  { %4849 = vmatprep.subr.bf16.mxu1 %v5721_v16 }
 0xf90   :  { %4850 = vmatpush3.bf16.msra.mxu1 %v5281_v56  ;;  %v5298_v56 = vld [vmem:[#allocation19 + $0x18] sm:$0xff]  }
 0xf91   :  { %4851 = vmatprep.subr.bf16.mxu1 %v5721_v16 }
 0xf94   :  { %4852 = vmatpush3.bf16.msra.mxu1 %v5282_v57 }
 0xf95   :  { %4853 = vmatprep.subr.bf16.mxu1 %v5721_v16 }
 0xf98   :  { %4854 = vmatpush3.bf16.msra.mxu1 %v5283_v58 }
 0xf99   :  { %4855 = vmatprep.subr.bf16.mxu1 %v5721_v16 }
 0xf9c   :  { %4856 = vmatpush3.bf16.msra.mxu1 %v5284_v27 }
 0xf9d   :  { %4857 = vmatprep.subr.bf16.mxu1 %v5721_v16 }
 0xfa0   :  { %4858 = vmatpush3.bf16.msra.mxu1 %v5285_v35 }
 0xfa1   :  { %4859 = vmatprep.subr.bf16.mxu1 %v5721_v16 }
 0xfa4   :  { %4860 = vmatpush3.bf16.msra.mxu1 %v5286_v15 }
 0xfa5   :  { %4885 = vmatprep.subr.bf16.mxu1 %v5721_v16 }
0x105a   :  { %v3591_v62 = vpop.f32.mrb[48].mxu1 }
0x105b   :  { %v3592_v59 = vadd.f32 %v4463_v61, %v3591_v62  ;;  %v4823_v0 = vpop.f32.mrb[49].mxu1 }
0x105c   :  { %v3594_v1 = vpop.f32.mrb[50].mxu1 }
0x105d   :  { %v3595_v6 = vadd.f32 %v4463_v61, %v3594_v1  ;;  %v4824_v51 = vpop.f32.mrb[51].mxu1  ;;  %v3602_v9 = vadd.f32 %v3592_v59, %v6323_v63 }
0x105f   :  { %3604 = vadd.xlane.f32.xlu0 %v3602_v9  ;;  %v3603_v5 = vadd.f32 %v3595_v6, %v6325_v60 }
0x1061   :  { %3606 = vadd.xlane.f32.xlu1 %v3603_v5 }
0x10ec   :  { %v3605_v10 = vpop.xlane.xlu0 %3604 }
0x10ed   :  { %v3608_v63 = vmul.f32 0.03125, %v3605_v10 }
0x10ee   :  { %v3607_v11 = vpop.xlane.xlu1 %3606 }
0x10ef   :  { %v3610_v45 = vsub.f32 %v3602_v9, %v3608_v63  ;;  %v3609_v60 = vmul.f32 0.03125, %v3607_v11 }
0x10f1   :  { %v3611_v7 = vsub.f32 %v3603_v5, %v3609_v60  ;;  %v3612_v21 = vmul.f32 %v6003_v17, %v3610_v45 }
0x10f3   :  { %v3614_v12 = vmul.f32 %v3612_v21, %v3612_v21  ;;  %v3613_v3 = vmul.f32 %v6003_v17, %v3611_v7 }
0x10f5   :  { %3616 = vadd.xlane.f32.xlu0 %v3614_v12  ;;  %v3615_v46 = vmul.f32 %v3613_v3, %v3613_v3 }
0x10f7   :  { %3618 = vadd.xlane.f32.xlu1 %v3615_v46 }
0x1182   :  { %v3617_v28 = vpop.xlane.xlu0 %3616 }
0x1183   :  { %v3620_v29 = vmul.f32 0.03125, %v3617_v28 }
0x1184   :  { %v3619_v36 = vpop.xlane.xlu1 %3618 }
0x1185   :  { %v3622_v2 = vadd.f32 1e-12, %v3620_v29  ;;  %v3621_v38 = vmul.f32 0.03125, %v3619_v36 }
0x1187   :  { %5383 = vrsqrt.f32 %v3622_v2  ;;  %v3623_v42 = vadd.f32 1e-12, %v3621_v38 }
0x1189   :  { %5385 = vrsqrt.f32 %v3623_v42 }
0x1191   :  { %v5384_v18 = vpop.eup %5383 }
0x1192   :  { %v3626_v49 = vmul.f32 %v5384_v18, %v3612_v21  ;;  %v4515_v21 = vld [vmem:[#allocation11 + $0x1] ss:$0 sm:$0xff] }
0x1193   :  { %v5386_v22 = vpop.eup %5385 }
0x1194   :  { %v3627_v52 = vmul.f32 %v5386_v22, %v3613_v3  ;;  %v3634_v54 = vmul.f32 %v4472_v20, %v3626_v49 }
0x1196   :  { %v3635_v32 = vmul.f32 %v4472_v20, %v3627_v52  ;;  %v6541_v40 = vadd.f32 %v4473_v33, %v3634_v54  ;;  %v5288_v52 = vld [vmem:[#allocation16 + $0x8] sm:$0xff]   ;;  %v5289_v54 = vld [vmem:[#allocation16 + $0x10] sm:$0xff]  }
0x1198   :  { %v6543_v55 = vadd.f32 %v4473_v33, %v3635_v32  ;;  %v5290_v33 = vld [vmem:[#allocation16 + $0x18] sm:$0xff]   ;;  %v5291_v32 = vld [vmem:[#allocation16 + $0x20] sm:$0xff]  }
0x119a   :  { %v3661_v31 = vpack.c.bf16 %v6543_v55, %v6541_v40 }
0x119c   :  { %4842 = vmatmul.mubr.bf16.vlgmr.msra.gmra.mrb[52].mxu0 %v3661_v31  ;;  %v5295_v31 = vld [vmem:[#allocation19] sm:$0xff]  }
0x119d   :  { %4881 = vmatprep.mubr.msk.bf16.mxu0 %vm5723_vm2, %v5721_v16  ;;  %4866 = vmatpush3.bf16.msra.mxu0 %v5287_v25 }
0x119e   :  { %4867 = vmatprep.subr.bf16.mxu0 %v5721_v16 }
0x11a1   :  { %4868 = vmatpush3.bf16.msra.mxu0 %v5288_v52 }
0x11a2   :  { %4869 = vmatprep.subr.bf16.mxu0 %v5721_v16 }
0x11a5   :  { %4870 = vmatpush3.bf16.msra.mxu0 %v5289_v54 }
0x11a6   :  { %4871 = vmatprep.subr.bf16.mxu0 %v5721_v16 }
0x11a9   :  { %4872 = vmatpush3.bf16.msra.mxu0 %v5290_v33 }
0x11aa   :  { %4873 = vmatprep.subr.bf16.mxu0 %v5721_v16 }
0x11ad   :  { %4874 = vmatpush3.bf16.msra.mxu0 %v5291_v32 }
0x11ae   :  { %4875 = vmatprep.subr.bf16.mxu0 %v5721_v16 }
0x126f   :  { %v3752_v34 = vpop.f32.mrb[52].mxu0 }
0x1270   :  { %v3753_v41 = vadd.f32 %v4490_v50, %v3752_v34  ;;  %v4843_v37 = vpop.f32.mrb[53].mxu0 }
0x1271   :  { %v3755_v53 = vpop.f32.mrb[54].mxu0 }
0x1272   :  { %v3761_v26 = vmul.f32 0.044715, %v3753_v41  ;;  %v3756_v30 = vadd.f32 %v4490_v50, %v3755_v53  ;;  %v4844_v39 = vpop.f32.mrb[55].mxu0  ;;  %v3759_v10 = vmul.f32 0.5, %v3753_v41  ;;  %v4524_v53 = vld [vmem:[#allocation13 + $0x1] ss:$0 sm:$0xff] }
0x1274   :  { %v3763_v43 = vmul.f32 %v3761_v26, %v3753_v41  ;;  %v3762_v61 = vmul.f32 0.044715, %v3756_v30  ;;  %v3760_v63 = vmul.f32 0.5, %v3756_v30 }
0x1276   :  { %v3765_v62 = vmul.f32 %v3763_v43, %v3753_v41  ;;  %v3764_v59 = vmul.f32 %v3762_v61, %v3756_v30  ;;  %v4525_v43 = vld [vmem:[#allocation14 + $0x1] ss:$0 sm:$0xff] }
0x1278   :  { %v3767_v0 = vadd.f32 %v3765_v62, %v3753_v41  ;;  %v3766_v1 = vmul.f32 %v3764_v59, %v3756_v30 }
0x127a   :  { %v3769_v6 = vmul.f32 0.7978846, %v3767_v0  ;;  %v3768_v51 = vadd.f32 %v3766_v1, %v3756_v30 }
0x127c   :  { %5387 = vtanh.f32 %v3769_v6  ;;  %v3770_v9 = vmul.f32 0.7978846, %v3768_v51  ;;  %v5299_v6 = vld [vmem:[#allocation19 + $0x20] sm:$0xff]   ;;  %v5300_v51 = vld [vmem:[#allocation19 + $0x28] sm:$0xff]  }
0x127e   :  { %5389 = vtanh.f32 %v3770_v9  ;;  %v5301_v9 = vld [vmem:[#allocation19 + $0x30] sm:$0xff]  }
0x1286   :  { %v5388_v5 = vpop.eup %5387 }
0x1287   :  { %v3773_v8 = vadd.f32 1.0, %v5388_v5  ;;  %v5302_v5 = vld [vmem:[#allocation19 + $0x38] sm:$0xff]  }
0x1288   :  { %v5390_v44 = vpop.eup %5389 }
0x1289   :  { %v3774_v11 = vadd.f32 1.0, %v5390_v44  ;;  %v3775_v45 = vmul.f32 %v3773_v8, %v3759_v10  ;;  %v4526_v8 = vld [vmem:[#allocation17] ss:$0 sm:$0xff] }
0x128b   :  { %v3776_v60 = vmul.f32 %v3774_v11, %v3760_v63 }
0x128d   :  { %v3794_v7 = vpack.c.bf16 %v3776_v60, %v3775_v45 }
0x128f   :  { %4862 = vmatmul.mubr.bf16.vlgmr.msra.gmra.mrb[52].mxu1 %v3794_v7 }
0x1290   :  { %4901 = vmatprep.mubr.msk.bf16.mxu1 %vm5723_vm2, %v5721_v16  ;;  %4886 = vmatpush3.bf16.msra.mxu1 %v5295_v31 }
0x1291   :  { %4887 = vmatprep.subr.bf16.mxu1 %v5721_v16 }
0x1294   :  { %4888 = vmatpush3.bf16.msra.mxu1 %v5296_v48 }
0x1295   :  { %4889 = vmatprep.subr.bf16.mxu1 %v5721_v16 }
0x1298   :  { %4890 = vmatpush3.bf16.msra.mxu1 %v5297_v19 }
0x1299   :  { %4891 = vmatprep.subr.bf16.mxu1 %v5721_v16 }
0x129c   :  { %4892 = vmatpush3.bf16.msra.mxu1 %v5298_v56 }
0x129d   :  { %4893 = vmatprep.subr.bf16.mxu1 %v5721_v16 }
0x12a0   :  { %4894 = vmatpush3.bf16.msra.mxu1 %v5299_v6 }
0x12a1   :  { %4895 = vmatprep.subr.bf16.mxu1 %v5721_v16 }
0x12a4   :  { %4896 = vmatpush3.bf16.msra.mxu1 %v5300_v51 }
0x12a5   :  { %4897 = vmatprep.subr.bf16.mxu1 %v5721_v16 }
0x12a8   :  { %4898 = vmatpush3.bf16.msra.mxu1 %v5301_v9 }
0x12a9   :  { %4899 = vmatprep.subr.bf16.mxu1 %v5721_v16 }
0x12ac   :  { %4900 = vmatpush3.bf16.msra.mxu1 %v5302_v5 }
0x1362   :  { %v3885_v12 = vpop.f32.mrb[52].mxu1 }
0x1363   :  { %v3886_v3 = vadd.f32 %v4515_v21, %v3885_v12  ;;  %v4863_v46 = vpop.f32.mrb[53].mxu1  ;;  %v4535_v12 = vld [vmem:[#allocation20] ss:$0 sm:$0xff] }
0x1364   :  { %v3888_v23 = vpop.f32.mrb[54].mxu1 }
0x1365   :  { %v3889_v14 = vadd.f32 %v4515_v21, %v3888_v23  ;;  %v4864_v47 = vpop.f32.mrb[55].mxu1  ;;  %v3896_v24 = vadd.f32 %v3886_v3, %v6541_v40  ;;  %v5293_v40 = vld [vmem:[#allocation16 + $0x30] sm:$0xff]   ;;  %v4544_v21 = vsel %vm4168_vm7, 1.0, %v5721_v16 }
0x1366   :  { %v4171_v3 = vmul.f32 -1e+09, %v4544_v21 }
0x1367   :  { %3898 = vadd.xlane.f32.xlu1 %v3896_v24  ;;  %v3897_v4 = vadd.f32 %v3889_v14, %v6543_v55  ;;  %v5294_v55 = vld [vmem:[#allocation16 + $0x38] sm:$0xff]  }
0x1369   :  { %3900 = vadd.xlane.f32.xlu0 %v3897_v4 }
0x13f4   :  { %v3899_v28 = vpop.xlane.xlu1 %3898 }
0x13f5   :  { %v3902_v29 = vmul.f32 0.03125, %v3899_v28 }
0x13f6   :  { %v3901_v36 = vpop.xlane.xlu0 %3900 }
0x13f7   :  { %v3904_v2 = vsub.f32 %v3896_v24, %v3902_v29  ;;  %v3903_v38 = vmul.f32 0.03125, %v3901_v36 }
0x13f9   :  { %v3905_v42 = vsub.f32 %v3897_v4, %v3903_v38  ;;  %v3906_v18 = vmul.f32 %v6003_v17, %v3904_v2 }
0x13fb   :  { %v3908_v20 = vmul.f32 %v3906_v18, %v3906_v18  ;;  %v3907_v49 = vmul.f32 %v6003_v17, %v3905_v42  ;;  %v5292_v17 = vld [vmem:[#allocation16 + $0x28] sm:$0xff]  }
0x13fc   :  { %4876 = vmatpush3.bf16.msra.mxu0 %v5292_v17 }
0x13fd   :  { %3910 = vadd.xlane.f32.xlu1 %v3908_v20  ;;  %v3909_v22 = vmul.f32 %v3907_v49, %v3907_v49  ;;  %4877 = vmatprep.subr.bf16.mxu0 %v5721_v16 }
0x13ff   :  { %3912 = vadd.xlane.f32.xlu0 %v3909_v22 }
0x1400   :  { %4878 = vmatpush3.bf16.msra.mxu0 %v5293_v40 }
0x1401   :  { %4879 = vmatprep.subr.bf16.mxu0 %v5721_v16 }
0x1404   :  { %4880 = vmatpush3.bf16.msra.mxu0 %v5294_v55 }
0x148a   :  { %v3911_v57 = vpop.xlane.xlu1 %3910 }
0x148b   :  { %v3914_v58 = vmul.f32 0.03125, %v3911_v57 }
0x148c   :  { %v3913_v27 = vpop.xlane.xlu0 %3912 }
0x148d   :  { %v3916_v35 = vadd.f32 1e-12, %v3914_v58  ;;  %v3915_v15 = vmul.f32 0.03125, %v3913_v27 }
0x148f   :  { %5391 = vrsqrt.f32 %v3916_v35  ;;  %v3917_v50 = vadd.f32 1e-12, %v3915_v15 }
0x1491   :  { %5393 = vrsqrt.f32 %v3917_v50 }
0x1499   :  { %v5392_v34 = vpop.eup %5391 }
0x149a   :  { %v3920_v41 = vmul.f32 %v5392_v34, %v3906_v18 }
0x149b   :  { %v5394_v37 = vpop.eup %5393 }
0x149c   :  { %v3921_v26 = vmul.f32 %v5394_v37, %v3907_v49  ;;  %v3928_v39 = vmul.f32 %v4524_v53, %v3920_v41 }
0x149e   :  { %v3929_v30 = vmul.f32 %v4524_v53, %v3921_v26  ;;  %v3936_v62 = vadd.f32 %v4525_v43, %v3928_v39 }
0x14a0   :  { %v3937_v61 = vadd.f32 %v4525_v43, %v3929_v30 }
0x14a2   :  { %v3939_v59 = vrot.slane %v3937_v61, 7 }
0x14a4   :  { %v3942_v0 = vsel %vm3941_vm6, %v3936_v62, %v3939_v59 }
0x14a5   :  { %v3959_v1 = vpack.c.bf16 %v3942_v0, %v3942_v0 }
0x14a7   :  { %4882 = vmatmul.mubr.bf16.vlgmr.msra.gmra.mrb[56].mxu0 %v3959_v1 }
0x157a   :  { %v4049_v44 = vpop.f32.mrb[56].mxu0 }
0x157b   :  { %v4050_v10 = vadd.f32 %v4526_v8, %v4049_v44  ;;  %v4883_v63 = vpop.f32.mrb[57].mxu0 }
0x157c   :  { %v4052_v11 = vpop.f32.mrb[58].mxu0 }
0x157d   :  { %5395 = vtanh.f32 %v4050_v10  ;;  %v4884_v45 = vpop.f32.mrb[59].mxu0 }
0x1587   :  { %v5396_v60 = vpop.eup %5395 }
0x1588   :  { %v4072_v7 = vpack.c.bf16 %v5396_v60, %v5396_v60 }
0x158a   :  { %4902 = vmatmul.mubr.bf16.vlgmr.msra.gmra.mrb[56].mxu1 %v4072_v7 }
0x165d   :  { %v4162_v46 = vpop.f32.mrb[56].mxu1 }
0x165e   :  { %v4163_v23 = vadd.f32 %v4535_v12, %v4162_v46  ;;  %v4903_v14 = vpop.f32.mrb[57].mxu1 }
0x165f   :  { %v4165_v47 = vpop.f32.mrb[58].mxu1 }
0x1660   :  { %v4904_v24 = vpop.f32.mrb[59].mxu1  ;;  %v4172_v4 = vadd.f32 %v4171_v3, %v4163_v23 }
0x1662   :  { %v4174_v25 = vsel %vm4173_vm8, %v4172_v4, -inf }
0x1663   :  { %4175 = vmax.xlane.f32.xlu0 %v4174_v25 }
0x16f0   :  { %v4176_v28 = vpop.xlane.xlu0 %4175 }
0x16f1   :  { %v4177_v29 = vsub.f32 %v4172_v4, %v4176_v28 }
0x16f3   :  { %v4178_v36 = vmul.f32 1.442695, %v4177_v29 }
0x16f5   :  { %5397 = vpow2.f32 %v4178_v36 }
0x16ff   :  { %v5398_v2 = vpop.eup %5397 }
0x1700   :  { %v4180_v38 = vsel %vm4173_vm8, %v5398_v2, 0.0 }
0x1701   :  { %4181 = vadd.xlane.f32.xlu1 %v4180_v38 }
0x178e   :  { %v4182_v13 = vpop.xlane.xlu1 %4181 }
0x178f   :  { %5399 = vrcp.f32 %v4182_v13 }
0x1799   :  { %v5400_v16 = vpop.eup %5399 }
0x179a   :  { %v4184_v42 = vmul.f32 %v5400_v16, %v5398_v2 }
0x179c   :  { %4185 = vst [vmem:[#allocation22] sm:$0x3] %v4184_v42 }
0x179d   :  { %5676 = shalt.err (!%p5673_p2)
}
0x179e   :  { %s6654_s28 = sld [smem:[#allocation37_spill]] }
0x17a4   :  { %s5677_s17 = scalar_lea.hbm %s6654_s28, 32 }
0x17a5   :  { %p5678_p3 = scmp.ne.s32.totalorder %s6654_s28, %s5677_s17  ;;  %p5681_p4 = scmp.lt.u32.totalorder %s5677_s17, %s6654_s28 }
0x17a7   :  { %p5683_p5 = pnand %p5681_p4, %p5678_p3 }
0x17a9   :  { %5686 = shalt.err (!%p5683_p5)
}
0x17aa   :  { %4195 = dma.vmem_to_hbm [thread:$0]  %s4193_s23, 32, %s6654_s28, [#allocation4]  }
0x17ab   :  { %5701 = dma.done.wait [#allocation4], 32  }
0x17ac   :  { %5702 = vsyncadd [#allocation4], 4294967264 }
0x17ad   :  { %4199 = vsyncpa [#allocation3], 1 }
0x17ae   :  { %4200 = vsyncpa [#allocation6], 1 }
0x17af   :  { %4201 = vsyncpa [#allocation9], 1 }
0x17b0   :  { %4202 = vsyncpa [#allocation12], 1 }
0x17b1   :  { %4203 = vsyncpa [#allocation15], 1 }
0x17b2   :  { %4204 = vsyncpa [#allocation18], 1 }
0x17b3   :  { %4205 = vsyncpa [#allocation21], 1 }
0x17b4   :  { %4206 = vsyncpa [#allocation4], 1 }

</bundles_post_ra>
